<compile_context>
chip_gen: v7x
topology: tpu7x:2x2x1
jax: 0.10.0
libtpu: 0.0.40
codegen_flags: <defaults>
</compile_context>

<pallas_src>
import math
from functools import partial

import jax
import jax.numpy as jnp
from jax.experimental import pallas as pl
from jax.experimental.pallas import tpu as pltpu

# ----------------------- small ESM2-style config -----------------------------
VOCAB = 33          # ESM alphabet size
EMBED = 32
HEADS = 4
HEAD_DIM = EMBED // HEADS
FFN = 128           # 4 * EMBED, ESM convention
NUM_LAYERS = 2
SEQ = 8
BATCH = 2
PAD_IDX = 1
MASK_IDX = 32
EPS = 1e-5
SCALING = HEAD_DIM ** -0.5

# ------------------- packed f32 parameter-slab row layout ---------------------
PSLAB_W = max(FFN, 3 * EMBED)                      # 128 lanes per row
ROWS_PER_LAYER = 8
R_LN1G, R_LN1B, R_BQKV, R_BO, R_LN2G, R_LN2B, R_B1, R_B2 = range(ROWS_PER_LAYER)
R_LNF_G = NUM_LAYERS * ROWS_PER_LAYER
R_LNF_B = R_LNF_G + 1
PSLAB_ROWS = R_LNF_B + 1


# ----------------------------- shared math helpers ----------------------------
def _layer_norm_ref(x, g, b):
    # Standard LayerNorm (reference form), f32 math.
    mu = jnp.mean(x, axis=-1, keepdims=True)
    var = jnp.mean(jnp.square(x - mu), axis=-1, keepdims=True)
    return (x - mu) * jax.lax.rsqrt(var + EPS) * g + b


def _gelu_erf(x):
    # ESM exact (erf) GELU.
    return x * 0.5 * (1.0 + jax.lax.erf(x * (1.0 / math.sqrt(2.0))))


# --------------------- fully fused ESM2 forward kernel ------------------------
def esm2_fused_kernel(x_ref, rot_ref, kbias_ref, pslab_ref,
                      wqkv_ref, wo_ref, w1_ref, w2_ref, o_ref,
                      *, batch, seq, heads, head_dim, num_layers):
    bt, embed = x_ref.shape
    ffn = w1_ref.shape[-1]
    half = head_dim // 2

    x = x_ref[...]                       # (B*T, E) f32 activations, VMEM-resident
    cos = rot_ref[0]                     # (B*T, E) rotary cos, tiled per head/batch
    sin_lo = rot_ref[1]                  # (B*T, E) -sin on lower half-head lanes, 0 elsewhere
    sin_hi = rot_ref[2]                  # (B*T, E)  sin on upper half-head lanes, 0 elsewhere
    # hoisted once: layer- & head-invariant additive key-padding bias
    kbias = jnp.broadcast_to(kbias_ref[...], (batch, seq, seq))          # (B, T, T)

    def prow(r, w):
        # static row/lane slice of the packed f32 parameter slab -> (1, w)
        return pslab_ref[r:r + 1, :w]

    def layer_norm(v, g, b):
        # var = E[v^2] - mean^2 -> two independent cross-lane reductions;
        # rsqrt * g fused into one multiplier.
        mu = jnp.mean(v, axis=-1, keepdims=True)
        ms = jnp.mean(v * v, axis=-1, keepdims=True)
        return (v - mu) * (jax.lax.rsqrt(ms - mu * mu + EPS) * g) + b

    def rope(u):
        # rotate_half == per-head roll by D/2 with sign [-1]*D/2 + [+1]*D/2,
        # done as two full-width lane rolls (XLU slot); cross-head wrap elements
        # are zeroed by the sign-folded sin tables built in the wrapper.
        return (u * cos
                + pltpu.roll(u, shift=embed - half, axis=1) * sin_lo
                + pltpu.roll(u, shift=half, axis=1) * sin_hi)

    for li in range(num_layers):         # static unroll; all layer weights in VMEM
        base = li * ROWS_PER_LAYER

        # ---------------- self-attention block (pre-LN) ----------------
        h = layer_norm(x, prow(base + R_LN1G, embed), prow(base + R_LN1B, embed))
        # fused QKV projection: one (B*T,E)@(E,3E) MXU dot per layer; SCALING is
        # pre-folded into the q-part of wqkv/bqkv on the host.
        qkv = jnp.dot(h.astype(jnp.bfloat16), wqkv_ref[li],
                      preferred_element_type=jnp.float32) + prow(base + R_BQKV, 3 * embed)
        q = rope(qkv[:, 0:embed])
        k = rope(qkv[:, embed:2 * embed])
        v = qkv[:, 2 * embed:3 * embed]

        q3 = q.reshape(batch, seq, embed)
        k3 = k.reshape(batch, seq, embed)
        v3 = v.reshape(batch, seq, embed)

        oh_list = []
        for hd in range(heads):          # heads: batched over B per head (validated dot form)
            sl = slice(hd * head_dim, (hd + 1) * head_dim)
            qh = q3[:, :, sl].astype(jnp.bfloat16)           # (B, T, D)
            kh = k3[:, :, sl].astype(jnp.bfloat16)
            vh = v3[:, :, sl].astype(jnp.bfloat16)
            s = jnp.einsum("btd,bsd->bts", qh, kh,
                           preferred_element_type=jnp.float32) + kbias    # (B, T, T)
            s = s - jnp.max(s, axis=-1, keepdims=True)
            p = jnp.exp(s)
            den = jnp.sum(p, axis=-1, keepdims=True)
            r = pl.reciprocal(den, approx=True)              # EUP slot
            r = r * (2.0 - den * r)                          # one Newton step -> ~exact
            p = p * r
            oh = jnp.einsum("bts,bsd->btd", p.astype(jnp.bfloat16), vh,
                            preferred_element_type=jnp.float32)           # (B, T, D)
            oh_list.append(oh.reshape(bt, head_dim))

        # lane-concat the per-head outputs (contiguous lane ranges) and do ONE
        # (B*T,E)@(E,E) output-projection dot instead of 4 K=8 accumulation dots.
        attn = jnp.concatenate(oh_list, axis=-1)             # (B*T, E)
        x = x + jnp.dot(attn.astype(jnp.bfloat16), wo_ref[li],
                        preferred_element_type=jnp.float32) + prow(base + R_BO, embed)

        # ---------------- feed-forward block (pre-LN) ----------------
        h2 = layer_norm(x, prow(base + R_LN2G, embed), prow(base + R_LN2B, embed))
        f = jnp.dot(h2.astype(jnp.bfloat16), w1_ref[li],
                    preferred_element_type=jnp.float32) + prow(base + R_B1, ffn)
        f = _gelu_erf(f)                 # exact erf GELU (ESM semantics) — VPU polynomial
        x = x + jnp.dot(f.astype(jnp.bfloat16), w2_ref[li],
                        preferred_element_type=jnp.float32) + prow(base + R_B2, embed)

    # representations[num_layers] == emb_layer_norm_after(x)
    o_ref[...] = layer_norm(x, prow(R_LNF_G, embed), prow(R_LNF_B, embed))


# ------------------------------- wrapper ---------------------------------------
def rotary_tables_folded(batch, seq, heads, head_dim):
    """Packed (3, B*T, H*D) rotary tables with rotate_half sign/masking folded in."""
    half = head_dim // 2
    inv_freq = 1.0 / (10000.0 ** (jnp.arange(0, head_dim, 2, dtype=jnp.float32) / head_dim))
    t = jnp.arange(seq, dtype=jnp.float32)
    freqs = jnp.einsum("i,j->ij", t, inv_freq)                # (T, D/2)
    emb = jnp.concatenate([freqs, freqs], axis=-1)            # (T, D)
    cos_h, sin_h = jnp.cos(emb), jnp.sin(emb)
    lower = (jnp.arange(head_dim) < half)[None, :]            # (1, D)
    sin_lo_h = jnp.where(lower, -sin_h, 0.0)   # pairs with roll(shift = E - D/2) -> -u[j+D/2]
    sin_hi_h = jnp.where(lower, 0.0, sin_h)    # pairs with roll(shift = D/2)     ->  u[j-D/2]
    tile = lambda a: jnp.tile(a, (batch, heads))              # (T, D) -> (B*T, H*D)
    return jnp.stack([tile(cos_h), tile(sin_lo_h), tile(sin_hi_h)])     # (3, B*T, E)


def _pack_param_slab(params):
    """All small f32 params packed into one (PSLAB_ROWS, 128) slab -> one DMA."""
    def row(v):
        v = jnp.asarray(v, jnp.float32).reshape(-1)
        return jnp.pad(v, (0, PSLAB_W - v.shape[0]))
    rows = []
    for li in range(NUM_LAYERS):
        bqkv = jnp.concatenate(
            [params["bq"][li] * SCALING, params["bk"][li], params["bv"][li]], axis=-1)
        rows += [row(params["ln1_g"][li]), row(params["ln1_b"][li]),
                 row(bqkv), row(params["bo"][li]),
                 row(params["ln2_g"][li]), row(params["ln2_b"][li]),
                 row(params["b1"][li]), row(params["b2"][li])]
    rows += [row(params["ln_f_g"]), row(params["ln_f_b"])]
    return jnp.stack(rows)                                    # (18, 128) f32


def esm2_embed(tokens, params):
    """Embedding lookup + ESM2 token-dropout scaling + padding zeroing (plain-JAX glue)."""
    emb = params["embed_tokens"][tokens]                      # (B, T, E)
    padding_mask = tokens == PAD_IDX
    mask_tok = tokens == MASK_IDX
    x = jnp.where(mask_tok[..., None], 0.0, emb)              # embed_scale = 1
    mask_ratio_train = 0.15 * 0.8
    src_lengths = jnp.maximum(jnp.sum(~padding_mask, axis=-1).astype(x.dtype), 1.0)
    mask_ratio_observed = jnp.sum(mask_tok, axis=-1).astype(x.dtype) / src_lengths
    scale = (1.0 - mask_ratio_train) / jnp.maximum(1.0 - mask_ratio_observed, 1e-6)
    x = x * scale[:, None, None]
    x = x * (1.0 - padding_mask[..., None].astype(x.dtype))
    return x, padding_mask


def esm2_forward(tokens, params):
    B, T = tokens.shape
    x, padding_mask = esm2_embed(tokens, params)
    rot = rotary_tables_folded(B, T, HEADS, HEAD_DIM)                    # (3, B*T, E)
    kbias = (padding_mask.astype(jnp.float32) * -1e9)[:, None, :]        # (B, 1, T)

    bf = lambda w: w.astype(jnp.bfloat16)
    # fused QKV weights with SCALING folded into the q block (host-side, once)
    wqkv = bf(jnp.concatenate(
        [params["wq"] * SCALING, params["wk"], params["wv"]], axis=-1))  # (L, E, 3E)
    pslab = _pack_param_slab(params)

    args = [x.reshape(B * T, EMBED), rot, kbias, pslab,
            wqkv, bf(params["wo"]), bf(params["w1"]), bf(params["w2"])]

    kernel = partial(esm2_fused_kernel, batch=B, seq=T, heads=HEADS,
                     head_dim=HEAD_DIM, num_layers=NUM_LAYERS)
    out = pl.pallas_call(
        kernel,
        out_shape=jax.ShapeDtypeStruct((B * T, EMBED), jnp.float32),
        # no grid: single invocation, full arrays resident in VMEM (no pipeline machinery)
        in_specs=[pl.BlockSpec(memory_space=pltpu.MemorySpace.VMEM)] * len(args),
        out_specs=pl.BlockSpec(memory_space=pltpu.MemorySpace.VMEM),
    )(*args)
    return out.reshape(B, T, EMBED)


# ------------------------- parameter construction -----------------------------
def init_params(key):
    def nrm(k, shape, scale=0.02):
        return scale * jax.random.normal(k, shape, dtype=jnp.float32)

    ks = jax.random.split(key, 7)
    L = NUM_LAYERS
    return {
        "embed_tokens": nrm(ks[0], (VOCAB, EMBED)),
        # per-layer params stacked along a leading layer axis; linear weights are
        # stored PRE-TRANSPOSED as (in, out) so kernels compute y = x @ W + b.
        "ln1_g": jnp.ones((L, 1, EMBED), jnp.float32), "ln1_b": jnp.zeros((L, 1, EMBED), jnp.float32),
        "wq": nrm(ks[1], (L, EMBED, EMBED)), "bq": jnp.zeros((L, 1, EMBED), jnp.float32),
        "wk": nrm(ks[2], (L, EMBED, EMBED)), "bk": jnp.zeros((L, 1, EMBED), jnp.float32),
        "wv": nrm(ks[3], (L, EMBED, EMBED)), "bv": jnp.zeros((L, 1, EMBED), jnp.float32),
        "wo": nrm(ks[4], (L, EMBED, EMBED)), "bo": jnp.zeros((L, 1, EMBED), jnp.float32),
        "ln2_g": jnp.ones((L, 1, EMBED), jnp.float32), "ln2_b": jnp.zeros((L, 1, EMBED), jnp.float32),
        "w1": nrm(ks[5], (L, EMBED, FFN)), "b1": jnp.zeros((L, 1, FFN), jnp.float32),
        "w2": nrm(ks[6], (L, FFN, EMBED)), "b2": jnp.zeros((L, 1, EMBED), jnp.float32),
        "ln_f_g": jnp.ones((1, EMBED), jnp.float32), "ln_f_b": jnp.zeros((1, EMBED), jnp.float32),
    }


# ------------------------- pure-JAX reference ----------------------------------
def esm2_forward_ref(tokens, params):
    """Plain-JAX mirror of the module math (same bf16 casts at every MXU dot)."""
    B, T = tokens.shape
    x, padding_mask = esm2_embed(tokens, params)              # (B, T, E) f32
    D = HEAD_DIM
    inv_freq = 1.0 / (10000.0 ** (jnp.arange(0, D, 2, dtype=jnp.float32) / D))
    t = jnp.arange(T, dtype=jnp.float32)
    emb = jnp.concatenate([jnp.einsum("i,j->ij", t, inv_freq)] * 2, axis=-1)   # (T, D)
    cos = jnp.cos(emb)[None, :, None, :]
    sin = jnp.sin(emb)[None, :, None, :]
    kbias = (padding_mask.astype(jnp.float32) * -1e9)[:, None, None, :]        # (B,1,1,T)

    def rotate_half(u):
        return jnp.concatenate([-u[..., D // 2:], u[..., :D // 2]], axis=-1)

    bf = jnp.bfloat16
    for li in range(NUM_LAYERS):
        h = _layer_norm_ref(x, params["ln1_g"][li], params["ln1_b"][li])
        hb = h.astype(bf)
        proj = lambda w, b: jnp.einsum("bte,ef->btf", hb, w[li].astype(bf),
                                       preferred_element_type=jnp.float32) + b[li]
        q = proj(params["wq"], params["bq"]) * SCALING
        k = proj(params["wk"], params["bk"])
        v = proj(params["wv"], params["bv"])
        q4 = q.reshape(B, T, HEADS, D); k4 = k.reshape(B, T, HEADS, D); v4 = v.reshape(B, T, HEADS, D)
        q4 = q4 * cos + rotate_half(q4) * sin
        k4 = k4 * cos + rotate_half(k4) * sin
        s = jnp.einsum("bthd,bshd->bhts", q4.astype(bf), k4.astype(bf),
                       preferred_element_type=jnp.float32) + kbias
        s = s - jnp.max(s, axis=-1, keepdims=True)
        p = jnp.exp(s)
        p = p / jnp.sum(p, axis=-1, keepdims=True)
        attn = jnp.einsum("bhts,bshd->bthd", p.astype(bf), v4.astype(bf),
                          preferred_element_type=jnp.float32).reshape(B, T, EMBED)
        out = jnp.einsum("bte,ef->btf", attn.astype(bf), params["wo"][li].astype(bf),
                         preferred_element_type=jnp.float32) + params["bo"][li]
        x = x + out
        h2 = _layer_norm_ref(x, params["ln2_g"][li], params["ln2_b"][li])
        f = jnp.einsum("bte,ef->btf", h2.astype(bf), params["w1"][li].astype(bf),
                       preferred_element_type=jnp.float32) + params["b1"][li]
        f = _gelu_erf(f)
        x = x + jnp.einsum("btf,fe->bte", f.astype(bf), params["w2"][li].astype(bf),
                           preferred_element_type=jnp.float32) + params["b2"][li]
    return _layer_norm_ref(x, params["ln_f_g"], params["ln_f_b"])


# ---------------------------------- main ---------------------------------------
if __name__ == "__main__":
    key = jax.random.PRNGKey(0)
    k_tok, k_par = jax.random.split(key)
    # standard amino-acid token ids live in [4, 24); avoids PAD_IDX=1 / MASK_IDX=32
    tokens = jax.random.randint(k_tok, (BATCH, SEQ), 4, 24, dtype=jnp.int32)
    params = init_params(k_par)

    residue_feature = jax.jit(esm2_forward)(tokens, params)
    jax.block_until_ready(residue_feature)
    assert residue_feature.shape == (BATCH, SEQ, EMBED)
    assert residue_feature.dtype == jnp.float32

    # correctness check against the pure-JAX reference (tolerance tightened vs the
    # previous 5e-2; remaining slack covers bf16(W*scale) vs bf16(W)*scale, the
    # Newton-refined reciprocal, and transcendental lowering differences)
    ref = esm2_forward_ref(tokens, params)
    err = float(jnp.max(jnp.abs(residue_feature - ref)))
    assert err < 2e-2, f"kernel/reference mismatch: max abs err = {err}"

    print("KERNEL_OK")
</pallas_src>

<mosaic_0001>
module attributes {stable_mosaic.version = 11 : i64} {
  func.func @esm2_fused_kernel(%arg0: memref<16x32xf32, #tpu.memory_space<vmem>>, %arg1: memref<3x16x32xf32, #tpu.memory_space<vmem>>, %arg2: memref<2x1x8xf32, #tpu.memory_space<vmem>>, %arg3: memref<18x128xf32, #tpu.memory_space<vmem>>, %arg4: memref<2x32x96xbf16, #tpu.memory_space<vmem>>, %arg5: memref<2x32x32xbf16, #tpu.memory_space<vmem>>, %arg6: memref<2x32x128xbf16, #tpu.memory_space<vmem>>, %arg7: memref<2x128x32xbf16, #tpu.memory_space<vmem>>, %arg8: memref<16x32xf32, #tpu.memory_space<vmem>>) attributes {dimension_semantics = [], scalar_prefetch = 0 : i64, scratch_operands = 0 : i64, tpu.core_type = #tpu.core_type<tc>} {
    %c0 = arith.constant 0 : index
    %c0_0 = arith.constant 0 : index
    %0 = vector.load %arg0[%c0, %c0_0] : memref<16x32xf32, #tpu.memory_space<vmem>>, vector<16x32xf32>
    %c0_1 = arith.constant 0 : index
    %c0_2 = arith.constant 0 : index
    %c0_3 = arith.constant 0 : index
    %1 = vector.load %arg1[%c0_1, %c0_2, %c0_3] : memref<3x16x32xf32, #tpu.memory_space<vmem>>, vector<1x16x32xf32>
    %2 = vector.shape_cast %1 : vector<1x16x32xf32> to vector<16x32xf32>
    %c1 = arith.constant 1 : index
    %c0_4 = arith.constant 0 : index
    %c0_5 = arith.constant 0 : index
    %3 = vector.load %arg1[%c1, %c0_4, %c0_5] : memref<3x16x32xf32, #tpu.memory_space<vmem>>, vector<1x16x32xf32>
    %4 = vector.shape_cast %3 : vector<1x16x32xf32> to vector<16x32xf32>
    %c2 = arith.constant 2 : index
    %c0_6 = arith.constant 0 : index
    %c0_7 = arith.constant 0 : index
    %5 = vector.load %arg1[%c2, %c0_6, %c0_7] : memref<3x16x32xf32, #tpu.memory_space<vmem>>, vector<1x16x32xf32>
    %6 = vector.shape_cast %5 : vector<1x16x32xf32> to vector<16x32xf32>
    %c0_8 = arith.constant 0 : index
    %c0_9 = arith.constant 0 : index
    %c0_10 = arith.constant 0 : index
    %7 = vector.load %arg2[%c0_8, %c0_9, %c0_10] : memref<2x1x8xf32, #tpu.memory_space<vmem>>, vector<2x1x8xf32>
    %8 = vector.shape_cast %7 : vector<2x1x8xf32> to vector<2x1x8xf32>
    %9 = vector.broadcast %8 : vector<2x1x8xf32> to vector<2x8x8xf32>
    %c0_11 = arith.constant 0 : index
    %c0_12 = arith.constant 0 : index
    %10 = vector.load %arg3[%c0_11, %c0_12] : memref<18x128xf32, #tpu.memory_space<vmem>>, vector<1x32xf32>
    %c1_13 = arith.constant 1 : index
    %c0_14 = arith.constant 0 : index
    %11 = vector.load %arg3[%c1_13, %c0_14] : memref<18x128xf32, #tpu.memory_space<vmem>>, vector<1x32xf32>
    %cst = arith.constant dense<0.000000e+00> : vector<16xf32>
    %12 = vector.multi_reduction <add>, %0, %cst [1] : vector<16x32xf32> to vector<16xf32>
    %13 = vector.shape_cast %12 : vector<16xf32> to vector<16x1xf32>
    %cst_15 = arith.constant 3.200000e+01 : f32
    %14 = vector.broadcast %cst_15 : f32 to vector<16x1xf32>
    %15 = arith.divf %13, %14 : vector<16x1xf32>
    %16 = arith.mulf %0, %0 : vector<16x32xf32>
    %cst_16 = arith.constant dense<0.000000e+00> : vector<16xf32>
    %17 = vector.multi_reduction <add>, %16, %cst_16 [1] : vector<16x32xf32> to vector<16xf32>
    %18 = vector.shape_cast %17 : vector<16xf32> to vector<16x1xf32>
    %cst_17 = arith.constant 3.200000e+01 : f32
    %19 = vector.broadcast %cst_17 : f32 to vector<16x1xf32>
    %20 = arith.divf %18, %19 : vector<16x1xf32>
    %21 = vector.broadcast %15 : vector<16x1xf32> to vector<16x32xf32>
    %22 = arith.subf %0, %21 : vector<16x32xf32>
    %23 = arith.mulf %15, %15 : vector<16x1xf32>
    %24 = arith.subf %20, %23 : vector<16x1xf32>
    %cst_18 = arith.constant 9.99999974E-6 : f32
    %25 = vector.broadcast %cst_18 : f32 to vector<16x1xf32>
    %26 = arith.addf %24, %25 : vector<16x1xf32>
    %27 = math.rsqrt %26 : vector<16x1xf32>
    %28 = vector.broadcast %27 : vector<16x1xf32> to vector<16x32xf32>
    %29 = vector.broadcast %10 : vector<1x32xf32> to vector<16x32xf32>
    %30 = arith.mulf %28, %29 : vector<16x32xf32>
    %31 = arith.mulf %22, %30 : vector<16x32xf32>
    %32 = vector.broadcast %11 : vector<1x32xf32> to vector<16x32xf32>
    %33 = arith.addf %31, %32 : vector<16x32xf32>
    %34 = arith.truncf %33 : vector<16x32xf32> to vector<16x32xbf16>
    %c0_19 = arith.constant 0 : index
    %c0_20 = arith.constant 0 : index
    %c0_21 = arith.constant 0 : index
    %35 = vector.load %arg4[%c0_19, %c0_20, %c0_21] : memref<2x32x96xbf16, #tpu.memory_space<vmem>>, vector<1x32x96xbf16>
    %36 = vector.shape_cast %35 : vector<1x32x96xbf16> to vector<32x96xbf16>
    %cst_22 = arith.constant dense<0.000000e+00> : vector<16x96xf32>
    %37 = tpu.matmul %34, %36, %cst_22 {dimension_numbers = #tpu.dot_dimension_numbers<[1], [0], [0], [1], [0, 0, 1, 1], [], []>} : vector<16x32xbf16>, vector<32x96xbf16>, vector<16x96xf32> -> vector<16x96xf32>
    %c2_23 = arith.constant 2 : index
    %c0_24 = arith.constant 0 : index
    %38 = vector.load %arg3[%c2_23, %c0_24] : memref<18x128xf32, #tpu.memory_space<vmem>>, vector<1x96xf32>
    %39 = vector.broadcast %38 : vector<1x96xf32> to vector<16x96xf32>
    %40 = arith.addf %37, %39 : vector<16x96xf32>
    %41 = vector.extract_strided_slice %40 {offsets = [0, 0], sizes = [16, 32], strides = [1, 1]} : vector<16x96xf32> to vector<16x32xf32>
    %42 = arith.mulf %41, %2 : vector<16x32xf32>
    %c28_i32 = arith.constant 28 : i32
    %43 = tpu.dynamic_rotate %41 by %c28_i32 dim 1 : vector<16x32xf32>, i32 -> vector<16x32xf32>
    %44 = arith.mulf %43, %4 : vector<16x32xf32>
    %45 = arith.addf %42, %44 : vector<16x32xf32>
    %c4_i32 = arith.constant 4 : i32
    %46 = tpu.dynamic_rotate %41 by %c4_i32 dim 1 : vector<16x32xf32>, i32 -> vector<16x32xf32>
    %47 = arith.mulf %46, %6 : vector<16x32xf32>
    %48 = arith.addf %45, %47 : vector<16x32xf32>
    %49 = vector.extract_strided_slice %40 {offsets = [0, 32], sizes = [16, 32], strides = [1, 1]} : vector<16x96xf32> to vector<16x32xf32>
    %50 = arith.mulf %49, %2 : vector<16x32xf32>
    %c28_i32_25 = arith.constant 28 : i32
    %51 = tpu.dynamic_rotate %49 by %c28_i32_25 dim 1 : vector<16x32xf32>, i32 -> vector<16x32xf32>
    %52 = arith.mulf %51, %4 : vector<16x32xf32>
    %53 = arith.addf %50, %52 : vector<16x32xf32>
    %c4_i32_26 = arith.constant 4 : i32
    %54 = tpu.dynamic_rotate %49 by %c4_i32_26 dim 1 : vector<16x32xf32>, i32 -> vector<16x32xf32>
    %55 = arith.mulf %54, %6 : vector<16x32xf32>
    %56 = arith.addf %53, %55 : vector<16x32xf32>
    %57 = vector.extract_strided_slice %40 {offsets = [0, 64], sizes = [16, 32], strides = [1, 1]} : vector<16x96xf32> to vector<16x32xf32>
    %58 = vector.shape_cast %48 : vector<16x32xf32> to vector<2x8x32xf32>
    %59 = vector.shape_cast %56 : vector<16x32xf32> to vector<2x8x32xf32>
    %60 = vector.shape_cast %57 : vector<16x32xf32> to vector<2x8x32xf32>
    %61 = vector.extract_strided_slice %58 {offsets = [0, 0, 0], sizes = [2, 8, 8], strides = [1, 1, 1]} : vector<2x8x32xf32> to vector<2x8x8xf32>
    %62 = arith.truncf %61 : vector<2x8x8xf32> to vector<2x8x8xbf16>
    %63 = vector.extract_strided_slice %59 {offsets = [0, 0, 0], sizes = [2, 8, 8], strides = [1, 1, 1]} : vector<2x8x32xf32> to vector<2x8x8xf32>
    %64 = arith.truncf %63 : vector<2x8x8xf32> to vector<2x8x8xbf16>
    %65 = vector.extract_strided_slice %60 {offsets = [0, 0, 0], sizes = [2, 8, 8], strides = [1, 1, 1]} : vector<2x8x32xf32> to vector<2x8x8xf32>
    %66 = arith.truncf %65 : vector<2x8x8xf32> to vector<2x8x8xbf16>
    "tpu.trace_start"() <{level = 10 : i32, message = "btd,bsd->bts"}> : () -> ()
    %cst_27 = arith.constant dense<0.000000e+00> : vector<2x8x8xf32>
    %67 = tpu.matmul %62, %64, %cst_27 {dimension_numbers = #tpu.dot_dimension_numbers<[2], [2], [1], [1], [0, 0, 0, 1, 1, 1], [0], [0]>} : vector<2x8x8xbf16>, vector<2x8x8xbf16>, vector<2x8x8xf32> -> vector<2x8x8xf32>
    "tpu.trace_stop"() : () -> ()
    %68 = arith.addf %67, %9 : vector<2x8x8xf32>
    %cst_28 = arith.constant dense<0xFF800000> : vector<2x8xf32>
    %69 = vector.multi_reduction <maximumf>, %68, %cst_28 [2] : vector<2x8x8xf32> to vector<2x8xf32>
    %70 = vector.shape_cast %69 : vector<2x8xf32> to vector<2x8x1xf32>
    %71 = vector.broadcast %70 : vector<2x8x1xf32> to vector<2x8x8xf32>
    %72 = arith.subf %68, %71 : vector<2x8x8xf32>
    %73 = math.exp %72 : vector<2x8x8xf32>
    %cst_29 = arith.constant dense<0.000000e+00> : vector<2x8xf32>
    %74 = vector.multi_reduction <add>, %73, %cst_29 [2] : vector<2x8x8xf32> to vector<2x8xf32>
    %75 = vector.shape_cast %74 : vector<2x8xf32> to vector<2x8x1xf32>
    %76 = tpu.reciprocal %75 {approx = true} : vector<2x8x1xf32> -> vector<2x8x1xf32>
    %77 = arith.mulf %75, %76 : vector<2x8x1xf32>
    %cst_30 = arith.constant 2.000000e+00 : f32
    %78 = vector.broadcast %cst_30 : f32 to vector<2x8x1xf32>
    %79 = arith.subf %78, %77 : vector<2x8x1xf32>
    %80 = arith.mulf %76, %79 : vector<2x8x1xf32>
    %81 = vector.broadcast %80 : vector<2x8x1xf32> to vector<2x8x8xf32>
    %82 = arith.mulf %73, %81 : vector<2x8x8xf32>
    %83 = arith.truncf %82 : vector<2x8x8xf32> to vector<2x8x8xbf16>
    "tpu.trace_start"() <{level = 10 : i32, message = "bts,bsd->btd"}> : () -> ()
    %cst_31 = arith.constant dense<0.000000e+00> : vector<2x8x8xf32>
    %84 = tpu.matmul %83, %66, %cst_31 {dimension_numbers = #tpu.dot_dimension_numbers<[2], [1], [1], [2], [0, 0, 0, 1, 1, 2], [0], [0]>} : vector<2x8x8xbf16>, vector<2x8x8xbf16>, vector<2x8x8xf32> -> vector<2x8x8xf32>
    "tpu.trace_stop"() : () -> ()
    %85 = vector.shape_cast %84 : vector<2x8x8xf32> to vector<16x8xf32>
    %86 = vector.extract_strided_slice %58 {offsets = [0, 0, 8], sizes = [2, 8, 8], strides = [1, 1, 1]} : vector<2x8x32xf32> to vector<2x8x8xf32>
    %87 = arith.truncf %86 : vector<2x8x8xf32> to vector<2x8x8xbf16>
    %88 = vector.extract_strided_slice %59 {offsets = [0, 0, 8], sizes = [2, 8, 8], strides = [1, 1, 1]} : vector<2x8x32xf32> to vector<2x8x8xf32>
    %89 = arith.truncf %88 : vector<2x8x8xf32> to vector<2x8x8xbf16>
    %90 = vector.extract_strided_slice %60 {offsets = [0, 0, 8], sizes = [2, 8, 8], strides = [1, 1, 1]} : vector<2x8x32xf32> to vector<2x8x8xf32>
    %91 = arith.truncf %90 : vector<2x8x8xf32> to vector<2x8x8xbf16>
    "tpu.trace_start"() <{level = 10 : i32, message = "btd,bsd->bts"}> : () -> ()
    %cst_32 = arith.constant dense<0.000000e+00> : vector<2x8x8xf32>
    %92 = tpu.matmul %87, %89, %cst_32 {dimension_numbers = #tpu.dot_dimension_numbers<[2], [2], [1], [1], [0, 0, 0, 1, 1, 1], [0], [0]>} : vector<2x8x8xbf16>, vector<2x8x8xbf16>, vector<2x8x8xf32> -> vector<2x8x8xf32>
    "tpu.trace_stop"() : () -> ()
    %93 = arith.addf %92, %9 : vector<2x8x8xf32>
    %cst_33 = arith.constant dense<0xFF800000> : vector<2x8xf32>
    %94 = vector.multi_reduction <maximumf>, %93, %cst_33 [2] : vector<2x8x8xf32> to vector<2x8xf32>
    %95 = vector.shape_cast %94 : vector<2x8xf32> to vector<2x8x1xf32>
    %96 = vector.broadcast %95 : vector<2x8x1xf32> to vector<2x8x8xf32>
    %97 = arith.subf %93, %96 : vector<2x8x8xf32>
    %98 = math.exp %97 : vector<2x8x8xf32>
    %cst_34 = arith.constant dense<0.000000e+00> : vector<2x8xf32>
    %99 = vector.multi_reduction <add>, %98, %cst_34 [2] : vector<2x8x8xf32> to vector<2x8xf32>
    %100 = vector.shape_cast %99 : vector<2x8xf32> to vector<2x8x1xf32>
    %101 = tpu.reciprocal %100 {approx = true} : vector<2x8x1xf32> -> vector<2x8x1xf32>
    %102 = arith.mulf %100, %101 : vector<2x8x1xf32>
    %cst_35 = arith.constant 2.000000e+00 : f32
    %103 = vector.broadcast %cst_35 : f32 to vector<2x8x1xf32>
    %104 = arith.subf %103, %102 : vector<2x8x1xf32>
    %105 = arith.mulf %101, %104 : vector<2x8x1xf32>
    %106 = vector.broadcast %105 : vector<2x8x1xf32> to vector<2x8x8xf32>
    %107 = arith.mulf %98, %106 : vector<2x8x8xf32>
    %108 = arith.truncf %107 : vector<2x8x8xf32> to vector<2x8x8xbf16>
    "tpu.trace_start"() <{level = 10 : i32, message = "bts,bsd->btd"}> : () -> ()
    %cst_36 = arith.constant dense<0.000000e+00> : vector<2x8x8xf32>
    %109 = tpu.matmul %108, %91, %cst_36 {dimension_numbers = #tpu.dot_dimension_numbers<[2], [1], [1], [2], [0, 0, 0, 1, 1, 2], [0], [0]>} : vector<2x8x8xbf16>, vector<2x8x8xbf16>, vector<2x8x8xf32> -> vector<2x8x8xf32>
    "tpu.trace_stop"() : () -> ()
    %110 = vector.shape_cast %109 : vector<2x8x8xf32> to vector<16x8xf32>
    %111 = vector.extract_strided_slice %58 {offsets = [0, 0, 16], sizes = [2, 8, 8], strides = [1, 1, 1]} : vector<2x8x32xf32> to vector<2x8x8xf32>
    %112 = arith.truncf %111 : vector<2x8x8xf32> to vector<2x8x8xbf16>
    %113 = vector.extract_strided_slice %59 {offsets = [0, 0, 16], sizes = [2, 8, 8], strides = [1, 1, 1]} : vector<2x8x32xf32> to vector<2x8x8xf32>
    %114 = arith.truncf %113 : vector<2x8x8xf32> to vector<2x8x8xbf16>
    %115 = vector.extract_strided_slice %60 {offsets = [0, 0, 16], sizes = [2, 8, 8], strides = [1, 1, 1]} : vector<2x8x32xf32> to vector<2x8x8xf32>
    %116 = arith.truncf %115 : vector<2x8x8xf32> to vector<2x8x8xbf16>
    "tpu.trace_start"() <{level = 10 : i32, message = "btd,bsd->bts"}> : () -> ()
    %cst_37 = arith.constant dense<0.000000e+00> : vector<2x8x8xf32>
    %117 = tpu.matmul %112, %114, %cst_37 {dimension_numbers = #tpu.dot_dimension_numbers<[2], [2], [1], [1], [0, 0, 0, 1, 1, 1], [0], [0]>} : vector<2x8x8xbf16>, vector<2x8x8xbf16>, vector<2x8x8xf32> -> vector<2x8x8xf32>
    "tpu.trace_stop"() : () -> ()
    %118 = arith.addf %117, %9 : vector<2x8x8xf32>
    %cst_38 = arith.constant dense<0xFF800000> : vector<2x8xf32>
    %119 = vector.multi_reduction <maximumf>, %118, %cst_38 [2] : vector<2x8x8xf32> to vector<2x8xf32>
    %120 = vector.shape_cast %119 : vector<2x8xf32> to vector<2x8x1xf32>
    %121 = vector.broadcast %120 : vector<2x8x1xf32> to vector<2x8x8xf32>
    %122 = arith.subf %118, %121 : vector<2x8x8xf32>
    %123 = math.exp %122 : vector<2x8x8xf32>
    %cst_39 = arith.constant dense<0.000000e+00> : vector<2x8xf32>
    %124 = vector.multi_reduction <add>, %123, %cst_39 [2] : vector<2x8x8xf32> to vector<2x8xf32>
    %125 = vector.shape_cast %124 : vector<2x8xf32> to vector<2x8x1xf32>
    %126 = tpu.reciprocal %125 {approx = true} : vector<2x8x1xf32> -> vector<2x8x1xf32>
    %127 = arith.mulf %125, %126 : vector<2x8x1xf32>
    %cst_40 = arith.constant 2.000000e+00 : f32
    %128 = vector.broadcast %cst_40 : f32 to vector<2x8x1xf32>
    %129 = arith.subf %128, %127 : vector<2x8x1xf32>
    %130 = arith.mulf %126, %129 : vector<2x8x1xf32>
    %131 = vector.broadcast %130 : vector<2x8x1xf32> to vector<2x8x8xf32>
    %132 = arith.mulf %123, %131 : vector<2x8x8xf32>
    %133 = arith.truncf %132 : vector<2x8x8xf32> to vector<2x8x8xbf16>
    "tpu.trace_start"() <{level = 10 : i32, message = "bts,bsd->btd"}> : () -> ()
    %cst_41 = arith.constant dense<0.000000e+00> : vector<2x8x8xf32>
    %134 = tpu.matmul %133, %116, %cst_41 {dimension_numbers = #tpu.dot_dimension_numbers<[2], [1], [1], [2], [0, 0, 0, 1, 1, 2], [0], [0]>} : vector<2x8x8xbf16>, vector<2x8x8xbf16>, vector<2x8x8xf32> -> vector<2x8x8xf32>
    "tpu.trace_stop"() : () -> ()
    %135 = vector.shape_cast %134 : vector<2x8x8xf32> to vector<16x8xf32>
    %136 = vector.extract_strided_slice %58 {offsets = [0, 0, 24], sizes = [2, 8, 8], strides = [1, 1, 1]} : vector<2x8x32xf32> to vector<2x8x8xf32>
    %137 = arith.truncf %136 : vector<2x8x8xf32> to vector<2x8x8xbf16>
    %138 = vector.extract_strided_slice %59 {offsets = [0, 0, 24], sizes = [2, 8, 8], strides = [1, 1, 1]} : vector<2x8x32xf32> to vector<2x8x8xf32>
    %139 = arith.truncf %138 : vector<2x8x8xf32> to vector<2x8x8xbf16>
    %140 = vector.extract_strided_slice %60 {offsets = [0, 0, 24], sizes = [2, 8, 8], strides = [1, 1, 1]} : vector<2x8x32xf32> to vector<2x8x8xf32>
    %141 = arith.truncf %140 : vector<2x8x8xf32> to vector<2x8x8xbf16>
    "tpu.trace_start"() <{level = 10 : i32, message = "btd,bsd->bts"}> : () -> ()
    %cst_42 = arith.constant dense<0.000000e+00> : vector<2x8x8xf32>
    %142 = tpu.matmul %137, %139, %cst_42 {dimension_numbers = #tpu.dot_dimension_numbers<[2], [2], [1], [1], [0, 0, 0, 1, 1, 1], [0], [0]>} : vector<2x8x8xbf16>, vector<2x8x8xbf16>, vector<2x8x8xf32> -> vector<2x8x8xf32>
    "tpu.trace_stop"() : () -> ()
    %143 = arith.addf %142, %9 : vector<2x8x8xf32>
    %cst_43 = arith.constant dense<0xFF800000> : vector<2x8xf32>
    %144 = vector.multi_reduction <maximumf>, %143, %cst_43 [2] : vector<2x8x8xf32> to vector<2x8xf32>
    %145 = vector.shape_cast %144 : vector<2x8xf32> to vector<2x8x1xf32>
    %146 = vector.broadcast %145 : vector<2x8x1xf32> to vector<2x8x8xf32>
    %147 = arith.subf %143, %146 : vector<2x8x8xf32>
    %148 = math.exp %147 : vector<2x8x8xf32>
    %cst_44 = arith.constant dense<0.000000e+00> : vector<2x8xf32>
    %149 = vector.multi_reduction <add>, %148, %cst_44 [2] : vector<2x8x8xf32> to vector<2x8xf32>
    %150 = vector.shape_cast %149 : vector<2x8xf32> to vector<2x8x1xf32>
    %151 = tpu.reciprocal %150 {approx = true} : vector<2x8x1xf32> -> vector<2x8x1xf32>
    %152 = arith.mulf %150, %151 : vector<2x8x1xf32>
    %cst_45 = arith.constant 2.000000e+00 : f32
    %153 = vector.broadcast %cst_45 : f32 to vector<2x8x1xf32>
    %154 = arith.subf %153, %152 : vector<2x8x1xf32>
    %155 = arith.mulf %151, %154 : vector<2x8x1xf32>
    %156 = vector.broadcast %155 : vector<2x8x1xf32> to vector<2x8x8xf32>
    %157 = arith.mulf %148, %156 : vector<2x8x8xf32>
    %158 = arith.truncf %157 : vector<2x8x8xf32> to vector<2x8x8xbf16>
    "tpu.trace_start"() <{level = 10 : i32, message = "bts,bsd->btd"}> : () -> ()
    %cst_46 = arith.constant dense<0.000000e+00> : vector<2x8x8xf32>
    %159 = tpu.matmul %158, %141, %cst_46 {dimension_numbers = #tpu.dot_dimension_numbers<[2], [1], [1], [2], [0, 0, 0, 1, 1, 2], [0], [0]>} : vector<2x8x8xbf16>, vector<2x8x8xbf16>, vector<2x8x8xf32> -> vector<2x8x8xf32>
    "tpu.trace_stop"() : () -> ()
    %160 = vector.shape_cast %159 : vector<2x8x8xf32> to vector<16x8xf32>
    %161 = tpu.concatenate %85, %110, %135, %160 in 1 : vector<16x8xf32>, vector<16x8xf32>, vector<16x8xf32>, vector<16x8xf32> -> vector<16x32xf32>
    %162 = arith.truncf %161 : vector<16x32xf32> to vector<16x32xbf16>
    %c0_47 = arith.constant 0 : index
    %c0_48 = arith.constant 0 : index
    %c0_49 = arith.constant 0 : index
    %163 = vector.load %arg5[%c0_47, %c0_48, %c0_49] : memref<2x32x32xbf16, #tpu.memory_space<vmem>>, vector<1x32x32xbf16>
    %164 = vector.shape_cast %163 : vector<1x32x32xbf16> to vector<32x32xbf16>
    %cst_50 = arith.constant dense<0.000000e+00> : vector<16x32xf32>
    %165 = tpu.matmul %162, %164, %cst_50 {dimension_numbers = #tpu.dot_dimension_numbers<[1], [0], [0], [1], [0, 0, 1, 1], [], []>} : vector<16x32xbf16>, vector<32x32xbf16>, vector<16x32xf32> -> vector<16x32xf32>
    %166 = arith.addf %0, %165 : vector<16x32xf32>
    %c3 = arith.constant 3 : index
    %c0_51 = arith.constant 0 : index
    %167 = vector.load %arg3[%c3, %c0_51] : memref<18x128xf32, #tpu.memory_space<vmem>>, vector<1x32xf32>
    %168 = vector.broadcast %167 : vector<1x32xf32> to vector<16x32xf32>
    %169 = arith.addf %166, %168 : vector<16x32xf32>
    %c4 = arith.constant 4 : index
    %c0_52 = arith.constant 0 : index
    %170 = vector.load %arg3[%c4, %c0_52] : memref<18x128xf32, #tpu.memory_space<vmem>>, vector<1x32xf32>
    %c5 = arith.constant 5 : index
    %c0_53 = arith.constant 0 : index
    %171 = vector.load %arg3[%c5, %c0_53] : memref<18x128xf32, #tpu.memory_space<vmem>>, vector<1x32xf32>
    %cst_54 = arith.constant dense<0.000000e+00> : vector<16xf32>
    %172 = vector.multi_reduction <add>, %169, %cst_54 [1] : vector<16x32xf32> to vector<16xf32>
    %173 = vector.shape_cast %172 : vector<16xf32> to vector<16x1xf32>
    %cst_55 = arith.constant 3.200000e+01 : f32
    %174 = vector.broadcast %cst_55 : f32 to vector<16x1xf32>
    %175 = arith.divf %173, %174 : vector<16x1xf32>
    %176 = arith.mulf %169, %169 : vector<16x32xf32>
    %cst_56 = arith.constant dense<0.000000e+00> : vector<16xf32>
    %177 = vector.multi_reduction <add>, %176, %cst_56 [1] : vector<16x32xf32> to vector<16xf32>
    %178 = vector.shape_cast %177 : vector<16xf32> to vector<16x1xf32>
    %cst_57 = arith.constant 3.200000e+01 : f32
    %179 = vector.broadcast %cst_57 : f32 to vector<16x1xf32>
    %180 = arith.divf %178, %179 : vector<16x1xf32>
    %181 = vector.broadcast %175 : vector<16x1xf32> to vector<16x32xf32>
    %182 = arith.subf %169, %181 : vector<16x32xf32>
    %183 = arith.mulf %175, %175 : vector<16x1xf32>
    %184 = arith.subf %180, %183 : vector<16x1xf32>
    %cst_58 = arith.constant 9.99999974E-6 : f32
    %185 = vector.broadcast %cst_58 : f32 to vector<16x1xf32>
    %186 = arith.addf %184, %185 : vector<16x1xf32>
    %187 = math.rsqrt %186 : vector<16x1xf32>
    %188 = vector.broadcast %187 : vector<16x1xf32> to vector<16x32xf32>
    %189 = vector.broadcast %170 : vector<1x32xf32> to vector<16x32xf32>
    %190 = arith.mulf %188, %189 : vector<16x32xf32>
    %191 = arith.mulf %182, %190 : vector<16x32xf32>
    %192 = vector.broadcast %171 : vector<1x32xf32> to vector<16x32xf32>
    %193 = arith.addf %191, %192 : vector<16x32xf32>
    %194 = arith.truncf %193 : vector<16x32xf32> to vector<16x32xbf16>
    %c0_59 = arith.constant 0 : index
    %c0_60 = arith.constant 0 : index
    %c0_61 = arith.constant 0 : index
    %195 = vector.load %arg6[%c0_59, %c0_60, %c0_61] : memref<2x32x128xbf16, #tpu.memory_space<vmem>>, vector<1x32x128xbf16>
    %196 = vector.shape_cast %195 : vector<1x32x128xbf16> to vector<32x128xbf16>
    %cst_62 = arith.constant dense<0.000000e+00> : vector<16x128xf32>
    %197 = tpu.matmul %194, %196, %cst_62 {dimension_numbers = #tpu.dot_dimension_numbers<[1], [0], [0], [1], [0, 0, 1, 1], [], []>} : vector<16x32xbf16>, vector<32x128xbf16>, vector<16x128xf32> -> vector<16x128xf32>
    %c6 = arith.constant 6 : index
    %c0_63 = arith.constant 0 : index
    %198 = vector.load %arg3[%c6, %c0_63] : memref<18x128xf32, #tpu.memory_space<vmem>>, vector<1x128xf32>
    %199 = vector.broadcast %198 : vector<1x128xf32> to vector<16x128xf32>
    %200 = arith.addf %197, %199 : vector<16x128xf32>
    %cst_64 = arith.constant 5.000000e-01 : f32
    %201 = vector.broadcast %cst_64 : f32 to vector<16x128xf32>
    %202 = arith.mulf %200, %201 : vector<16x128xf32>
    %cst_65 = arith.constant 0.707106769 : f32
    %203 = vector.broadcast %cst_65 : f32 to vector<16x128xf32>
    %204 = arith.mulf %200, %203 : vector<16x128xf32>
    %205 = math.erf %204 : vector<16x128xf32>
    %cst_66 = arith.constant 1.000000e+00 : f32
    %206 = vector.broadcast %cst_66 : f32 to vector<16x128xf32>
    %207 = arith.addf %206, %205 : vector<16x128xf32>
    %208 = arith.mulf %202, %207 : vector<16x128xf32>
    %209 = arith.truncf %208 : vector<16x128xf32> to vector<16x128xbf16>
    %c0_67 = arith.constant 0 : index
    %c0_68 = arith.constant 0 : index
    %c0_69 = arith.constant 0 : index
    %210 = vector.load %arg7[%c0_67, %c0_68, %c0_69] : memref<2x128x32xbf16, #tpu.memory_space<vmem>>, vector<1x128x32xbf16>
    %211 = vector.shape_cast %210 : vector<1x128x32xbf16> to vector<128x32xbf16>
    %cst_70 = arith.constant dense<0.000000e+00> : vector<16x32xf32>
    %212 = tpu.matmul %209, %211, %cst_70 {dimension_numbers = #tpu.dot_dimension_numbers<[1], [0], [0], [1], [0, 0, 1, 1], [], []>} : vector<16x128xbf16>, vector<128x32xbf16>, vector<16x32xf32> -> vector<16x32xf32>
    %213 = arith.addf %169, %212 : vector<16x32xf32>
    %c7 = arith.constant 7 : index
    %c0_71 = arith.constant 0 : index
    %214 = vector.load %arg3[%c7, %c0_71] : memref<18x128xf32, #tpu.memory_space<vmem>>, vector<1x32xf32>
    %215 = vector.broadcast %214 : vector<1x32xf32> to vector<16x32xf32>
    %216 = arith.addf %213, %215 : vector<16x32xf32>
    %c8 = arith.constant 8 : index
    %c0_72 = arith.constant 0 : index
    %217 = vector.load %arg3[%c8, %c0_72] : memref<18x128xf32, #tpu.memory_space<vmem>>, vector<1x32xf32>
    %c9 = arith.constant 9 : index
    %c0_73 = arith.constant 0 : index
    %218 = vector.load %arg3[%c9, %c0_73] : memref<18x128xf32, #tpu.memory_space<vmem>>, vector<1x32xf32>
    %cst_74 = arith.constant dense<0.000000e+00> : vector<16xf32>
    %219 = vector.multi_reduction <add>, %216, %cst_74 [1] : vector<16x32xf32> to vector<16xf32>
    %220 = vector.shape_cast %219 : vector<16xf32> to vector<16x1xf32>
    %cst_75 = arith.constant 3.200000e+01 : f32
    %221 = vector.broadcast %cst_75 : f32 to vector<16x1xf32>
    %222 = arith.divf %220, %221 : vector<16x1xf32>
    %223 = arith.mulf %216, %216 : vector<16x32xf32>
    %cst_76 = arith.constant dense<0.000000e+00> : vector<16xf32>
    %224 = vector.multi_reduction <add>, %223, %cst_76 [1] : vector<16x32xf32> to vector<16xf32>
    %225 = vector.shape_cast %224 : vector<16xf32> to vector<16x1xf32>
    %cst_77 = arith.constant 3.200000e+01 : f32
    %226 = vector.broadcast %cst_77 : f32 to vector<16x1xf32>
    %227 = arith.divf %225, %226 : vector<16x1xf32>
    %228 = vector.broadcast %222 : vector<16x1xf32> to vector<16x32xf32>
    %229 = arith.subf %216, %228 : vector<16x32xf32>
    %230 = arith.mulf %222, %222 : vector<16x1xf32>
    %231 = arith.subf %227, %230 : vector<16x1xf32>
    %cst_78 = arith.constant 9.99999974E-6 : f32
    %232 = vector.broadcast %cst_78 : f32 to vector<16x1xf32>
    %233 = arith.addf %231, %232 : vector<16x1xf32>
    %234 = math.rsqrt %233 : vector<16x1xf32>
    %235 = vector.broadcast %234 : vector<16x1xf32> to vector<16x32xf32>
    %236 = vector.broadcast %217 : vector<1x32xf32> to vector<16x32xf32>
    %237 = arith.mulf %235, %236 : vector<16x32xf32>
    %238 = arith.mulf %229, %237 : vector<16x32xf32>
    %239 = vector.broadcast %218 : vector<1x32xf32> to vector<16x32xf32>
    %240 = arith.addf %238, %239 : vector<16x32xf32>
    %241 = arith.truncf %240 : vector<16x32xf32> to vector<16x32xbf16>
    %c1_79 = arith.constant 1 : index
    %c0_80 = arith.constant 0 : index
    %c0_81 = arith.constant 0 : index
    %242 = vector.load %arg4[%c1_79, %c0_80, %c0_81] : memref<2x32x96xbf16, #tpu.memory_space<vmem>>, vector<1x32x96xbf16>
    %243 = vector.shape_cast %242 : vector<1x32x96xbf16> to vector<32x96xbf16>
    %cst_82 = arith.constant dense<0.000000e+00> : vector<16x96xf32>
    %244 = tpu.matmul %241, %243, %cst_82 {dimension_numbers = #tpu.dot_dimension_numbers<[1], [0], [0], [1], [0, 0, 1, 1], [], []>} : vector<16x32xbf16>, vector<32x96xbf16>, vector<16x96xf32> -> vector<16x96xf32>
    %c10 = arith.constant 10 : index
    %c0_83 = arith.constant 0 : index
    %245 = vector.load %arg3[%c10, %c0_83] : memref<18x128xf32, #tpu.memory_space<vmem>>, vector<1x96xf32>
    %246 = vector.broadcast %245 : vector<1x96xf32> to vector<16x96xf32>
    %247 = arith.addf %244, %246 : vector<16x96xf32>
    %248 = vector.extract_strided_slice %247 {offsets = [0, 0], sizes = [16, 32], strides = [1, 1]} : vector<16x96xf32> to vector<16x32xf32>
    %249 = arith.mulf %248, %2 : vector<16x32xf32>
    %c28_i32_84 = arith.constant 28 : i32
    %250 = tpu.dynamic_rotate %248 by %c28_i32_84 dim 1 : vector<16x32xf32>, i32 -> vector<16x32xf32>
    %251 = arith.mulf %250, %4 : vector<16x32xf32>
    %252 = arith.addf %249, %251 : vector<16x32xf32>
    %c4_i32_85 = arith.constant 4 : i32
    %253 = tpu.dynamic_rotate %248 by %c4_i32_85 dim 1 : vector<16x32xf32>, i32 -> vector<16x32xf32>
    %254 = arith.mulf %253, %6 : vector<16x32xf32>
    %255 = arith.addf %252, %254 : vector<16x32xf32>
    %256 = vector.extract_strided_slice %247 {offsets = [0, 32], sizes = [16, 32], strides = [1, 1]} : vector<16x96xf32> to vector<16x32xf32>
    %257 = arith.mulf %256, %2 : vector<16x32xf32>
    %c28_i32_86 = arith.constant 28 : i32
    %258 = tpu.dynamic_rotate %256 by %c28_i32_86 dim 1 : vector<16x32xf32>, i32 -> vector<16x32xf32>
    %259 = arith.mulf %258, %4 : vector<16x32xf32>
    %260 = arith.addf %257, %259 : vector<16x32xf32>
    %c4_i32_87 = arith.constant 4 : i32
    %261 = tpu.dynamic_rotate %256 by %c4_i32_87 dim 1 : vector<16x32xf32>, i32 -> vector<16x32xf32>
    %262 = arith.mulf %261, %6 : vector<16x32xf32>
    %263 = arith.addf %260, %262 : vector<16x32xf32>
    %264 = vector.extract_strided_slice %247 {offsets = [0, 64], sizes = [16, 32], strides = [1, 1]} : vector<16x96xf32> to vector<16x32xf32>
    %265 = vector.shape_cast %255 : vector<16x32xf32> to vector<2x8x32xf32>
    %266 = vector.shape_cast %263 : vector<16x32xf32> to vector<2x8x32xf32>
    %267 = vector.shape_cast %264 : vector<16x32xf32> to vector<2x8x32xf32>
    %268 = vector.extract_strided_slice %265 {offsets = [0, 0, 0], sizes = [2, 8, 8], strides = [1, 1, 1]} : vector<2x8x32xf32> to vector<2x8x8xf32>
    %269 = arith.truncf %268 : vector<2x8x8xf32> to vector<2x8x8xbf16>
    %270 = vector.extract_strided_slice %266 {offsets = [0, 0, 0], sizes = [2, 8, 8], strides = [1, 1, 1]} : vector<2x8x32xf32> to vector<2x8x8xf32>
    %271 = arith.truncf %270 : vector<2x8x8xf32> to vector<2x8x8xbf16>
    %272 = vector.extract_strided_slice %267 {offsets = [0, 0, 0], sizes = [2, 8, 8], strides = [1, 1, 1]} : vector<2x8x32xf32> to vector<2x8x8xf32>
    %273 = arith.truncf %272 : vector<2x8x8xf32> to vector<2x8x8xbf16>
    "tpu.trace_start"() <{level = 10 : i32, message = "btd,bsd->bts"}> : () -> ()
    %cst_88 = arith.constant dense<0.000000e+00> : vector<2x8x8xf32>
    %274 = tpu.matmul %269, %271, %cst_88 {dimension_numbers = #tpu.dot_dimension_numbers<[2], [2], [1], [1], [0, 0, 0, 1, 1, 1], [0], [0]>} : vector<2x8x8xbf16>, vector<2x8x8xbf16>, vector<2x8x8xf32> -> vector<2x8x8xf32>
    "tpu.trace_stop"() : () -> ()
    %275 = arith.addf %274, %9 : vector<2x8x8xf32>
    %cst_89 = arith.constant dense<0xFF800000> : vector<2x8xf32>
    %276 = vector.multi_reduction <maximumf>, %275, %cst_89 [2] : vector<2x8x8xf32> to vector<2x8xf32>
    %277 = vector.shape_cast %276 : vector<2x8xf32> to vector<2x8x1xf32>
    %278 = vector.broadcast %277 : vector<2x8x1xf32> to vector<2x8x8xf32>
    %279 = arith.subf %275, %278 : vector<2x8x8xf32>
    %280 = math.exp %279 : vector<2x8x8xf32>
    %cst_90 = arith.constant dense<0.000000e+00> : vector<2x8xf32>
    %281 = vector.multi_reduction <add>, %280, %cst_90 [2] : vector<2x8x8xf32> to vector<2x8xf32>
    %282 = vector.shape_cast %281 : vector<2x8xf32> to vector<2x8x1xf32>
    %283 = tpu.reciprocal %282 {approx = true} : vector<2x8x1xf32> -> vector<2x8x1xf32>
    %284 = arith.mulf %282, %283 : vector<2x8x1xf32>
    %cst_91 = arith.constant 2.000000e+00 : f32
    %285 = vector.broadcast %cst_91 : f32 to vector<2x8x1xf32>
    %286 = arith.subf %285, %284 : vector<2x8x1xf32>
    %287 = arith.mulf %283, %286 : vector<2x8x1xf32>
    %288 = vector.broadcast %287 : vector<2x8x1xf32> to vector<2x8x8xf32>
    %289 = arith.mulf %280, %288 : vector<2x8x8xf32>
    %290 = arith.truncf %289 : vector<2x8x8xf32> to vector<2x8x8xbf16>
    "tpu.trace_start"() <{level = 10 : i32, message = "bts,bsd->btd"}> : () -> ()
    %cst_92 = arith.constant dense<0.000000e+00> : vector<2x8x8xf32>
    %291 = tpu.matmul %290, %273, %cst_92 {dimension_numbers = #tpu.dot_dimension_numbers<[2], [1], [1], [2], [0, 0, 0, 1, 1, 2], [0], [0]>} : vector<2x8x8xbf16>, vector<2x8x8xbf16>, vector<2x8x8xf32> -> vector<2x8x8xf32>
    "tpu.trace_stop"() : () -> ()
    %292 = vector.shape_cast %291 : vector<2x8x8xf32> to vector<16x8xf32>
    %293 = vector.extract_strided_slice %265 {offsets = [0, 0, 8], sizes = [2, 8, 8], strides = [1, 1, 1]} : vector<2x8x32xf32> to vector<2x8x8xf32>
    %294 = arith.truncf %293 : vector<2x8x8xf32> to vector<2x8x8xbf16>
    %295 = vector.extract_strided_slice %266 {offsets = [0, 0, 8], sizes = [2, 8, 8], strides = [1, 1, 1]} : vector<2x8x32xf32> to vector<2x8x8xf32>
    %296 = arith.truncf %295 : vector<2x8x8xf32> to vector<2x8x8xbf16>
    %297 = vector.extract_strided_slice %267 {offsets = [0, 0, 8], sizes = [2, 8, 8], strides = [1, 1, 1]} : vector<2x8x32xf32> to vector<2x8x8xf32>
    %298 = arith.truncf %297 : vector<2x8x8xf32> to vector<2x8x8xbf16>
    "tpu.trace_start"() <{level = 10 : i32, message = "btd,bsd->bts"}> : () -> ()
    %cst_93 = arith.constant dense<0.000000e+00> : vector<2x8x8xf32>
    %299 = tpu.matmul %294, %296, %cst_93 {dimension_numbers = #tpu.dot_dimension_numbers<[2], [2], [1], [1], [0, 0, 0, 1, 1, 1], [0], [0]>} : vector<2x8x8xbf16>, vector<2x8x8xbf16>, vector<2x8x8xf32> -> vector<2x8x8xf32>
    "tpu.trace_stop"() : () -> ()
    %300 = arith.addf %299, %9 : vector<2x8x8xf32>
    %cst_94 = arith.constant dense<0xFF800000> : vector<2x8xf32>
    %301 = vector.multi_reduction <maximumf>, %300, %cst_94 [2] : vector<2x8x8xf32> to vector<2x8xf32>
    %302 = vector.shape_cast %301 : vector<2x8xf32> to vector<2x8x1xf32>
    %303 = vector.broadcast %302 : vector<2x8x1xf32> to vector<2x8x8xf32>
    %304 = arith.subf %300, %303 : vector<2x8x8xf32>
    %305 = math.exp %304 : vector<2x8x8xf32>
    %cst_95 = arith.constant dense<0.000000e+00> : vector<2x8xf32>
    %306 = vector.multi_reduction <add>, %305, %cst_95 [2] : vector<2x8x8xf32> to vector<2x8xf32>
    %307 = vector.shape_cast %306 : vector<2x8xf32> to vector<2x8x1xf32>
    %308 = tpu.reciprocal %307 {approx = true} : vector<2x8x1xf32> -> vector<2x8x1xf32>
    %309 = arith.mulf %307, %308 : vector<2x8x1xf32>
    %cst_96 = arith.constant 2.000000e+00 : f32
    %310 = vector.broadcast %cst_96 : f32 to vector<2x8x1xf32>
    %311 = arith.subf %310, %309 : vector<2x8x1xf32>
    %312 = arith.mulf %308, %311 : vector<2x8x1xf32>
    %313 = vector.broadcast %312 : vector<2x8x1xf32> to vector<2x8x8xf32>
    %314 = arith.mulf %305, %313 : vector<2x8x8xf32>
    %315 = arith.truncf %314 : vector<2x8x8xf32> to vector<2x8x8xbf16>
    "tpu.trace_start"() <{level = 10 : i32, message = "bts,bsd->btd"}> : () -> ()
    %cst_97 = arith.constant dense<0.000000e+00> : vector<2x8x8xf32>
    %316 = tpu.matmul %315, %298, %cst_97 {dimension_numbers = #tpu.dot_dimension_numbers<[2], [1], [1], [2], [0, 0, 0, 1, 1, 2], [0], [0]>} : vector<2x8x8xbf16>, vector<2x8x8xbf16>, vector<2x8x8xf32> -> vector<2x8x8xf32>
    "tpu.trace_stop"() : () -> ()
    %317 = vector.shape_cast %316 : vector<2x8x8xf32> to vector<16x8xf32>
    %318 = vector.extract_strided_slice %265 {offsets = [0, 0, 16], sizes = [2, 8, 8], strides = [1, 1, 1]} : vector<2x8x32xf32> to vector<2x8x8xf32>
    %319 = arith.truncf %318 : vector<2x8x8xf32> to vector<2x8x8xbf16>
    %320 = vector.extract_strided_slice %266 {offsets = [0, 0, 16], sizes = [2, 8, 8], strides = [1, 1, 1]} : vector<2x8x32xf32> to vector<2x8x8xf32>
    %321 = arith.truncf %320 : vector<2x8x8xf32> to vector<2x8x8xbf16>
    %322 = vector.extract_strided_slice %267 {offsets = [0, 0, 16], sizes = [2, 8, 8], strides = [1, 1, 1]} : vector<2x8x32xf32> to vector<2x8x8xf32>
    %323 = arith.truncf %322 : vector<2x8x8xf32> to vector<2x8x8xbf16>
    "tpu.trace_start"() <{level = 10 : i32, message = "btd,bsd->bts"}> : () -> ()
    %cst_98 = arith.constant dense<0.000000e+00> : vector<2x8x8xf32>
    %324 = tpu.matmul %319, %321, %cst_98 {dimension_numbers = #tpu.dot_dimension_numbers<[2], [2], [1], [1], [0, 0, 0, 1, 1, 1], [0], [0]>} : vector<2x8x8xbf16>, vector<2x8x8xbf16>, vector<2x8x8xf32> -> vector<2x8x8xf32>
    "tpu.trace_stop"() : () -> ()
    %325 = arith.addf %324, %9 : vector<2x8x8xf32>
    %cst_99 = arith.constant dense<0xFF800000> : vector<2x8xf32>
    %326 = vector.multi_reduction <maximumf>, %325, %cst_99 [2] : vector<2x8x8xf32> to vector<2x8xf32>
    %327 = vector.shape_cast %326 : vector<2x8xf32> to vector<2x8x1xf32>
    %328 = vector.broadcast %327 : vector<2x8x1xf32> to vector<2x8x8xf32>
    %329 = arith.subf %325, %328 : vector<2x8x8xf32>
    %330 = math.exp %329 : vector<2x8x8xf32>
    %cst_100 = arith.constant dense<0.000000e+00> : vector<2x8xf32>
    %331 = vector.multi_reduction <add>, %330, %cst_100 [2] : vector<2x8x8xf32> to vector<2x8xf32>
    %332 = vector.shape_cast %331 : vector<2x8xf32> to vector<2x8x1xf32>
    %333 = tpu.reciprocal %332 {approx = true} : vector<2x8x1xf32> -> vector<2x8x1xf32>
    %334 = arith.mulf %332, %333 : vector<2x8x1xf32>
    %cst_101 = arith.constant 2.000000e+00 : f32
    %335 = vector.broadcast %cst_101 : f32 to vector<2x8x1xf32>
    %336 = arith.subf %335, %334 : vector<2x8x1xf32>
    %337 = arith.mulf %333, %336 : vector<2x8x1xf32>
    %338 = vector.broadcast %337 : vector<2x8x1xf32> to vector<2x8x8xf32>
    %339 = arith.mulf %330, %338 : vector<2x8x8xf32>
    %340 = arith.truncf %339 : vector<2x8x8xf32> to vector<2x8x8xbf16>
    "tpu.trace_start"() <{level = 10 : i32, message = "bts,bsd->btd"}> : () -> ()
    %cst_102 = arith.constant dense<0.000000e+00> : vector<2x8x8xf32>
    %341 = tpu.matmul %340, %323, %cst_102 {dimension_numbers = #tpu.dot_dimension_numbers<[2], [1], [1], [2], [0, 0, 0, 1, 1, 2], [0], [0]>} : vector<2x8x8xbf16>, vector<2x8x8xbf16>, vector<2x8x8xf32> -> vector<2x8x8xf32>
    "tpu.trace_stop"() : () -> ()
    %342 = vector.shape_cast %341 : vector<2x8x8xf32> to vector<16x8xf32>
    %343 = vector.extract_strided_slice %265 {offsets = [0, 0, 24], sizes = [2, 8, 8], strides = [1, 1, 1]} : vector<2x8x32xf32> to vector<2x8x8xf32>
    %344 = arith.truncf %343 : vector<2x8x8xf32> to vector<2x8x8xbf16>
    %345 = vector.extract_strided_slice %266 {offsets = [0, 0, 24], sizes = [2, 8, 8], strides = [1, 1, 1]} : vector<2x8x32xf32> to vector<2x8x8xf32>
    %346 = arith.truncf %345 : vector<2x8x8xf32> to vector<2x8x8xbf16>
    %347 = vector.extract_strided_slice %267 {offsets = [0, 0, 24], sizes = [2, 8, 8], strides = [1, 1, 1]} : vector<2x8x32xf32> to vector<2x8x8xf32>
    %348 = arith.truncf %347 : vector<2x8x8xf32> to vector<2x8x8xbf16>
    "tpu.trace_start"() <{level = 10 : i32, message = "btd,bsd->bts"}> : () -> ()
    %cst_103 = arith.constant dense<0.000000e+00> : vector<2x8x8xf32>
    %349 = tpu.matmul %344, %346, %cst_103 {dimension_numbers = #tpu.dot_dimension_numbers<[2], [2], [1], [1], [0, 0, 0, 1, 1, 1], [0], [0]>} : vector<2x8x8xbf16>, vector<2x8x8xbf16>, vector<2x8x8xf32> -> vector<2x8x8xf32>
    "tpu.trace_stop"() : () -> ()
    %350 = arith.addf %349, %9 : vector<2x8x8xf32>
    %cst_104 = arith.constant dense<0xFF800000> : vector<2x8xf32>
    %351 = vector.multi_reduction <maximumf>, %350, %cst_104 [2] : vector<2x8x8xf32> to vector<2x8xf32>
    %352 = vector.shape_cast %351 : vector<2x8xf32> to vector<2x8x1xf32>
    %353 = vector.broadcast %352 : vector<2x8x1xf32> to vector<2x8x8xf32>
    %354 = arith.subf %350, %353 : vector<2x8x8xf32>
    %355 = math.exp %354 : vector<2x8x8xf32>
    %cst_105 = arith.constant dense<0.000000e+00> : vector<2x8xf32>
    %356 = vector.multi_reduction <add>, %355, %cst_105 [2] : vector<2x8x8xf32> to vector<2x8xf32>
    %357 = vector.shape_cast %356 : vector<2x8xf32> to vector<2x8x1xf32>
    %358 = tpu.reciprocal %357 {approx = true} : vector<2x8x1xf32> -> vector<2x8x1xf32>
    %359 = arith.mulf %357, %358 : vector<2x8x1xf32>
    %cst_106 = arith.constant 2.000000e+00 : f32
    %360 = vector.broadcast %cst_106 : f32 to vector<2x8x1xf32>
    %361 = arith.subf %360, %359 : vector<2x8x1xf32>
    %362 = arith.mulf %358, %361 : vector<2x8x1xf32>
    %363 = vector.broadcast %362 : vector<2x8x1xf32> to vector<2x8x8xf32>
    %364 = arith.mulf %355, %363 : vector<2x8x8xf32>
    %365 = arith.truncf %364 : vector<2x8x8xf32> to vector<2x8x8xbf16>
    "tpu.trace_start"() <{level = 10 : i32, message = "bts,bsd->btd"}> : () -> ()
    %cst_107 = arith.constant dense<0.000000e+00> : vector<2x8x8xf32>
    %366 = tpu.matmul %365, %348, %cst_107 {dimension_numbers = #tpu.dot_dimension_numbers<[2], [1], [1], [2], [0, 0, 0, 1, 1, 2], [0], [0]>} : vector<2x8x8xbf16>, vector<2x8x8xbf16>, vector<2x8x8xf32> -> vector<2x8x8xf32>
    "tpu.trace_stop"() : () -> ()
    %367 = vector.shape_cast %366 : vector<2x8x8xf32> to vector<16x8xf32>
    %368 = tpu.concatenate %292, %317, %342, %367 in 1 : vector<16x8xf32>, vector<16x8xf32>, vector<16x8xf32>, vector<16x8xf32> -> vector<16x32xf32>
    %369 = arith.truncf %368 : vector<16x32xf32> to vector<16x32xbf16>
    %c1_108 = arith.constant 1 : index
    %c0_109 = arith.constant 0 : index
    %c0_110 = arith.constant 0 : index
    %370 = vector.load %arg5[%c1_108, %c0_109, %c0_110] : memref<2x32x32xbf16, #tpu.memory_space<vmem>>, vector<1x32x32xbf16>
    %371 = vector.shape_cast %370 : vector<1x32x32xbf16> to vector<32x32xbf16>
    %cst_111 = arith.constant dense<0.000000e+00> : vector<16x32xf32>
    %372 = tpu.matmul %369, %371, %cst_111 {dimension_numbers = #tpu.dot_dimension_numbers<[1], [0], [0], [1], [0, 0, 1, 1], [], []>} : vector<16x32xbf16>, vector<32x32xbf16>, vector<16x32xf32> -> vector<16x32xf32>
    %373 = arith.addf %216, %372 : vector<16x32xf32>
    %c11 = arith.constant 11 : index
    %c0_112 = arith.constant 0 : index
    %374 = vector.load %arg3[%c11, %c0_112] : memref<18x128xf32, #tpu.memory_space<vmem>>, vector<1x32xf32>
    %375 = vector.broadcast %374 : vector<1x32xf32> to vector<16x32xf32>
    %376 = arith.addf %373, %375 : vector<16x32xf32>
    %c12 = arith.constant 12 : index
    %c0_113 = arith.constant 0 : index
    %377 = vector.load %arg3[%c12, %c0_113] : memref<18x128xf32, #tpu.memory_space<vmem>>, vector<1x32xf32>
    %c13 = arith.constant 13 : index
    %c0_114 = arith.constant 0 : index
    %378 = vector.load %arg3[%c13, %c0_114] : memref<18x128xf32, #tpu.memory_space<vmem>>, vector<1x32xf32>
    %cst_115 = arith.constant dense<0.000000e+00> : vector<16xf32>
    %379 = vector.multi_reduction <add>, %376, %cst_115 [1] : vector<16x32xf32> to vector<16xf32>
    %380 = vector.shape_cast %379 : vector<16xf32> to vector<16x1xf32>
    %cst_116 = arith.constant 3.200000e+01 : f32
    %381 = vector.broadcast %cst_116 : f32 to vector<16x1xf32>
    %382 = arith.divf %380, %381 : vector<16x1xf32>
    %383 = arith.mulf %376, %376 : vector<16x32xf32>
    %cst_117 = arith.constant dense<0.000000e+00> : vector<16xf32>
    %384 = vector.multi_reduction <add>, %383, %cst_117 [1] : vector<16x32xf32> to vector<16xf32>
    %385 = vector.shape_cast %384 : vector<16xf32> to vector<16x1xf32>
    %cst_118 = arith.constant 3.200000e+01 : f32
    %386 = vector.broadcast %cst_118 : f32 to vector<16x1xf32>
    %387 = arith.divf %385, %386 : vector<16x1xf32>
    %388 = vector.broadcast %382 : vector<16x1xf32> to vector<16x32xf32>
    %389 = arith.subf %376, %388 : vector<16x32xf32>
    %390 = arith.mulf %382, %382 : vector<16x1xf32>
    %391 = arith.subf %387, %390 : vector<16x1xf32>
    %cst_119 = arith.constant 9.99999974E-6 : f32
    %392 = vector.broadcast %cst_119 : f32 to vector<16x1xf32>
    %393 = arith.addf %391, %392 : vector<16x1xf32>
    %394 = math.rsqrt %393 : vector<16x1xf32>
    %395 = vector.broadcast %394 : vector<16x1xf32> to vector<16x32xf32>
    %396 = vector.broadcast %377 : vector<1x32xf32> to vector<16x32xf32>
    %397 = arith.mulf %395, %396 : vector<16x32xf32>
    %398 = arith.mulf %389, %397 : vector<16x32xf32>
    %399 = vector.broadcast %378 : vector<1x32xf32> to vector<16x32xf32>
    %400 = arith.addf %398, %399 : vector<16x32xf32>
    %401 = arith.truncf %400 : vector<16x32xf32> to vector<16x32xbf16>
    %c1_120 = arith.constant 1 : index
    %c0_121 = arith.constant 0 : index
    %c0_122 = arith.constant 0 : index
    %402 = vector.load %arg6[%c1_120, %c0_121, %c0_122] : memref<2x32x128xbf16, #tpu.memory_space<vmem>>, vector<1x32x128xbf16>
    %403 = vector.shape_cast %402 : vector<1x32x128xbf16> to vector<32x128xbf16>
    %cst_123 = arith.constant dense<0.000000e+00> : vector<16x128xf32>
    %404 = tpu.matmul %401, %403, %cst_123 {dimension_numbers = #tpu.dot_dimension_numbers<[1], [0], [0], [1], [0, 0, 1, 1], [], []>} : vector<16x32xbf16>, vector<32x128xbf16>, vector<16x128xf32> -> vector<16x128xf32>
    %c14 = arith.constant 14 : index
    %c0_124 = arith.constant 0 : index
    %405 = vector.load %arg3[%c14, %c0_124] : memref<18x128xf32, #tpu.memory_space<vmem>>, vector<1x128xf32>
    %406 = vector.broadcast %405 : vector<1x128xf32> to vector<16x128xf32>
    %407 = arith.addf %404, %406 : vector<16x128xf32>
    %cst_125 = arith.constant 5.000000e-01 : f32
    %408 = vector.broadcast %cst_125 : f32 to vector<16x128xf32>
    %409 = arith.mulf %407, %408 : vector<16x128xf32>
    %cst_126 = arith.constant 0.707106769 : f32
    %410 = vector.broadcast %cst_126 : f32 to vector<16x128xf32>
    %411 = arith.mulf %407, %410 : vector<16x128xf32>
    %412 = math.erf %411 : vector<16x128xf32>
    %cst_127 = arith.constant 1.000000e+00 : f32
    %413 = vector.broadcast %cst_127 : f32 to vector<16x128xf32>
    %414 = arith.addf %413, %412 : vector<16x128xf32>
    %415 = arith.mulf %409, %414 : vector<16x128xf32>
    %416 = arith.truncf %415 : vector<16x128xf32> to vector<16x128xbf16>
    %c1_128 = arith.constant 1 : index
    %c0_129 = arith.constant 0 : index
    %c0_130 = arith.constant 0 : index
    %417 = vector.load %arg7[%c1_128, %c0_129, %c0_130] : memref<2x128x32xbf16, #tpu.memory_space<vmem>>, vector<1x128x32xbf16>
    %418 = vector.shape_cast %417 : vector<1x128x32xbf16> to vector<128x32xbf16>
    %cst_131 = arith.constant dense<0.000000e+00> : vector<16x32xf32>
    %419 = tpu.matmul %416, %418, %cst_131 {dimension_numbers = #tpu.dot_dimension_numbers<[1], [0], [0], [1], [0, 0, 1, 1], [], []>} : vector<16x128xbf16>, vector<128x32xbf16>, vector<16x32xf32> -> vector<16x32xf32>
    %420 = arith.addf %376, %419 : vector<16x32xf32>
    %c15 = arith.constant 15 : index
    %c0_132 = arith.constant 0 : index
    %421 = vector.load %arg3[%c15, %c0_132] : memref<18x128xf32, #tpu.memory_space<vmem>>, vector<1x32xf32>
    %422 = vector.broadcast %421 : vector<1x32xf32> to vector<16x32xf32>
    %423 = arith.addf %420, %422 : vector<16x32xf32>
    %c16 = arith.constant 16 : index
    %c0_133 = arith.constant 0 : index
    %424 = vector.load %arg3[%c16, %c0_133] : memref<18x128xf32, #tpu.memory_space<vmem>>, vector<1x32xf32>
    %c17 = arith.constant 17 : index
    %c0_134 = arith.constant 0 : index
    %425 = vector.load %arg3[%c17, %c0_134] : memref<18x128xf32, #tpu.memory_space<vmem>>, vector<1x32xf32>
    %cst_135 = arith.constant dense<0.000000e+00> : vector<16xf32>
    %426 = vector.multi_reduction <add>, %423, %cst_135 [1] : vector<16x32xf32> to vector<16xf32>
    %427 = vector.shape_cast %426 : vector<16xf32> to vector<16x1xf32>
    %cst_136 = arith.constant 3.200000e+01 : f32
    %428 = vector.broadcast %cst_136 : f32 to vector<16x1xf32>
    %429 = arith.divf %427, %428 : vector<16x1xf32>
    %430 = arith.mulf %423, %423 : vector<16x32xf32>
    %cst_137 = arith.constant dense<0.000000e+00> : vector<16xf32>
    %431 = vector.multi_reduction <add>, %430, %cst_137 [1] : vector<16x32xf32> to vector<16xf32>
    %432 = vector.shape_cast %431 : vector<16xf32> to vector<16x1xf32>
    %cst_138 = arith.constant 3.200000e+01 : f32
    %433 = vector.broadcast %cst_138 : f32 to vector<16x1xf32>
    %434 = arith.divf %432, %433 : vector<16x1xf32>
    %435 = vector.broadcast %429 : vector<16x1xf32> to vector<16x32xf32>
    %436 = arith.subf %423, %435 : vector<16x32xf32>
    %437 = arith.mulf %429, %429 : vector<16x1xf32>
    %438 = arith.subf %434, %437 : vector<16x1xf32>
    %cst_139 = arith.constant 9.99999974E-6 : f32
    %439 = vector.broadcast %cst_139 : f32 to vector<16x1xf32>
    %440 = arith.addf %438, %439 : vector<16x1xf32>
    %441 = math.rsqrt %440 : vector<16x1xf32>
    %442 = vector.broadcast %441 : vector<16x1xf32> to vector<16x32xf32>
    %443 = vector.broadcast %424 : vector<1x32xf32> to vector<16x32xf32>
    %444 = arith.mulf %442, %443 : vector<16x32xf32>
    %445 = arith.mulf %436, %444 : vector<16x32xf32>
    %446 = vector.broadcast %425 : vector<1x32xf32> to vector<16x32xf32>
    %447 = arith.addf %445, %446 : vector<16x32xf32>
    %c0_140 = arith.constant 0 : index
    %c0_141 = arith.constant 0 : index
    %448 = vector.load %arg8[%c0_140, %c0_141] : memref<16x32xf32, #tpu.memory_space<vmem>>, vector<16x32xf32>
    tpu.vector_store %arg8[%c0_140, %c0_141], %447 {strides = array<i32>} : memref<16x32xf32, #tpu.memory_space<vmem>>, vector<16x32xf32>,
    return
  }
}

</mosaic_0001>

<bundles_post_ra>
// kernel: tile.22
= control target key start
LH: loop header
LB: loop body
LE: loop exit
PB: predicated region body
PF: predicated region fallthrough
CT: control target
= control target key end

     0   :  { %s154_s0 = inlined_call_operand.vmem [shape: f32[8,8], index: 0, kind: input, shape index: {}]   ;;  %s155_s1 = inlined_call_operand.vmem [shape: f32[2,8,4,8], index: 1, kind: output, shape index: {}]  }
   0x1   :  { %v4_v0 = vld [vmem:[%s154_s0] ss:$0 sm:$0xff]  ;;  %v51_v1 = vld [vmem:[%s154_s0 + $0x1] ss:$0 sm:$0xff]  ;;  %v54_v2 = vld [vmem:[%s154_s0 + $0x2] ss:$0 sm:$0xff] }
   0x2   :  { %5 = vst [vmem:[%s155_s1] sm:$0xf] %v4_v0  ;;  %50 = vst [vmem:[%s155_s1 + $0x20] sm:$0xf] %v4_v0  ;;  %v57_v3 = vld [vmem:[%s154_s0 + $0x3] ss:$0 sm:$0xff] }
   0x3   :  { %52 = vst [vmem:[%s155_s1 + $0x4] sm:$0xf] %v51_v1  ;;  %53 = vst [vmem:[%s155_s1 + $0x24] sm:$0xf] %v51_v1  ;;  %v60_v4 = vld [vmem:[%s154_s0 + $0x4] ss:$0 sm:$0xff] }
   0x4   :  { %55 = vst [vmem:[%s155_s1 + $0x8] sm:$0xf] %v54_v2  ;;  %56 = vst [vmem:[%s155_s1 + $0x28] sm:$0xf] %v54_v2  ;;  %v63_v5 = vld [vmem:[%s154_s0 + $0x5] ss:$0 sm:$0xff] }
   0x5   :  { %58 = vst [vmem:[%s155_s1 + $0xc] sm:$0xf] %v57_v3  ;;  %59 = vst [vmem:[%s155_s1 + $0x2c] sm:$0xf] %v57_v3  ;;  %v66_v6 = vld [vmem:[%s154_s0 + $0x6] ss:$0 sm:$0xff] }
   0x6   :  { %61 = vst [vmem:[%s155_s1 + $0x10] sm:$0xf] %v60_v4  ;;  %62 = vst [vmem:[%s155_s1 + $0x30] sm:$0xf] %v60_v4  ;;  %v69_v7 = vld [vmem:[%s154_s0 + $0x7] ss:$0 sm:$0xff] }
   0x7   :  { %64 = vst [vmem:[%s155_s1 + $0x14] sm:$0xf] %v63_v5  ;;  %65 = vst [vmem:[%s155_s1 + $0x34] sm:$0xf] %v63_v5 }
   0x8   :  { %67 = vst [vmem:[%s155_s1 + $0x18] sm:$0xf] %v66_v6  ;;  %68 = vst [vmem:[%s155_s1 + $0x38] sm:$0xf] %v66_v6 }
   0x9   :  { %70 = vst [vmem:[%s155_s1 + $0x1c] sm:$0xf] %v69_v7  ;;  %71 = vst [vmem:[%s155_s1 + $0x3c] sm:$0xf] %v69_v7 }

// kernel: tile.28
= control target key start
LH: loop header
LB: loop body
LE: loop exit
PB: predicated region body
PF: predicated region fallthrough
CT: control target
= control target key end

     0   :  { %vm82_vm0 = vcmask 1047556   ;;  %vm84_vm1 = vcmask 64512   ;;  %s195_s9 = smov 24   ;;  %s196_s14 = smov 8   ;;  %vm103_vm2 = vcmask 261312   ;;  %vm124_vm3 = vcmask 195712   ;;  %s289_s0 = inlined_call_operand.vmem [shape: f32[2,8,4,8], index: 0, kind: input, shape index: {}]   ;;  %s290_s1 = inlined_call_operand.vmem [shape: f32[1,16,32], index: 1, kind: output, shape index: {}]  }
   0x1   :  { %v180_v0 = vld [vmem:[%s289_s0 + $0x1c] sm:$0xf]  ;;  %v181_v1 = vld [vmem:[%s289_s0 + $0x18] sm:$0xf]  ;;  %v182_v2 = vld [vmem:[%s289_s0 + $0x14] sm:$0xf] }
   0x2   :  { %48 = vst [vmem:[#allocation0 + $0x38] sm:$0xf] %v180_v0  ;;  %53 = vst [vmem:[#allocation0 + $0x30] sm:$0xf] %v181_v1  ;;  %v183_v3 = vld [vmem:[%s289_s0 + $0x10] sm:$0xf] }
   0x3   :  { %58 = vst [vmem:[#allocation0 + $0x28] sm:$0xf] %v182_v2  ;;  %v184_v4 = vld [vmem:[%s289_s0 + $0xc] sm:$0xf]  ;;  %v185_v5 = vld [vmem:[%s289_s0 + $0x8] sm:$0xf] }
   0x4   :  { %63 = vst [vmem:[#allocation0 + $0x20] sm:$0xf] %v183_v3  ;;  %68 = vst [vmem:[#allocation0 + $0x18] sm:$0xf] %v184_v4  ;;  %v186_v6 = vld [vmem:[%s289_s0 + $0x4] sm:$0xf] }
   0x5   :  { %73 = vst [vmem:[#allocation0 + $0x10] sm:$0xf] %v185_v5  ;;  %v78_v7 = vld [vmem:[%s289_s0] sm:$0xf]  ;;  %77 = vst [vmem:[#allocation0 + $0x8] sm:$0xf] %v186_v6 }
   0x6   :  { %79 = vst [vmem:[#allocation0] sm:$0xf] %v78_v7  ;;  %v172_v8 = vld [vmem:[%s289_s0 + $0x3c] sm:$0xf]  ;;  %v173_v9 = vld [vmem:[%s289_s0 + $0x38] sm:$0xf] }
   0x7   :  { %8 = vst [vmem:[#allocation0 + $0x78] sm:$0xf] %v172_v8  ;;  %13 = vst [vmem:[#allocation0 + $0x70] sm:$0xf] %v173_v9  ;;  %v174_v10 = vld [vmem:[%s289_s0 + $0x34] sm:$0xf] }
   0x8   :  { %v175_v11 = vld [vmem:[%s289_s0 + $0x30] sm:$0xf]  ;;  %v176_v12 = vld [vmem:[%s289_s0 + $0x2c] sm:$0xf]  ;;  %18 = vst [vmem:[#allocation0 + $0x68] sm:$0xf] %v174_v10 }
   0x9   :  { %23 = vst [vmem:[#allocation0 + $0x60] sm:$0xf] %v175_v11  ;;  %28 = vst [vmem:[#allocation0 + $0x58] sm:$0xf] %v176_v12  ;;  %v177_v13 = vld [vmem:[%s289_s0 + $0x28] sm:$0xf] }
   0xa   :  { %v178_v14 = vld [vmem:[%s289_s0 + $0x24] sm:$0xf]  ;;  %v179_v15 = vld [vmem:[%s289_s0 + $0x20] sm:$0xf]  ;;  %33 = vst [vmem:[#allocation0 + $0x50] sm:$0xf] %v177_v13 }
   0xb   :  { %38 = vst [vmem:[#allocation0 + $0x48] sm:$0xf] %v178_v14  ;;  %43 = vst [vmem:[#allocation0 + $0x40] sm:$0xf] %v179_v15  ;;  %s194_s0 = smov 16   ;;  %vm145_vm4 = vcmask 130112  }
   0xc   :  { %v119_v16 = vld [vmem:[#allocation0 + $0x2] ss:$8 sm:$0xf0]   ;;  %v98_v17 = vld [vmem:[#allocation0 + $0x3] ss:$8 sm:$0xf0]  }
   0xd   :  { %v117_v18 = vld [vmem:[#allocation0 + $0x2] ss:$8 sm:$0xf]   ;;  %v96_v19 = vld [vmem:[#allocation0 + $0x3] ss:$8 sm:$0xf]  }
   0xe   :  { %v121_v20 = vsel %vm82_vm0, %v119_v16, %v117_v18  ;;  %v100_v21 = vsel %vm82_vm0, %v98_v17, %v96_v19  ;;  %v138_v24 = vld [vmem:[#allocation0 + $0x1] ss:$8 sm:$0xf]   ;;  %v80_v32 = vld [vmem:[#allocation0] ss:$8 sm:$0xf]  }
   0xf   :  { %122 = vrot.lane.b32.xlu1 %v121_v20, %s194_s0  ;;  %101 = vrot.lane.b32.xlu0 %v100_v21, %s195_s9  ;;  %v140_v25 = vld [vmem:[#allocation0 + $0x1] ss:$8 sm:$0xf0]   ;;  %v81_v33 = vld [vmem:[#allocation0] ss:$8 sm:$0xf0]  }
  0x10   :  { %v129_v22 = vld [vmem:[#allocation0 + $0x42] ss:$8 sm:$0xf0]   ;;  %v108_v23 = vld [vmem:[#allocation0 + $0x43] ss:$8 sm:$0xf0]   ;;  %v83_v34 = vsel %vm82_vm0, %v81_v33, %v80_v32  ;;  %v142_v38 = vsel %vm82_vm0, %v140_v25, %v138_v24 }
  0x11   :  { %v150_v31 = vld [vmem:[#allocation0 + $0x41] ss:$8 sm:$0xf0]   ;;  %v89_v36 = vld [vmem:[#allocation0 + $0x40] ss:$8 sm:$0xf0]  }
  0x12   :  { %v127_v26 = vld [vmem:[#allocation0 + $0x42] ss:$8 sm:$0xf]   ;;  %v106_v27 = vld [vmem:[#allocation0 + $0x43] ss:$8 sm:$0xf]  }
  0x13   :  { %v131_v28 = vsel %vm82_vm0, %v129_v22, %v127_v26  ;;  %v110_v29 = vsel %vm82_vm0, %v108_v23, %v106_v27  ;;  %v148_v30 = vld [vmem:[#allocation0 + $0x41] ss:$8 sm:$0xf]   ;;  %v87_v35 = vld [vmem:[#allocation0 + $0x40] ss:$8 sm:$0xf]  }
  0x14   :  { %132 = vrot.lane.b32.xlu1 %v131_v28, %s194_s0  ;;  %111 = vrot.lane.b32.xlu0 %v110_v29, %s195_s9  ;;  %v152_v37 = vsel %vm82_vm0, %v150_v31, %v148_v30  ;;  %85 = vst.msk [vmem:[%s290_s1] sm:$0xff] %vm84_vm1, %v83_v34   ;;  %v91_v39 = vsel %vm82_vm0, %v89_v36, %v87_v35 }
  0x15   :  { %187 = vst.msk [vmem:[%s290_s1 + $0x8] sm:$0xff] %vm84_vm1, %v91_v39  }
  0x18   :  { %153 = vrot.lane.b32.xlu1 %v152_v37, %s196_s14  ;;  %143 = vrot.lane.b32.xlu0 %v142_v38, %s196_s14 }
  0x81   :  { %v123_v40 = vpop.permute.xlu1 %122   ;;  %v102_v41 = vpop.permute.xlu0 %101  }
  0x82   :  { %104 = vst.msk [vmem:[%s290_s1] sm:$0xff] %vm103_vm2, %v102_v41  }
  0x83   :  { %125 = vst.msk [vmem:[%s290_s1] sm:$0xff] %vm124_vm3, %v123_v40  }
  0x86   :  { %v133_v42 = vpop.permute.xlu1 %132   ;;  %v112_v43 = vpop.permute.xlu0 %111  }
  0x87   :  { %188 = vst.msk [vmem:[%s290_s1 + $0x8] sm:$0xff] %vm103_vm2, %v112_v43  }
  0x88   :  { %189 = vst.msk [vmem:[%s290_s1 + $0x8] sm:$0xff] %vm124_vm3, %v133_v42  }
  0x8a   :  { %v154_v44 = vpop.permute.xlu1 %153   ;;  %v144_v45 = vpop.permute.xlu0 %143  }
  0x8b   :  { %190 = vst.msk [vmem:[%s290_s1 + $0x8] sm:$0xff] %vm145_vm4, %v154_v44   ;;  %146 = vst.msk [vmem:[%s290_s1] sm:$0xff] %vm145_vm4, %v144_v45  }

// kernel: esm2_forward.1
= control target key start
LH: loop header
LB: loop body
LE: loop exit
PB: predicated region body
PF: predicated region fallthrough
CT: control target
= control target key end

     0   :  { %vm57_vm0 = vcmask 261120   ;;  %s4626_s0 = inlined_call_operand.vmem [shape: f32[16,32], index: 0, kind: input, shape index: {}]   ;;  %s4627_s1 = inlined_call_operand.vmem [shape: f32[3,16,32], index: 1, kind: input, shape index: {}]   ;;  %s4628_s2 = inlined_call_operand.vmem [shape: f32[2,1,8], index: 2, kind: input, shape index: {}]   ;;  %s4629_s3 = inlined_call_operand.vmem [shape: f32[18,128], index: 3, kind: input, shape index: {}]   ;;  %s4630_s4 = inlined_call_operand.vmem [shape: bf16[2,32,96], index: 4, kind: input, shape index: {}]   ;;  %s4631_s5 = inlined_call_operand.vmem [shape: bf16[2,32,32], index: 5, kind: input, shape index: {}]   ;;  %s4632_s6 = inlined_call_operand.vmem [shape: bf16[2,32,128], index: 6, kind: input, shape index: {}]   ;;  %s4633_s7 = inlined_call_operand.vmem [shape: bf16[2,128,32], index: 7, kind: input, shape index: {}]   ;;  %s4634_s8 = inlined_call_operand.hbm [shape: f32[16,32], index: 8, kind: output, shape index: {}]  }
   0x1   :  { %v31_v0 = vld [vmem:[%s4626_s0] sm:$0xff]  ;;  %v32_v1 = vld [vmem:[%s4626_s0 + $0x8] sm:$0xff] }
   0x2   :  { %v58_v2 = vsel %vm57_vm0, %v31_v0, 0.0  ;;  %v67_v3 = vmul.f32 %v31_v0, %v31_v0  ;;  %v61_v4 = vsel %vm57_vm0, %v32_v1, 0.0  ;;  %v68_v5 = vmul.f32 %v32_v1, %v32_v1 }
   0x3   :  { %59 = vadd.xlane.f32.xlu0 %v58_v2 }
   0x4   :  { %v69_v6 = vsel %vm57_vm0, %v67_v3, 0.0  ;;  %v72_v7 = vsel %vm57_vm0, %v68_v5, 0.0 }
   0x5   :  { %70 = vadd.xlane.f32.xlu1 %v69_v6 }
   0x7   :  { %62 = vadd.xlane.f32.xlu0 %v61_v4 }
   0x9   :  { %73 = vadd.xlane.f32.xlu1 %v72_v7 }
   0xa   :  { %13 = vsyncpa [#allocation3], 0  ;;  %v3585_v8 = vld [vmem:[%s4630_s4] sm:$0xff]   ;;  %v3735_v9 = vmov 0.0   ;;  %vm3736_vm1 = vmmov 0   ;;  %v3586_v10 = vld [vmem:[%s4630_s4 + $0x8] sm:$0xff]  }
   0xb   :  { %3252 = vmatprep.subr.bf16.mxu1 %v3735_v9  ;;  %3256 = vmatprep.mubr.msk.bf16.mxu1 %vm3736_vm1, %v3735_v9  ;;  %v3040_v25 = vld [vmem:[%s4629_s3] ss:$0 sm:$0xff]  ;;  %v3041_v33 = vld [vmem:[%s4629_s3 + $0x1] ss:$0 sm:$0xff]  ;;  %v3042_v38 = vld [vmem:[%s4629_s3 + $0x2] ss:$0 sm:$0xff] }
   0xc   :  { %3253 = vmatpush3.bf16.msra.mxu1 %v3585_v8  ;;  %3278 = vmatprep.subr.bf16.mxu0 %v3735_v9  ;;  %s3737_s19 = smov 96   ;;  %s3738_s20 = smov 32   ;;  %v3034_v47 = vld [vmem:[%s4627_s1 + $0x10] sm:$0xff]  ;;  %v3035_v48 = vld [vmem:[%s4627_s1 + $0x18] sm:$0xff]  ;;  %vm169_vm2 = vcmask 1047808   ;;  %v3036_v51 = vld [vmem:[%s4627_s1 + $0x20] sm:$0xff] }
   0xd   :  { %3254 = vmatprep.subr.bf16.mxu1 %v3735_v9  ;;  %3280 = vmatprep.mubr.msk.bf16.mxu0 %vm3736_vm1, %v3735_v9  ;;  %s3739_s23 = smov 4   ;;  %s3740_s28 = smov 28   ;;  %v3037_v54 = vld [vmem:[%s4627_s1 + $0x28] sm:$0xff]  ;;  %v33_v55 = vld [vmem:[%s4627_s1] sm:$0xff]  ;;  %vm285_vm3 = vcmask 64512   ;;  %vm417_vm4 = vcmask 1043456  }
   0xe   :  { %v34_v4 = vld [vmem:[%s4627_s1 + $0x8] sm:$0xff]  ;;  %s3741_s13 = smov 124   ;;  %s3742_s14 = smov 100   ;;  %vm1216_vm5 = vcmask 130048   ;;  %vm1219_vm6 = vcmask 195584  }
   0xf   :  { %s3743_s21 = smov 64   ;;  %s3744_s22 = smov 88  }
  0x10   :  { %3255 = vmatpush3.bf16.msra.mxu1 %v3586_v10  ;;  %s3745_s24 = smov 120   ;;  %s3746_s25 = smov 56  }
  0x11   :  { %3260 = vmatprep.subr.bf16.mxu1 %v3735_v9  ;;  %s3747_s26 = smov 80   ;;  %s3748_s27 = smov 112  }
  0x12   :  { %s3749_s29 = smov 48   ;;  %s3750_s30 = smov 72  }
  0x13   :  { %s3751_s9 = smov 104   ;;  %s4639_s10 = smov 40  }
  0x14   :  { %s4637_s11 = smov 8   ;;  %s4636_s12 = smov 16  }
  0x15   :  { %s4635_s15 = smov 24  }
  0x90   :  { %v60_v11 = vpop.xlane.xlu0 %59 }
  0x91   :  { %v65_v12 = vmul.f32 0.03125, %v60_v11 }
  0x92   :  { %v71_v13 = vpop.xlane.xlu1 %70 }
  0x93   :  { %v79_v14 = vmul.f32 %v65_v12, %v65_v12  ;;  %v75_v15 = vmul.f32 0.03125, %v71_v13  ;;  %v77_v28 = vsub.f32 %v31_v0, %v65_v12 }
  0x94   :  { %v63_v16 = vpop.xlane.xlu0 %62 }
  0x95   :  { %v81_v17 = vsub.f32 %v75_v15, %v79_v14  ;;  %v66_v18 = vmul.f32 0.03125, %v63_v16 }
  0x96   :  { %v74_v19 = vpop.xlane.xlu1 %73 }
  0x97   :  { %v83_v20 = vadd.f32 1e-05, %v81_v17  ;;  %v80_v21 = vmul.f32 %v66_v18, %v66_v18  ;;  %v76_v22 = vmul.f32 0.03125, %v74_v19  ;;  %v78_v30 = vsub.f32 %v32_v1, %v66_v18 }
  0x99   :  { %3613 = vrsqrt.f32 %v83_v20  ;;  %v82_v23 = vsub.f32 %v76_v22, %v80_v21 }
  0x9b   :  { %v84_v24 = vadd.f32 1e-05, %v82_v23 }
  0x9d   :  { %3615 = vrsqrt.f32 %v84_v24 }
  0xa3   :  { %v3614_v26 = vpop.eup %3613 }
  0xa4   :  { %v91_v27 = vmul.f32 %v3614_v26, %v3040_v25 }
  0xa6   :  { %v93_v32 = vmul.f32 %v91_v27, %v77_v28 }
  0xa7   :  { %v3616_v29 = vpop.eup %3615 }
  0xa8   :  { %v92_v31 = vmul.f32 %v3616_v29, %v3040_v25  ;;  %v99_v35 = vadd.f32 %v3041_v33, %v93_v32 }
  0xaa   :  { %v94_v34 = vmul.f32 %v92_v31, %v78_v30 }
  0xac   :  { %v100_v36 = vadd.f32 %v3041_v33, %v94_v34 }
  0xae   :  { %v101_v37 = vpack.c.bf16 %v100_v36, %v99_v35 }
  0xb0   :  { %3257 = vmatmul.mubr.msk.bf16.vlgmr.msra.gmra.mrb[0].mxu1 %vm57_vm0, %v101_v37 }
  0xb1   :  { %3262 = vmatprep.mubr.msk.bf16.mxu1 %vm3736_vm1, %v3735_v9 }
 0x183   :  { %v160_v39 = vpop.f32.mrb[0].mxu1 }
 0x184   :  { %v3839_v40 = vadd.f32 %v3042_v38, %v160_v39  ;;  %v3258_v41 = vpop.f32.mrb[1].mxu1 }
 0x185   :  { %v163_v42 = vpop.f32.mrb[2].mxu1 }
 0x186   :  { %v3841_v43 = vadd.f32 %v3042_v38, %v163_v42  ;;  %234 = vrot.lane.b32.xlu0 %v3839_v40, %s3737_s19  ;;  %v3259_v44 = vpop.f32.mrb[3].mxu1  ;;  %v167_v35 = vmul.f32 %v3839_v40, %v33_v55 }
 0x188   :  { %236 = vrot.lane.b32.xlu1 %v3841_v43, %s3737_s19  ;;  %v168_v44 = vmul.f32 %v3841_v43, %v34_v4 }
 0x1f8   :  { %v235_v45 = vpop.permute.xlu0 %234 }
 0x1f9   :  { %240 = vrot.lane.b32.xlu1 %v235_v45, %s3738_s20 }
 0x1fa   :  { %v237_v46 = vpop.permute.xlu1 %236 }
 0x1fd   :  { %243 = vrot.lane.b32.xlu1 %v237_v46, %s3738_s20 }
 0x201   :  { %184 = vrot.lane.b32.xlu1 %v3034_v47, %s3739_s23 }
 0x205   :  { %170 = vrot.lane.b32.xlu1 %v3839_v40, %s3738_s20 }
 0x209   :  { %186 = vrot.lane.b32.xlu1 %v3035_v48, %s3739_s23 }
 0x20d   :  { %173 = vrot.lane.b32.xlu1 %v3841_v43, %s3738_s20 }
 0x26b   :  { %v241_v49 = vpop.permute.xlu1 %240 }
 0x26c   :  { %v242_v50 = vsel %vm169_vm2, %v241_v49, %v235_v45 }
 0x26d   :  { %246 = vrot.lane.b32.xlu0 %v242_v50, %s3738_s20  ;;  %v3954_v50 = vld [vmem:[%s4628_s2] ss:$0 sm:$0xff] }
 0x26f   :  { %v244_v52 = vpop.permute.xlu1 %243 }
 0x270   :  { %v245_v53 = vsel %vm169_vm2, %v244_v52, %v237_v46 }
 0x271   :  { %204 = vrot.lane.b32.xlu0 %v3036_v51, %s3740_s28 }
 0x273   :  { %v3877_v56 = vpop.permute.xlu1 %184 }
 0x275   :  { %248 = vrot.lane.b32.xlu0 %v245_v53, %s3738_s20 }
 0x277   :  { %v171_v57 = vpop.permute.xlu1 %170 }
 0x278   :  { %v172_v0 = vsel %vm169_vm2, %v171_v57, %v3839_v40 }
 0x279   :  { %206 = vrot.lane.b32.xlu0 %v3037_v54, %s3740_s28 }
 0x27b   :  { %v3885_v63 = vpop.permute.xlu1 %186 }
 0x27d   :  { %224 = vrot.lane.b32.xlu0 %v33_v55, %s3738_s20 }
 0x27f   :  { %v174_v5 = vpop.permute.xlu1 %173 }
 0x280   :  { %v175_v8 = vsel %vm169_vm2, %v174_v5, %v3841_v43 }
 0x2df   :  { %v247_v58 = vpop.permute.xlu0 %246 }
 0x2e0   :  { %v250_v59 = vsel %vm169_vm2, %v247_v58, %v235_v45  ;;  %v3961_v58 = vld [vmem:[%s4628_s2 + $0x1] ss:$0 sm:$0xff] }
 0x2e1   :  { %v252_v60 = vmul.f32 %v250_v59, %v3877_v56 }
 0x2e3   :  { %v3881_v61 = vpop.permute.xlu0 %204  ;;  %256 = vrot.lane.b32.xlu1 %v252_v60, %s3740_s28 }
 0x2e4   :  { %v264_v62 = vmul.f32 %v250_v59, %v3881_v61 }
 0x2e6   :  { %268 = vrot.lane.b32.xlu0 %v264_v62, %s3739_s23 }
 0x2e7   :  { %v249_v1 = vpop.permute.xlu0 %248  ;;  %176 = vrot.lane.b32.xlu1 %v172_v0, %s3738_s20 }
 0x2e8   :  { %v251_v2 = vsel %vm169_vm2, %v249_v1, %v237_v46 }
 0x2e9   :  { %v253_v3 = vmul.f32 %v251_v2, %v3885_v63 }
 0x2ea   :  { %226 = vrot.lane.b32.xlu0 %v34_v4, %s3738_s20 }
 0x2eb   :  { %v3897_v6 = vpop.permute.xlu0 %206  ;;  %258 = vrot.lane.b32.xlu1 %v253_v3, %s3740_s28  ;;  %v3967_v3 = vpack.c.bf16 %v3841_v43, %v3841_v43 }
 0x2ec   :  { %v265_v7 = vmul.f32 %v251_v2, %v3897_v6 }
 0x2ee   :  { %270 = vrot.lane.b32.xlu0 %v265_v7, %s3739_s23 }
 0x2ef   :  { %178 = vrot.lane.b32.xlu1 %v175_v8, %s3738_s20  ;;  %v3905_v10 = vpop.permute.xlu0 %224 }
 0x2f0   :  { %v230_v11 = vmul.f32 %v3905_v10, %v3839_v40 }
 0x355   :  { %v257_v12 = vpop.permute.xlu1 %256 }
 0x356   :  { %v262_v13 = vadd.f32 %v257_v12, %v230_v11 }
 0x358   :  { %v269_v14 = vpop.permute.xlu0 %268 }
 0x359   :  { %v274_v15 = vadd.f32 %v269_v14, %v262_v13  ;;  %v177_v16 = vpop.permute.xlu1 %176 }
 0x35a   :  { %v180_v17 = vsel %vm169_vm2, %v177_v16, %v3839_v40 }
 0x35b   :  { %v3911_v18 = vpack.c.bf16 %v274_v15, %v274_v15  ;;  %v190_v19 = vmul.f32 %v3877_v56, %v180_v17  ;;  %v210_v23 = vmul.f32 %v3881_v61, %v180_v17 }
 0x35c   :  { %v3914_v20 = vpop.permute.xlu0 %226 }
 0x35d   :  { %v231_v21 = vmul.f32 %v3914_v20, %v3841_v43  ;;  %283 = vrot.lane.b32.xlu0 %v3911_v18, %s3737_s19  ;;  %194 = vrot.lane.b32.xlu1 %v190_v19, %s3741_s13  ;;  %v259_v22 = vpop.permute.xlu1 %258  ;;  %v3983_v19 = vpack.c.bf16 %v3839_v40, %v3839_v40 }
 0x35f   :  { %v263_v24 = vadd.f32 %v259_v22, %v231_v21 }
 0x360   :  { %v271_v25 = vpop.permute.xlu0 %270 }
 0x361   :  { %v275_v26 = vadd.f32 %v271_v25, %v263_v24  ;;  %214 = vrot.lane.b32.xlu0 %v210_v23, %s3742_s14  ;;  %v179_v27 = vpop.permute.xlu1 %178 }
 0x362   :  { %v181_v28 = vsel %vm169_vm2, %v179_v27, %v3841_v43 }
 0x363   :  { %v3925_v29 = vpack.c.bf16 %v275_v26, %v275_v26  ;;  %v191_v30 = vmul.f32 %v3885_v63, %v181_v28  ;;  %v211_v31 = vmul.f32 %v3897_v6, %v181_v28 }
 0x365   :  { %333 = vrot.lane.b32.xlu1 %v3925_v29, %s3737_s19  ;;  %196 = vrot.lane.b32.xlu0 %v191_v30, %s3741_s13 }
 0x369   :  { %216 = vrot.lane.b32.xlu1 %v211_v31, %s3742_s14 }
 0x3cf   :  { %v284_v32 = vpop.permute.xlu0 %283  ;;  %v195_v33 = vpop.permute.xlu1 %194 }
 0x3d0   :  { %v290_v34 = vsel %vm285_vm3, %v284_v32, 0  ;;  %v200_v36 = vadd.f32 %v195_v33, %v167_v35 }
 0x3d1   :  { %3261 = vmatpush3.bf16.xpose.msra.mxu1 %v290_v34 }
 0x3d2   :  { %3266 = vmatprep.subr.bf16.mxu1 %v3735_v9 }
 0x3d3   :  { %v215_v37 = vpop.permute.xlu0 %214 }
 0x3d4   :  { %v220_v38 = vadd.f32 %v215_v37, %v200_v36 }
 0x3d6   :  { %v3936_v39 = vpack.c.bf16 %v220_v38, %v220_v38 }
 0x3d7   :  { %v197_v41 = vpop.permute.xlu0 %196  ;;  %v334_v42 = vpop.permute.xlu1 %333 }
 0x3d8   :  { %v339_v45 = vsel %vm285_vm3, %v334_v42, 0  ;;  %3263 = vmatmul.mubr.msk.bf16.vlgmr.msra.gmra.mrb[4].mxu1 %vm285_vm3, %v3936_v39  ;;  %v201_v46 = vadd.f32 %v197_v41, %v168_v44 }
 0x3d9   :  { %3267 = vmatpush3.bf16.xpose.msra.mxu1 %v339_v45  ;;  %3268 = vmatprep.mubr.msk.bf16.mxu1 %vm3736_vm1, %v3735_v9 }
 0x3da   :  { %3272 = vmatprep.subr.bf16.mxu1 %v3735_v9 }
 0x3db   :  { %v217_v47 = vpop.permute.xlu1 %216 }
 0x3dc   :  { %v221_v48 = vadd.f32 %v217_v47, %v201_v46 }
 0x3de   :  { %v3945_v49 = vpack.c.bf16 %v221_v48, %v221_v48 }
 0x3e0   :  { %3269 = vmatmul.mubr.msk.bf16.vlgmr.msra.gmra.mrb[8].mxu1 %vm285_vm3, %v3945_v49 }
 0x3e1   :  { %3274 = vmatprep.mubr.msk.bf16.mxu1 %vm3736_vm1, %v3735_v9 }
 0x4ab   :  { %v326_v51 = vpop.f32.mrb[4].mxu1 }
 0x4ac   :  { %v327_v52 = vadd.f32 %v3954_v50, %v326_v51  ;;  %v3264_v53 = vpop.f32.mrb[5].mxu1 }
 0x4ad   :  { %v329_v54 = vpop.f32.mrb[6].mxu1 }
 0x4ae   :  { %v3265_v55 = vpop.f32.mrb[7].mxu1  ;;  %v381_v57 = vsel %vm285_vm3, %v327_v52, -inf }
 0x4af   :  { %382 = vmax.xlane.f32.xlu0 %v381_v57 }
 0x4b3   :  { %v375_v59 = vpop.f32.mrb[8].mxu1 }
 0x4b4   :  { %v376_v60 = vadd.f32 %v3961_v58, %v375_v59  ;;  %v3270_v62 = vpop.f32.mrb[9].mxu1 }
 0x4b5   :  { %v378_v0 = vpop.f32.mrb[10].mxu1 }
 0x4b6   :  { %v3271_v1 = vpop.f32.mrb[11].mxu1  ;;  %v384_v2 = vsel %vm285_vm3, %v376_v60, -inf }
 0x4b7   :  { %385 = vmax.xlane.f32.xlu1 %v384_v2 }
 0x4c8   :  { %462 = vrot.lane.b32.xlu1 %v3967_v3, %s3743_s21 }
 0x4cc   :  { %513 = vrot.lane.b32.xlu1 %v3911_v18, %s3744_s22 }
 0x4d0   :  { %564 = vrot.lane.b32.xlu1 %v3925_v29, %s3744_s22 }
 0x4d4   :  { %562 = vrot.lane.b32.xlu1 %v3945_v49, %s3745_s24 }
 0x53c   :  { %v383_v4 = vpop.xlane.xlu0 %382 }
 0x53d   :  { %v387_v5 = vsub.f32 %v327_v52, %v383_v4 }
 0x53f   :  { %v389_v7 = vmul.f32 1.442695, %v387_v5 }
 0x541   :  { %3617 = vpow2.f32 %v389_v7 }
 0x544   :  { %v386_v43 = vpop.xlane.xlu1 %385 }
 0x545   :  { %v388_v8 = vsub.f32 %v376_v60, %v386_v43 }
 0x547   :  { %v391_v11 = vmul.f32 1.442695, %v388_v8 }
 0x548   :  { %v463_v12 = vpop.permute.xlu1 %462 }
 0x549   :  { %3619 = vpow2.f32 %v391_v11  ;;  %v468_v13 = vsel %vm417_vm4, %v463_v12, 0 }
 0x54a   :  { %3279 = vmatpush3.bf16.msra.mxu0 %v468_v13 }
 0x54b   :  { %v3618_v14 = vpop.eup %3617  ;;  %3290 = vmatprep.subr.bf16.mxu0 %v3735_v9 }
 0x54c   :  { %v393_v15 = vsel %vm285_vm3, %v3618_v14, 0.0  ;;  %v514_v31 = vpop.permute.xlu1 %513 }
 0x54d   :  { %394 = vadd.xlane.f32.xlu0 %v393_v15  ;;  %v519_v34 = vsel %vm285_vm3, %v514_v31, 0 }
 0x550   :  { %v565_v38 = vpop.permute.xlu1 %564 }
 0x551   :  { %v570_v44 = vsel %vm285_vm3, %v565_v38, 0 }
 0x553   :  { %v3620_v16 = vpop.eup %3619 }
 0x554   :  { %v396_v17 = vsel %vm285_vm3, %v3620_v16, 0.0  ;;  %v563_v45 = vpop.permute.xlu1 %562 }
 0x555   :  { %397 = vadd.xlane.f32.xlu0 %v396_v17 }
 0x56b   :  { %412 = vrot.lane.b32.xlu0 %v3983_v19, %s3743_s21 }
 0x56f   :  { %511 = vrot.lane.b32.xlu0 %v3936_v39, %s3745_s24 }
 0x5da   :  { %v395_v21 = vpop.xlane.xlu0 %394 }
 0x5db   :  { %3621 = vrcp.f32 %v395_v21 }
 0x5e2   :  { %v398_v22 = vpop.xlane.xlu0 %397 }
 0x5e3   :  { %3623 = vrcp.f32 %v398_v22 }
 0x5e5   :  { %v3622_v23 = vpop.eup %3621 }
 0x5e6   :  { %v401_v24 = vmul.f32 %v3622_v23, %v395_v21  ;;  %v413_v25 = vpop.permute.xlu0 %412 }
 0x5e7   :  { %v419_v26 = vsel %vm417_vm4, %v413_v25, 0 }
 0x5e8   :  { %v403_v27 = vsub.f32 2.0, %v401_v24  ;;  %3273 = vmatpush3.bf16.msra.mxu1 %v419_v26 }
 0x5e9   :  { %3284 = vmatprep.subr.bf16.mxu1 %v3735_v9 }
 0x5ea   :  { %v405_v40 = vmul.f32 %v3622_v23, %v403_v27  ;;  %v512_v42 = vpop.permute.xlu0 %511 }
 0x5ec   :  { %v407_v28 = vmul.f32 %v3618_v14, %v405_v40 }
 0x5ed   :  { %v3624_v30 = vpop.eup %3623 }
 0x5ee   :  { %v409_v32 = vpack.c.bf16 %v407_v28, %v407_v28  ;;  %v402_v33 = vmul.f32 %v3624_v30, %v398_v22 }
 0x5f0   :  { %v404_v35 = vsub.f32 2.0, %v402_v33  ;;  %3275 = vmatmul.mubr.msk.bf16.vlgmr.msra.gmra.mrb[12].mxu1 %vm285_vm3, %v409_v32 }
 0x5f1   :  { %3285 = vmatpush3.bf16.xpose.msra.mxu1 %v519_v34  ;;  %3286 = vmatprep.mubr.msk.bf16.mxu1 %vm3736_vm1, %v3735_v9 }
 0x5f2   :  { %v406_v36 = vmul.f32 %v3624_v30, %v404_v35  ;;  %3296 = vmatprep.subr.bf16.mxu1 %v3735_v9 }
 0x5f4   :  { %v408_v37 = vmul.f32 %v3620_v16, %v406_v36 }
 0x5f6   :  { %v410_v41 = vpack.c.bf16 %v408_v37, %v408_v37 }
 0x5f8   :  { %3281 = vmatmul.mubr.msk.bf16.vlgmr.msra.gmra.mrb[0].mxu0 %vm285_vm3, %v410_v41  ;;  %3287 = vmatmul.mubr.msk.bf16.vlgmr.msra.gmra.mrb[16].mxu1 %vm285_vm3, %v512_v42 }
 0x5f9   :  { %3291 = vmatpush3.bf16.xpose.msra.mxu0 %v570_v44  ;;  %3292 = vmatprep.mubr.msk.bf16.mxu0 %vm3736_vm1, %v3735_v9 }
 0x5fa   :  { %3302 = vmatprep.subr.bf16.mxu0 %v3735_v9  ;;  %3298 = vmatprep.mubr.msk.bf16.mxu1 %vm3736_vm1, %v3735_v9 }
 0x600   :  { %3293 = vmatmul.mubr.msk.bf16.vlgmr.msra.gmra.mrb[4].mxu0 %vm285_vm3, %v563_v45 }
 0x601   :  { %3304 = vmatprep.mubr.msk.bf16.mxu0 %vm3736_vm1, %v3735_v9 }
 0x6c3   :  { %v4007_v46 = vpop.f32.mrb[12].mxu1 }
 0x6c4   :  { %v3276_v47 = vpop.f32.mrb[13].mxu1 }
 0x6c5   :  { %v458_v48 = vpop.f32.mrb[14].mxu1 }
 0x6c6   :  { %v3277_v51 = vpop.f32.mrb[15].mxu1 }
 0x6cb   :  { %v4009_v52 = vpop.f32.mrb[0].mxu0  ;;  %v555_v53 = vpop.f32.mrb[16].mxu1 }
 0x6cc   :  { %v556_v54 = vadd.f32 %v3954_v50, %v555_v53  ;;  %v3282_v55 = vpop.f32.mrb[1].mxu0  ;;  %v3288_v57 = vpop.f32.mrb[17].mxu1 }
 0x6cd   :  { %v507_v59 = vpop.f32.mrb[2].mxu0  ;;  %v558_v60 = vpop.f32.mrb[18].mxu1 }
 0x6ce   :  { %v3283_v62 = vpop.f32.mrb[3].mxu0  ;;  %v3289_v0 = vpop.f32.mrb[19].mxu1  ;;  %v612_v1 = vsel %vm285_vm3, %v556_v54, -inf }
 0x6cf   :  { %613 = vmax.xlane.f32.xlu0 %v612_v1 }
 0x6d3   :  { %v606_v2 = vpop.f32.mrb[4].mxu0 }
 0x6d4   :  { %v607_v4 = vadd.f32 %v3961_v58, %v606_v2  ;;  %v3294_v5 = vpop.f32.mrb[5].mxu0 }
 0x6d5   :  { %v609_v7 = vpop.f32.mrb[6].mxu0 }
 0x6d6   :  { %v3295_v43 = vpop.f32.mrb[7].mxu0  ;;  %v615_v8 = vsel %vm285_vm3, %v607_v4, -inf }
 0x6d7   :  { %616 = vmax.xlane.f32.xlu1 %v615_v8 }
 0x6e8   :  { %690 = vrot.lane.b32.xlu1 %v3967_v3, %s3746_s25 }
 0x6ec   :  { %740 = vrot.lane.b32.xlu1 %v3911_v18, %s3747_s26 }
 0x6f0   :  { %790 = vrot.lane.b32.xlu1 %v3925_v29, %s3747_s26 }
 0x6f4   :  { %788 = vrot.lane.b32.xlu1 %v3945_v49, %s3748_s27 }
 0x75c   :  { %v614_v11 = vpop.xlane.xlu0 %613 }
 0x75d   :  { %v618_v12 = vsub.f32 %v556_v54, %v614_v11 }
 0x75f   :  { %v620_v13 = vmul.f32 1.442695, %v618_v12 }
 0x761   :  { %3625 = vpow2.f32 %v620_v13 }
 0x764   :  { %v617_v14 = vpop.xlane.xlu1 %616 }
 0x765   :  { %v619_v15 = vsub.f32 %v607_v4, %v617_v14 }
 0x767   :  { %v622_v16 = vmul.f32 1.442695, %v619_v15 }
 0x768   :  { %v691_v17 = vpop.permute.xlu1 %690 }
 0x769   :  { %3627 = vpow2.f32 %v622_v16  ;;  %v696_v21 = vsel %vm417_vm4, %v691_v17, 0 }
 0x76a   :  { %3303 = vmatpush3.bf16.msra.mxu0 %v696_v21 }
 0x76b   :  { %v3626_v22 = vpop.eup %3625  ;;  %3314 = vmatprep.subr.bf16.mxu0 %v3735_v9 }
 0x76c   :  { %v624_v23 = vsel %vm285_vm3, %v3626_v22, 0.0  ;;  %v741_v36 = vpop.permute.xlu1 %740 }
 0x76d   :  { %625 = vadd.xlane.f32.xlu0 %v624_v23  ;;  %v746_v41 = vsel %vm285_vm3, %v741_v36, 0 }
 0x770   :  { %v791_v47 = vpop.permute.xlu1 %790 }
 0x771   :  { %v796_v53 = vsel %vm285_vm3, %v791_v47, 0 }
 0x773   :  { %v3628_v24 = vpop.eup %3627 }
 0x774   :  { %v627_v25 = vsel %vm285_vm3, %v3628_v24, 0.0  ;;  %v789_v54 = vpop.permute.xlu1 %788 }
 0x775   :  { %628 = vadd.xlane.f32.xlu0 %v627_v25 }
 0x78b   :  { %642 = vrot.lane.b32.xlu0 %v3983_v19, %s3746_s25 }
 0x78f   :  { %738 = vrot.lane.b32.xlu0 %v3936_v39, %s3748_s27 }
 0x7fa   :  { %v626_v26 = vpop.xlane.xlu0 %625 }
 0x7fb   :  { %3629 = vrcp.f32 %v626_v26 }
 0x802   :  { %v629_v27 = vpop.xlane.xlu0 %628 }
 0x803   :  { %3631 = vrcp.f32 %v629_v27 }
 0x805   :  { %v3630_v40 = vpop.eup %3629 }
 0x806   :  { %v632_v28 = vmul.f32 %v3630_v40, %v626_v26  ;;  %v643_v30 = vpop.permute.xlu0 %642 }
 0x807   :  { %v648_v31 = vsel %vm417_vm4, %v643_v30, 0 }
 0x808   :  { %v634_v32 = vsub.f32 2.0, %v632_v28  ;;  %3297 = vmatpush3.bf16.msra.mxu1 %v648_v31 }
 0x809   :  { %3308 = vmatprep.subr.bf16.mxu1 %v3735_v9 }
 0x80a   :  { %v636_v33 = vmul.f32 %v3630_v40, %v634_v32  ;;  %v739_v51 = vpop.permute.xlu0 %738 }
 0x80c   :  { %v638_v34 = vmul.f32 %v3626_v22, %v636_v33 }
 0x80d   :  { %v3632_v35 = vpop.eup %3631 }
 0x80e   :  { %v640_v37 = vpack.c.bf16 %v638_v34, %v638_v34  ;;  %v633_v38 = vmul.f32 %v3632_v35, %v629_v27 }
 0x810   :  { %v635_v42 = vsub.f32 2.0, %v633_v38  ;;  %3299 = vmatmul.mubr.msk.bf16.vlgmr.msra.gmra.mrb[20].mxu1 %vm285_vm3, %v640_v37 }
 0x811   :  { %3309 = vmatpush3.bf16.xpose.msra.mxu1 %v746_v41  ;;  %3310 = vmatprep.mubr.msk.bf16.mxu1 %vm3736_vm1, %v3735_v9 }
 0x812   :  { %v637_v44 = vmul.f32 %v3632_v35, %v635_v42  ;;  %3320 = vmatprep.subr.bf16.mxu1 %v3735_v9 }
 0x814   :  { %v639_v45 = vmul.f32 %v3628_v24, %v637_v44 }
 0x816   :  { %v641_v48 = vpack.c.bf16 %v639_v45, %v639_v45 }
 0x818   :  { %3305 = vmatmul.mubr.msk.bf16.vlgmr.msra.gmra.mrb[8].mxu0 %vm285_vm3, %v641_v48  ;;  %3311 = vmatmul.mubr.msk.bf16.vlgmr.msra.gmra.mrb[24].mxu1 %vm285_vm3, %v739_v51 }
 0x819   :  { %3315 = vmatpush3.bf16.xpose.msra.mxu0 %v796_v53  ;;  %3316 = vmatprep.mubr.msk.bf16.mxu0 %vm3736_vm1, %v3735_v9 }
 0x81a   :  { %3326 = vmatprep.subr.bf16.mxu0 %v3735_v9  ;;  %3322 = vmatprep.mubr.msk.bf16.mxu1 %vm3736_vm1, %v3735_v9 }
 0x820   :  { %3317 = vmatmul.mubr.msk.bf16.vlgmr.msra.gmra.mrb[12].mxu0 %vm285_vm3, %v789_v54 }
 0x821   :  { %3328 = vmatprep.mubr.msk.bf16.mxu0 %vm3736_vm1, %v3735_v9 }
 0x8e3   :  { %v4049_v55 = vpop.f32.mrb[20].mxu1 }
 0x8e4   :  { %v3300_v57 = vpop.f32.mrb[21].mxu1 }
 0x8e5   :  { %v687_v59 = vpop.f32.mrb[22].mxu1 }
 0x8e6   :  { %v3301_v60 = vpop.f32.mrb[23].mxu1 }
 0x8eb   :  { %v4051_v62 = vpop.f32.mrb[8].mxu0  ;;  %v782_v0 = vpop.f32.mrb[24].mxu1 }
 0x8ec   :  { %v3555_v1 = vpack.i.bf16 %v4051_v62, %v4049_v55  ;;  %v783_v2 = vadd.f32 %v3954_v50, %v782_v0  ;;  %v3306_v4 = vpop.f32.mrb[9].mxu0  ;;  %v3312_v5 = vpop.f32.mrb[25].mxu1 }
 0x8ed   :  { %v735_v7 = vpop.f32.mrb[10].mxu0  ;;  %v785_v43 = vpop.f32.mrb[26].mxu1 }
 0x8ee   :  { %v3307_v8 = vpop.f32.mrb[11].mxu0  ;;  %v3313_v11 = vpop.f32.mrb[27].mxu1  ;;  %v838_v12 = vsel %vm285_vm3, %v783_v2, -inf }
 0x8ef   :  { %839 = vmax.xlane.f32.xlu0 %v838_v12 }
 0x8f3   :  { %v832_v13 = vpop.f32.mrb[12].mxu0 }
 0x8f4   :  { %v833_v14 = vadd.f32 %v3961_v58, %v832_v13  ;;  %v3318_v15 = vpop.f32.mrb[13].mxu0 }
 0x8f5   :  { %v835_v16 = vpop.f32.mrb[14].mxu0 }
 0x8f6   :  { %v3319_v17 = vpop.f32.mrb[15].mxu0  ;;  %v841_v21 = vsel %vm285_vm3, %v833_v14, -inf }
 0x8f7   :  { %842 = vmax.xlane.f32.xlu1 %v841_v21 }
 0x908   :  { %916 = vrot.lane.b32.xlu1 %v3967_v3, %s3749_s29 }
 0x90c   :  { %966 = vrot.lane.b32.xlu1 %v3911_v18, %s3750_s30 }
 0x910   :  { %1016 = vrot.lane.b32.xlu1 %v3925_v29, %s3750_s30 }
 0x914   :  { %1014 = vrot.lane.b32.xlu1 %v3945_v49, %s3751_s9 }
 0x97c   :  { %v840_v22 = vpop.xlane.xlu0 %839 }
 0x97d   :  { %v844_v23 = vsub.f32 %v783_v2, %v840_v22 }
 0x97f   :  { %v846_v24 = vmul.f32 1.442695, %v844_v23 }
 0x981   :  { %3633 = vpow2.f32 %v846_v24 }
 0x984   :  { %v843_v25 = vpop.xlane.xlu1 %842 }
 0x985   :  { %v845_v26 = vsub.f32 %v833_v14, %v843_v25 }
 0x987   :  { %v848_v27 = vmul.f32 1.442695, %v845_v26 }
 0x988   :  { %v917_v40 = vpop.permute.xlu1 %916 }
 0x989   :  { %3635 = vpow2.f32 %v848_v27  ;;  %v922_v28 = vsel %vm417_vm4, %v917_v40, 0 }
 0x98a   :  { %3327 = vmatpush3.bf16.msra.mxu0 %v922_v28 }
 0x98b   :  { %v3634_v18 = vpop.eup %3633  ;;  %3338 = vmatprep.subr.bf16.mxu0 %v3735_v9 }
 0x98c   :  { %v850_v29 = vsel %vm285_vm3, %v3634_v18, 0.0  ;;  %v967_v44 = vpop.permute.xlu1 %966 }
 0x98d   :  { %851 = vadd.xlane.f32.xlu0 %v850_v29 }
 0x990   :  { %v1017_v54 = vpop.permute.xlu1 %1016 }
 0x991   :  { %v1022_v60 = vsel %vm285_vm3, %v1017_v54, 0  ;;  %v3588_v54 = vld [vmem:[%s4631_s5 + $0x8] sm:$0xff]  }
 0x993   :  { %v3636_v30 = vpop.eup %3635 }
 0x994   :  { %v853_v49 = vsel %vm285_vm3, %v3636_v30, 0.0  ;;  %v1015_v0 = vpop.permute.xlu1 %1014 }
 0x995   :  { %854 = vadd.xlane.f32.xlu0 %v853_v49 }
 0x9ab   :  { %868 = vrot.lane.b32.xlu0 %v3983_v19, %s3749_s29 }
 0x9af   :  { %964 = vrot.lane.b32.xlu0 %v3936_v39, %s3751_s9  ;;  %v972_v39 = vsel %vm285_vm3, %v967_v44, 0 }
 0xa1a   :  { %v852_v31 = vpop.xlane.xlu0 %851 }
 0xa1b   :  { %3637 = vrcp.f32 %v852_v31 }
 0xa22   :  { %v855_v32 = vpop.xlane.xlu0 %854 }
 0xa23   :  { %3639 = vrcp.f32 %v855_v32 }
 0xa25   :  { %v3638_v33 = vpop.eup %3637 }
 0xa26   :  { %v858_v34 = vmul.f32 %v3638_v33, %v852_v31  ;;  %v869_v35 = vpop.permute.xlu0 %868 }
 0xa27   :  { %v874_v36 = vsel %vm417_vm4, %v869_v35, 0 }
 0xa28   :  { %v860_v37 = vsub.f32 2.0, %v858_v34  ;;  %3321 = vmatpush3.bf16.msra.mxu1 %v874_v36 }
 0xa29   :  { %3332 = vmatprep.subr.bf16.mxu1 %v3735_v9 }
 0xa2a   :  { %v862_v38 = vmul.f32 %v3638_v33, %v860_v37  ;;  %v965_v59 = vpop.permute.xlu0 %964 }
 0xa2c   :  { %v864_v41 = vmul.f32 %v3634_v18, %v862_v38 }
 0xa2d   :  { %v3640_v42 = vpop.eup %3639 }
 0xa2e   :  { %v866_v45 = vpack.c.bf16 %v864_v41, %v864_v41  ;;  %v859_v47 = vmul.f32 %v3640_v42, %v855_v32 }
 0xa30   :  { %v861_v48 = vsub.f32 2.0, %v859_v47  ;;  %3323 = vmatmul.mubr.msk.bf16.vlgmr.msra.gmra.mrb[28].mxu1 %vm285_vm3, %v866_v45 }
 0xa31   :  { %3333 = vmatpush3.bf16.xpose.msra.mxu1 %v972_v39  ;;  %3334 = vmatprep.mubr.msk.bf16.mxu1 %vm3736_vm1, %v3735_v9 }
 0xa32   :  { %v863_v51 = vmul.f32 %v3640_v42, %v861_v48  ;;  %3344 = vmatprep.subr.bf16.mxu1 %v3735_v9 }
 0xa34   :  { %v865_v53 = vmul.f32 %v3636_v30, %v863_v51 }
 0xa36   :  { %v867_v57 = vpack.c.bf16 %v865_v53, %v865_v53  ;;  %v3587_v53 = vld [vmem:[%s4631_s5] sm:$0xff]  }
 0xa38   :  { %3329 = vmatmul.mubr.msk.bf16.vlgmr.msra.gmra.mrb[16].mxu0 %vm285_vm3, %v867_v57  ;;  %3335 = vmatmul.mubr.msk.bf16.vlgmr.msra.gmra.mrb[32].mxu1 %vm285_vm3, %v965_v59 }
 0xa39   :  { %3339 = vmatpush3.bf16.xpose.msra.mxu0 %v1022_v60  ;;  %3340 = vmatprep.mubr.msk.bf16.mxu0 %vm3736_vm1, %v3735_v9 }
 0xa3a   :  { %3350 = vmatprep.subr.bf16.mxu0 %v3735_v9  ;;  %3346 = vmatprep.mubr.msk.bf16.mxu1 %vm3736_vm1, %v3735_v9 }
 0xa40   :  { %3341 = vmatmul.mubr.msk.bf16.vlgmr.msra.gmra.mrb[20].mxu0 %vm285_vm3, %v1015_v0 }
 0xa41   :  { %3352 = vmatprep.mubr.msk.bf16.mxu0 %vm3736_vm1, %v3735_v9 }
 0xb03   :  { %v910_v2 = vpop.f32.mrb[28].mxu1 }
 0xb04   :  { %v3324_v4 = vpop.f32.mrb[29].mxu1 }
 0xb05   :  { %v913_v5 = vpop.f32.mrb[30].mxu1 }
 0xb06   :  { %v3325_v7 = vpop.f32.mrb[31].mxu1 }
 0xb0b   :  { %v958_v43 = vpop.f32.mrb[16].mxu0  ;;  %v1008_v8 = vpop.f32.mrb[32].mxu1 }
 0xb0c   :  { %v3560_v11 = vpack.i.bf16 %v958_v43, %v910_v2  ;;  %v1009_v12 = vadd.f32 %v3954_v50, %v1008_v8  ;;  %v3330_v13 = vpop.f32.mrb[17].mxu0  ;;  %v3336_v14 = vpop.f32.mrb[33].mxu1 }
 0xb0d   :  { %v961_v15 = vpop.f32.mrb[18].mxu0  ;;  %v1011_v16 = vpop.f32.mrb[34].mxu1 }
 0xb0e   :  { %v3331_v17 = vpop.f32.mrb[19].mxu0  ;;  %v3337_v21 = vpop.f32.mrb[35].mxu1  ;;  %v1064_v22 = vsel %vm285_vm3, %v1009_v12, -inf }
 0xb0f   :  { %1065 = vmax.xlane.f32.xlu0 %v1064_v22 }
 0xb13   :  { %v1058_v23 = vpop.f32.mrb[20].mxu0 }
 0xb14   :  { %v1059_v24 = vadd.f32 %v3961_v58, %v1058_v23  ;;  %v3342_v25 = vpop.f32.mrb[21].mxu0 }
 0xb15   :  { %v1061_v26 = vpop.f32.mrb[22].mxu0 }
 0xb16   :  { %v3343_v27 = vpop.f32.mrb[23].mxu0  ;;  %v1067_v40 = vsel %vm285_vm3, %v1059_v24, -inf }
 0xb17   :  { %1068 = vmax.xlane.f32.xlu1 %v1067_v40 }
 0xb28   :  { %1142 = vrot.lane.b32.xlu1 %v3967_v3, %s4639_s10 }
 0xb2c   :  { %3556 = vrot.lane.b32.xlu1 %v3555_v1, %s4637_s11 }
 0xb30   :  { %3561 = vrot.lane.b32.xlu1 %v3560_v11, %s4636_s12 }
 0xb9c   :  { %v1066_v50 = vpop.xlane.xlu0 %1065 }
 0xb9d   :  { %v1070_v58 = vsub.f32 %v1009_v12, %v1066_v50  ;;  %v3705_v50 = vld [vmem:[%s4626_s0] sm:$0xff] }
 0xb9f   :  { %v1072_v28 = vmul.f32 1.442695, %v1070_v58 }
 0xba1   :  { %3641 = vpow2.f32 %v1072_v28 }
 0xba4   :  { %v1069_v18 = vpop.xlane.xlu1 %1068 }
 0xba5   :  { %v1071_v29 = vsub.f32 %v1059_v24, %v1069_v18 }
 0xba7   :  { %v1074_v30 = vmul.f32 1.442695, %v1071_v29 }
 0xba8   :  { %v1143_v49 = vpop.permute.xlu1 %1142 }
 0xba9   :  { %3643 = vpow2.f32 %v1074_v30  ;;  %v1148_v3 = vsel %vm417_vm4, %v1143_v49, 0  ;;  %v3706_v30 = vld [vmem:[%s4626_s0 + $0x8] sm:$0xff] }
 0xbaa   :  { %3351 = vmatpush3.bf16.msra.mxu0 %v1148_v3 }
 0xbab   :  { %v3642_v31 = vpop.eup %3641  ;;  %3364 = vmatprep.subr.bf16.mxu0 %v3735_v9 }
 0xbac   :  { %v1076_v55 = vsel %vm285_vm3, %v3642_v31, 0.0  ;;  %v3557_v8 = vpop.permute.xlu1 %3556 }
 0xbad   :  { %1077 = vadd.xlane.f32.xlu0 %v1076_v55  ;;  %v3559_v12 = vunpack.i.h.bf16 %v3557_v8  ;;  %v3558_v13 = vunpack.i.l.bf16 %v3557_v8 }
 0xbaf   :  { %v1215_v17 = vsel %vm285_vm3, %v4009_v52, %v3559_v12  ;;  %v1214_v21 = vsel %vm285_vm3, %v4007_v46, %v3558_v13  ;;  %v3065_v46 = vld [vmem:[%s4629_s3 + $0x3] ss:$0 sm:$0xff]  ;;  %v3067_v12 = vld [vmem:[%s4629_s3 + $0x5] ss:$0 sm:$0xff] }
 0xbb0   :  { %v3562_v11 = vpop.permute.xlu1 %3561 }
 0xbb1   :  { %v3564_v14 = vunpack.i.h.bf16 %v3562_v11  ;;  %v3563_v15 = vunpack.i.l.bf16 %v3562_v11 }
 0xbb3   :  { %v3644_v62 = vpop.eup %3643  ;;  %v1218_v24 = vsel %vm1216_vm5, %v1215_v17, %v3564_v14  ;;  %v1217_v25 = vsel %vm1216_vm5, %v1214_v21, %v3563_v15  ;;  %v3593_v17 = vld [vmem:[%s4633_s7 + $0x10] sm:$0xff]   ;;  %v3594_v21 = vld [vmem:[%s4633_s7 + $0x18] sm:$0xff]  }
 0xbb4   :  { %v1079_v1 = vsel %vm285_vm3, %v3644_v62, 0.0 }
 0xbb5   :  { %1080 = vadd.xlane.f32.xlu0 %v1079_v1 }
 0xbcb   :  { %1094 = vrot.lane.b32.xlu0 %v3983_v19, %s4639_s10  ;;  %s3756_s10 = smov [#allocation2]  }
 0xbcc   :  { %s3023_s0 = sshll.u32 %s3756_s10, 4  ;;  %s3024_s0 = int_to_ptr.vmem [resolvable:$true] %s3023_s0 }
 0xbcd   :  { %s3711_s11 = scalar_lea.vmem %s3024_s0, 256  ;;  %p3716_p1 = scmp.lt.s32.totalorder %s3024_s0, %s3024_s0 }
 0xbce   :  { %p3712_p0 = scmp.ne.s32.totalorder %s3024_s0, %s3711_s11  ;;  %p3717_p2 = scmp.lt.s32.totalorder %s3711_s11, %s3711_s11 }
 0xbd0   :  { %p3718_p3 = por %p3717_p2, %p3716_p1 }
 0xbd2   :  { %p3719_p4 = pnand %p3718_p3, %p3712_p0 }
 0xc3a   :  { %v1078_v32 = vpop.xlane.xlu0 %1077 }
 0xc3b   :  { %3645 = vrcp.f32 %v1078_v32 }
 0xc42   :  { %v1081_v33 = vpop.xlane.xlu0 %1080 }
 0xc43   :  { %3647 = vrcp.f32 %v1081_v33 }
 0xc45   :  { %v3646_v34 = vpop.eup %3645 }
 0xc46   :  { %v1084_v35 = vmul.f32 %v3646_v34, %v1078_v32  ;;  %v1095_v36 = vpop.permute.xlu0 %1094 }
 0xc47   :  { %v1100_v37 = vsel %vm417_vm4, %v1095_v36, 0  ;;  %v3590_v36 = vld [vmem:[%s4632_s6 + $0x8] sm:$0xff]  }
 0xc48   :  { %v1086_v38 = vsub.f32 2.0, %v1084_v35  ;;  %3345 = vmatpush3.bf16.msra.mxu1 %v1100_v37  ;;  %v3589_v35 = vld [vmem:[%s4632_s6] sm:$0xff]  }
 0xc49   :  { %3356 = vmatprep.subr.bf16.mxu1 %v3735_v9  ;;  %v3591_v37 = vld [vmem:[%s4633_s7] sm:$0xff]  }
 0xc4a   :  { %v1088_v41 = vmul.f32 %v3646_v34, %v1086_v38  ;;  %v3592_v38 = vld [vmem:[%s4633_s7 + $0x8] sm:$0xff]  }
 0xc4c   :  { %v1090_v42 = vmul.f32 %v3642_v31, %v1088_v41 }
 0xc4d   :  { %v3648_v44 = vpop.eup %3647 }
 0xc4e   :  { %v1092_v45 = vpack.c.bf16 %v1090_v42, %v1090_v42  ;;  %v1085_v47 = vmul.f32 %v3648_v44, %v1081_v33 }
 0xc50   :  { %v1087_v39 = vsub.f32 2.0, %v1085_v47  ;;  %3347 = vmatmul.mubr.msk.bf16.vlgmr.msra.gmra.mrb[36].mxu1 %vm285_vm3, %v1092_v45 }
 0xc51   :  { %3360 = vmatprep.mubr.msk.bf16.mxu1 %vm3736_vm1, %v3735_v9  ;;  %3357 = vmatpush3.bf16.msra.mxu1 %v3587_v53 }
 0xc52   :  { %v1089_v19 = vmul.f32 %v3648_v44, %v1087_v39  ;;  %3358 = vmatprep.subr.bf16.mxu1 %v3735_v9 }
 0xc54   :  { %v1091_v48 = vmul.f32 %v3644_v62, %v1089_v19 }
 0xc55   :  { %3359 = vmatpush3.bf16.msra.mxu1 %v3588_v54 }
 0xc56   :  { %v1093_v51 = vpack.c.bf16 %v1091_v48, %v1091_v48  ;;  %3372 = vmatprep.subr.bf16.mxu1 %v3735_v9 }
 0xc58   :  { %3353 = vmatmul.mubr.msk.bf16.vlgmr.msra.gmra.mrb[24].mxu0 %vm285_vm3, %v1093_v51 }
 0xc59   :  { %3368 = vmatprep.mubr.msk.bf16.mxu0 %vm3736_vm1, %v3735_v9  ;;  %3365 = vmatpush3.bf16.msra.mxu0 %v3589_v35 }
 0xc5a   :  { %3366 = vmatprep.subr.bf16.mxu0 %v3735_v9 }
 0xc5d   :  { %3367 = vmatpush3.bf16.msra.mxu0 %v3590_v36  ;;  %v3080_v36 = vld [vmem:[%s4629_s3 + $0x7] ss:$0 sm:$0xff] }
 0xc5e   :  { %3392 = vmatprep.subr.bf16.mxu0 %v3735_v9 }
 0xd23   :  { %v1136_v57 = vpop.f32.mrb[36].mxu1 }
 0xd24   :  { %v3348_v59 = vpop.f32.mrb[37].mxu1 }
 0xd25   :  { %v1139_v60 = vpop.f32.mrb[38].mxu1 }
 0xd26   :  { %v3349_v0 = vpop.f32.mrb[39].mxu1 }
 0xd27   :  { %v3066_v0 = vld [vmem:[%s4629_s3 + $0x4] ss:$0 sm:$0xff] }
 0xd2b   :  { %v1184_v2 = vpop.f32.mrb[24].mxu0 }
 0xd2c   :  { %v3565_v4 = vpack.i.bf16 %v1184_v2, %v1136_v57  ;;  %v3354_v5 = vpop.f32.mrb[25].mxu0 }
 0xd2d   :  { %v1187_v7 = vpop.f32.mrb[26].mxu0 }
 0xd2e   :  { %v3355_v43 = vpop.f32.mrb[27].mxu0  ;;  %3566 = vrot.lane.b32.xlu0 %v3565_v4, %s4635_s15 }
 0xda0   :  { %v3567_v16 = vpop.permute.xlu0 %3566 }
 0xda1   :  { %v3569_v22 = vunpack.i.h.bf16 %v3567_v16  ;;  %v3568_v23 = vunpack.i.l.bf16 %v3567_v16 }
 0xda3   :  { %v1221_v26 = vsel %vm1219_vm6, %v1218_v24, %v3569_v22  ;;  %v1220_v27 = vsel %vm1219_vm6, %v1217_v25, %v3568_v23  ;;  %v3595_v22 = vld [vmem:[%s4633_s7 + $0x20] sm:$0xff]   ;;  %v3596_v23 = vld [vmem:[%s4633_s7 + $0x28] sm:$0xff]   ;;  %v3597_v24 = vld [vmem:[%s4633_s7 + $0x30] sm:$0xff]  }
 0xda4   :  { %v1222_v40 = vpack.c.bf16 %v1221_v26, %v1220_v27  ;;  %v3598_v25 = vld [vmem:[%s4633_s7 + $0x38] sm:$0xff]   ;;  %v3068_v26 = vld [vmem:[%s4629_s3 + $0x6] ss:$0 sm:$0xff] }
 0xda6   :  { %3361 = vmatmul.mubr.msk.bf16.vlgmr.msra.gmra.mrb[40].mxu1 %vm57_vm0, %v1222_v40 }
 0xda7   :  { %3388 = vmatprep.mubr.msk.bf16.mxu1 %vm3736_vm1, %v3735_v9  ;;  %3373 = vmatpush3.bf16.msra.mxu1 %v3591_v37 }
 0xda8   :  { %3374 = vmatprep.subr.bf16.mxu1 %v3735_v9 }
 0xdab   :  { %3375 = vmatpush3.bf16.msra.mxu1 %v3592_v38 }
 0xdac   :  { %3376 = vmatprep.subr.bf16.mxu1 %v3735_v9 }
 0xdaf   :  { %3377 = vmatpush3.bf16.msra.mxu1 %v3593_v17 }
 0xdb0   :  { %3378 = vmatprep.subr.bf16.mxu1 %v3735_v9 }
 0xdb3   :  { %3379 = vmatpush3.bf16.msra.mxu1 %v3594_v21 }
 0xdb4   :  { %3380 = vmatprep.subr.bf16.mxu1 %v3735_v9 }
 0xdb7   :  { %3381 = vmatpush3.bf16.msra.mxu1 %v3595_v22 }
 0xdb8   :  { %3382 = vmatprep.subr.bf16.mxu1 %v3735_v9 }
 0xdbb   :  { %3383 = vmatpush3.bf16.msra.mxu1 %v3596_v23 }
 0xdbc   :  { %3384 = vmatprep.subr.bf16.mxu1 %v3735_v9 }
 0xdbf   :  { %3385 = vmatpush3.bf16.msra.mxu1 %v3597_v24 }
 0xdc0   :  { %3386 = vmatprep.subr.bf16.mxu1 %v3735_v9 }
 0xdc3   :  { %3387 = vmatpush3.bf16.msra.mxu1 %v3598_v25 }
 0xdc4   :  { %3418 = vmatprep.subr.bf16.mxu1 %v3735_v9 }
 0xe79   :  { %v1276_v52 = vpop.f32.mrb[40].mxu1 }
 0xe7a   :  { %v1283_v58 = vadd.f32 %v3705_v50, %v1276_v52  ;;  %v3362_v28 = vpop.f32.mrb[41].mxu1 }
 0xe7b   :  { %v1279_v18 = vpop.f32.mrb[42].mxu1 }
 0xe7c   :  { %v4144_v29 = vadd.f32 %v3065_v46, %v1283_v58  ;;  %v1284_v49 = vadd.f32 %v3706_v30, %v1279_v18  ;;  %v3363_v3 = vpop.f32.mrb[43].mxu1 }
 0xe7e   :  { %v4149_v31 = vadd.f32 %v3065_v46, %v1284_v49  ;;  %v1294_v55 = vsel %vm57_vm0, %v4144_v29, 0.0  ;;  %v1302_v1 = vmul.f32 %v4144_v29, %v4144_v29 }
 0xe7f   :  { %1295 = vadd.xlane.f32.xlu1 %v1294_v55 }
 0xe80   :  { %v1297_v62 = vsel %vm57_vm0, %v4149_v31, 0.0  ;;  %v1304_v32 = vsel %vm57_vm0, %v1302_v1, 0.0  ;;  %v1303_v33 = vmul.f32 %v4149_v31, %v4149_v31 }
 0xe81   :  { %1298 = vadd.xlane.f32.xlu0 %v1297_v62 }
 0xe82   :  { %v1307_v34 = vsel %vm57_vm0, %v1303_v33, 0.0 }
 0xe85   :  { %1305 = vadd.xlane.f32.xlu0 %v1304_v32 }
 0xe89   :  { %1308 = vadd.xlane.f32.xlu0 %v1307_v34 }
 0xf0c   :  { %v1296_v41 = vpop.xlane.xlu1 %1295 }
 0xf0d   :  { %v1300_v44 = vmul.f32 0.03125, %v1296_v41 }
 0xf0e   :  { %v1299_v42 = vpop.xlane.xlu0 %1298 }
 0xf0f   :  { %v1314_v47 = vmul.f32 %v1300_v44, %v1300_v44  ;;  %v1301_v39 = vmul.f32 0.03125, %v1299_v42  ;;  %v1312_v5 = vsub.f32 %v4144_v29, %v1300_v44 }
 0xf11   :  { %v1315_v53 = vmul.f32 %v1301_v39, %v1301_v39  ;;  %v1313_v43 = vsub.f32 %v4149_v31, %v1301_v39 }
 0xf12   :  { %v1306_v45 = vpop.xlane.xlu0 %1305 }
 0xf13   :  { %v1310_v19 = vmul.f32 0.03125, %v1306_v45 }
 0xf15   :  { %v1316_v48 = vsub.f32 %v1310_v19, %v1314_v47 }
 0xf16   :  { %v1309_v51 = vpop.xlane.xlu0 %1308 }
 0xf17   :  { %v1318_v54 = vadd.f32 1e-05, %v1316_v48  ;;  %v1311_v57 = vmul.f32 0.03125, %v1309_v51 }
 0xf19   :  { %3649 = vrsqrt.f32 %v1318_v54  ;;  %v1317_v59 = vsub.f32 %v1311_v57, %v1315_v53  ;;  %v3599_v53 = vld [vmem:[%s4630_s4 + $0x10] sm:$0xff]   ;;  %v3600_v54 = vld [vmem:[%s4630_s4 + $0x18] sm:$0xff]  }
 0xf1b   :  { %v1319_v60 = vadd.f32 1e-05, %v1317_v59 }
 0xf1d   :  { %3651 = vrsqrt.f32 %v1319_v60 }
 0xf23   :  { %v3650_v2 = vpop.eup %3649 }
 0xf24   :  { %v1326_v4 = vmul.f32 %v3650_v2, %v3066_v0 }
 0xf26   :  { %v1328_v11 = vmul.f32 %v1326_v4, %v1312_v5 }
 0xf27   :  { %v3652_v7 = vpop.eup %3651 }
 0xf28   :  { %v1327_v8 = vmul.f32 %v3652_v7, %v3066_v0  ;;  %v1334_v14 = vadd.f32 %v3067_v12, %v1328_v11 }
 0xf2a   :  { %v1329_v13 = vmul.f32 %v1327_v8, %v1313_v43 }
 0xf2c   :  { %v1335_v15 = vadd.f32 %v3067_v12, %v1329_v13 }
 0xf2e   :  { %v1336_v16 = vpack.c.bf16 %v1335_v15, %v1334_v14  ;;  %v3081_v15 = vld [vmem:[%s4629_s3 + $0x8] ss:$0 sm:$0xff] }
 0xf30   :  { %3369 = vmatmul.mubr.msk.bf16.vlgmr.msra.gmra.mrb[28].mxu0 %vm57_vm0, %v1336_v16 }
 0xf31   :  { %3396 = vmatprep.mubr.msk.bf16.mxu0 %vm3736_vm1, %v3735_v9  ;;  %3393 = vmatpush3.bf16.msra.mxu0 %v3599_v53 }
 0xf32   :  { %3394 = vmatprep.subr.bf16.mxu0 %v3735_v9 }
 0xf35   :  { %3395 = vmatpush3.bf16.msra.mxu0 %v3600_v54 }
 0xf36   :  { %3400 = vmatprep.subr.bf16.mxu0 %v3735_v9 }
0x1003   :  { %v1395_v27 = vpop.f32.mrb[28].mxu0 }
0x1004   :  { %v1396_v40 = vadd.f32 %v3068_v26, %v1395_v27  ;;  %v3370_v52 = vpop.f32.mrb[29].mxu0 }
0x1005   :  { %v1398_v46 = vpop.f32.mrb[30].mxu0 }
0x1006   :  { %v1404_v50 = vmul.f32 0.70710677, %v1396_v40  ;;  %v1399_v58 = vadd.f32 %v3068_v26, %v1398_v46  ;;  %v3371_v28 = vpop.f32.mrb[31].mxu0  ;;  %v1402_v55 = vmul.f32 0.5, %v1396_v40  ;;  %v3082_v26 = vld [vmem:[%s4629_s3 + $0x9] ss:$0 sm:$0xff] }
0x1008   :  { %3653 = verf.f32 %v1404_v50  ;;  %v1405_v18 = vmul.f32 0.70710677, %v1399_v58  ;;  %v1403_v62 = vmul.f32 0.5, %v1399_v58  ;;  %v3087_v50 = vld [vmem:[%s4629_s3 + $0xa] ss:$0 sm:$0xff] }
0x100a   :  { %3655 = verf.f32 %v1405_v18 }
0x1012   :  { %v3654_v30 = vpop.eup %3653 }
0x1013   :  { %v1408_v49 = vadd.f32 1.0, %v3654_v30 }
0x1014   :  { %v3656_v3 = vpop.eup %3655 }
0x1015   :  { %v1409_v1 = vadd.f32 1.0, %v3656_v3  ;;  %v1410_v32 = vmul.f32 %v1408_v49, %v1402_v55 }
0x1017   :  { %v1411_v33 = vmul.f32 %v1409_v1, %v1403_v62 }
0x1019   :  { %v1412_v34 = vpack.c.bf16 %v1411_v33, %v1410_v32 }
0x101b   :  { %3389 = vmatmul.mubr.bf16.vlgmr.msra.gmra.mrb[44].mxu1 %v1412_v34 }
0x101c   :  { %3420 = vmatprep.mubr.msk.bf16.mxu1 %vm3736_vm1, %v3735_v9 }
0x10ee   :  { %v1511_v35 = vpop.f32.mrb[44].mxu1 }
0x10ef   :  { %v1518_v37 = vadd.f32 %v1511_v35, %v4144_v29  ;;  %v3390_v38 = vpop.f32.mrb[45].mxu1 }
0x10f0   :  { %v1514_v41 = vpop.f32.mrb[46].mxu1 }
0x10f1   :  { %v4221_v42 = vadd.f32 %v3080_v36, %v1518_v37  ;;  %v1519_v44 = vadd.f32 %v1514_v41, %v4149_v31  ;;  %v3391_v45 = vpop.f32.mrb[47].mxu1 }
0x10f3   :  { %v4224_v47 = vadd.f32 %v3080_v36, %v1519_v44  ;;  %v1529_v39 = vsel %vm57_vm0, %v4221_v42, 0.0  ;;  %v1537_v19 = vmul.f32 %v4221_v42, %v4221_v42 }
0x10f4   :  { %1530 = vadd.xlane.f32.xlu1 %v1529_v39 }
0x10f5   :  { %v1532_v48 = vsel %vm57_vm0, %v4224_v47, 0.0  ;;  %v1538_v29 = vmul.f32 %v4224_v47, %v4224_v47  ;;  %v1539_v51 = vsel %vm57_vm0, %v1537_v19, 0.0 }
0x10f6   :  { %1533 = vadd.xlane.f32.xlu0 %v1532_v48 }
0x10f7   :  { %v1542_v31 = vsel %vm57_vm0, %v1538_v29, 0.0 }
0x10f8   :  { %1540 = vadd.xlane.f32.xlu1 %v1539_v51 }
0x10fa   :  { %1543 = vadd.xlane.f32.xlu0 %v1542_v31 }
0x1181   :  { %v1531_v57 = vpop.xlane.xlu1 %1530 }
0x1182   :  { %v1535_v59 = vmul.f32 0.03125, %v1531_v57 }
0x1183   :  { %v1534_v60 = vpop.xlane.xlu0 %1533 }
0x1184   :  { %v1536_v0 = vmul.f32 0.03125, %v1534_v60  ;;  %v1549_v4 = vmul.f32 %v1535_v59, %v1535_v59  ;;  %v1547_v17 = vsub.f32 %v4221_v42, %v1535_v59 }
0x1185   :  { %v1541_v2 = vpop.xlane.xlu1 %1540 }
0x1186   :  { %v1545_v5 = vmul.f32 0.03125, %v1541_v2  ;;  %v1550_v43 = vmul.f32 %v1536_v0, %v1536_v0  ;;  %v1548_v23 = vsub.f32 %v4224_v47, %v1536_v0 }
0x1187   :  { %v1544_v7 = vpop.xlane.xlu0 %1543 }
0x1188   :  { %v1551_v8 = vsub.f32 %v1545_v5, %v1549_v4  ;;  %v1546_v11 = vmul.f32 0.03125, %v1544_v7 }
0x118a   :  { %v1553_v12 = vadd.f32 1e-05, %v1551_v8  ;;  %v1552_v13 = vsub.f32 %v1546_v11, %v1550_v43 }
0x118c   :  { %3657 = vrsqrt.f32 %v1553_v12  ;;  %v1554_v14 = vadd.f32 1e-05, %v1552_v13 }
0x118e   :  { %3659 = vrsqrt.f32 %v1554_v14 }
0x1196   :  { %v3658_v16 = vpop.eup %3657 }
0x1197   :  { %v1561_v21 = vmul.f32 %v3658_v16, %v3081_v15 }
0x1198   :  { %v3660_v22 = vpop.eup %3659 }
0x1199   :  { %v1562_v24 = vmul.f32 %v3660_v22, %v3081_v15  ;;  %v1563_v25 = vmul.f32 %v1561_v21, %v1547_v17  ;;  %v3707_v15 = vld [vmem:[%s4627_s1] sm:$0xff] }
0x119b   :  { %v1564_v27 = vmul.f32 %v1562_v24, %v1548_v23  ;;  %v1569_v40 = vadd.f32 %v3082_v26, %v1563_v25  ;;  %v3708_v25 = vld [vmem:[%s4627_s1 + $0x8] sm:$0xff] }
0x119d   :  { %v1570_v52 = vadd.f32 %v3082_v26, %v1564_v27 }
0x119f   :  { %v1571_v46 = vpack.c.bf16 %v1570_v52, %v1569_v40 }
0x11a1   :  { %3397 = vmatmul.mubr.msk.bf16.vlgmr.msra.gmra.mrb[32].mxu0 %vm57_vm0, %v1571_v46 }
0x11a2   :  { %3402 = vmatprep.mubr.msk.bf16.mxu0 %vm3736_vm1, %v3735_v9 }
0x1274   :  { %v1631_v58 = vpop.f32.mrb[32].mxu0 }
0x1275   :  { %v4258_v28 = vadd.f32 %v3087_v50, %v1631_v58  ;;  %v3398_v18 = vpop.f32.mrb[33].mxu0 }
0x1276   :  { %v1634_v30 = vpop.f32.mrb[34].mxu0 }
0x1277   :  { %v4260_v49 = vadd.f32 %v3087_v50, %v1634_v30  ;;  %1680 = vrot.lane.b32.xlu1 %v4258_v28, %s3737_s19  ;;  %v3399_v3 = vpop.f32.mrb[35].mxu0  ;;  %v1676_v31 = vmul.f32 %v4258_v28, %v3905_v10  ;;  %v1638_v16 = vmul.f32 %v3707_v15, %v4258_v28  ;;  %v4343_v30 = vld [vmem:[%s4628_s2] ss:$0 sm:$0xff] }
0x1279   :  { %1682 = vrot.lane.b32.xlu0 %v4260_v49, %s3737_s19  ;;  %v1677_v4 = vmul.f32 %v4260_v49, %v3914_v20  ;;  %v1639_v26 = vmul.f32 %v3708_v25, %v4260_v49 }
0x127d   :  { %1640 = vrot.lane.b32.xlu0 %v4258_v28, %s3738_s20 }
0x1281   :  { %1643 = vrot.lane.b32.xlu0 %v4260_v49, %s3738_s20 }
0x12e9   :  { %v1681_v55 = vpop.permute.xlu1 %1680 }
0x12ea   :  { %1686 = vrot.lane.b32.xlu1 %v1681_v55, %s3738_s20 }
0x12eb   :  { %v1683_v62 = vpop.permute.xlu0 %1682 }
0x12ee   :  { %1689 = vrot.lane.b32.xlu1 %v1683_v62, %s3738_s20 }
0x12ef   :  { %v1641_v37 = vpop.permute.xlu0 %1640 }
0x12f0   :  { %v1642_v19 = vsel %vm169_vm2, %v1641_v37, %v4258_v28 }
0x12f3   :  { %v1644_v48 = vpop.permute.xlu0 %1643 }
0x12f4   :  { %v1645_v51 = vsel %vm169_vm2, %v1644_v48, %v4260_v49 }
0x135c   :  { %v1687_v1 = vpop.permute.xlu1 %1686 }
0x135d   :  { %v1688_v32 = vsel %vm169_vm2, %v1687_v1, %v1681_v55 }
0x135e   :  { %1692 = vrot.lane.b32.xlu1 %v1688_v32, %s3738_s20 }
0x1360   :  { %v1690_v33 = vpop.permute.xlu1 %1689 }
0x1361   :  { %v1691_v34 = vsel %vm169_vm2, %v1690_v33, %v1683_v62 }
0x1362   :  { %1694 = vrot.lane.b32.xlu1 %v1691_v34, %s3738_s20  ;;  %v4350_v34 = vld [vmem:[%s4628_s2 + $0x1] ss:$0 sm:$0xff]  ;;  %s4641_s2 = smov 40  }
0x13d0   :  { %v1693_v35 = vpop.permute.xlu1 %1692 }
0x13d1   :  { %v1696_v36 = vsel %vm169_vm2, %v1693_v35, %v1681_v55 }
0x13d2   :  { %v1698_v38 = vmul.f32 %v1696_v36, %v3877_v56  ;;  %v1710_v41 = vmul.f32 %v1696_v36, %v3881_v61 }
0x13d4   :  { %1714 = vrot.lane.b32.xlu0 %v1710_v41, %s3739_s23  ;;  %1702 = vrot.lane.b32.xlu1 %v1698_v38, %s3740_s28  ;;  %v1695_v44 = vpop.permute.xlu1 %1694 }
0x13d5   :  { %v1697_v45 = vsel %vm169_vm2, %v1695_v44, %v1683_v62  ;;  %v4356_v44 = vpack.c.bf16 %v4258_v28, %v4258_v28 }
0x13d6   :  { %v1699_v39 = vmul.f32 %v1697_v45, %v3885_v63  ;;  %v1711_v29 = vmul.f32 %v1697_v45, %v3897_v6 }
0x13d8   :  { %1646 = vrot.lane.b32.xlu1 %v1642_v19, %s3738_s20  ;;  %1704 = vrot.lane.b32.xlu0 %v1699_v39, %s3740_s28 }
0x13dc   :  { %1716 = vrot.lane.b32.xlu1 %v1711_v29, %s3739_s23  ;;  %1648 = vrot.lane.b32.xlu0 %v1645_v51, %s3738_s20 }
0x1446   :  { %v1715_v53 = vpop.permute.xlu0 %1714  ;;  %v1703_v54 = vpop.permute.xlu1 %1702 }
0x1447   :  { %v1708_v57 = vadd.f32 %v1703_v54, %v1676_v31 }
0x1449   :  { %v1720_v59 = vadd.f32 %v1715_v53, %v1708_v57 }
0x144a   :  { %v1705_v60 = vpop.permute.xlu0 %1704  ;;  %v1647_v0 = vpop.permute.xlu1 %1646 }
0x144b   :  { %v4294_v2 = vpack.c.bf16 %v1720_v59, %v1720_v59  ;;  %v1650_v5 = vsel %vm169_vm2, %v1647_v0, %v4258_v28  ;;  %v1709_v43 = vadd.f32 %v1705_v60, %v1677_v4  ;;  %v4372_v60 = vpack.c.bf16 %v4260_v49, %v4260_v49 }
0x144c   :  { %v1652_v7 = vmul.f32 %v1650_v5, %v3877_v56  ;;  %v1664_v11 = vmul.f32 %v1650_v5, %v3881_v61 }
0x144d   :  { %1729 = vrot.lane.b32.xlu1 %v4294_v2, %s3737_s19 }
0x144e   :  { %v1649_v10 = vpop.permute.xlu0 %1648  ;;  %1656 = vrot.lane.b32.xlu0 %v1652_v7, %s3741_s13  ;;  %v1717_v8 = vpop.permute.xlu1 %1716 }
0x144f   :  { %v1721_v12 = vadd.f32 %v1717_v8, %v1709_v43  ;;  %v1651_v13 = vsel %vm169_vm2, %v1649_v10, %v4260_v49 }
0x1450   :  { %v1653_v56 = vmul.f32 %v1651_v13, %v3885_v63  ;;  %v1665_v14 = vmul.f32 %v1651_v13, %v3897_v6 }
0x1451   :  { %v4307_v20 = vpack.c.bf16 %v1721_v12, %v1721_v12  ;;  %1668 = vrot.lane.b32.xlu1 %v1664_v11, %s3742_s14 }
0x1453   :  { %1778 = vrot.lane.b32.xlu0 %v4307_v20, %s3737_s19 }
0x1455   :  { %1658 = vrot.lane.b32.xlu1 %v1653_v56, %s3741_s13 }
0x1457   :  { %1670 = vrot.lane.b32.xlu0 %v1665_v14, %s3742_s14 }
0x14bf   :  { %v1730_v61 = vpop.permute.xlu1 %1729 }
0x14c0   :  { %v1735_v17 = vsel %vm285_vm3, %v1730_v61, 0  ;;  %v1657_v21 = vpop.permute.xlu0 %1656 }
0x14c1   :  { %v1662_v63 = vadd.f32 %v1657_v21, %v1638_v16  ;;  %3401 = vmatpush3.bf16.xpose.msra.mxu0 %v1735_v17 }
0x14c2   :  { %3406 = vmatprep.subr.bf16.mxu0 %v3735_v9 }
0x14c3   :  { %v1669_v22 = vpop.permute.xlu1 %1668 }
0x14c4   :  { %v1674_v6 = vadd.f32 %v1669_v22, %v1662_v63 }
0x14c5   :  { %v1779_v23 = vpop.permute.xlu0 %1778 }
0x14c6   :  { %v4322_v24 = vpack.c.bf16 %v1674_v6, %v1674_v6  ;;  %v1784_v40 = vsel %vm285_vm3, %v1779_v23, 0 }
0x14c7   :  { %v1659_v27 = vpop.permute.xlu1 %1658 }
0x14c8   :  { %v1663_v52 = vadd.f32 %v1659_v27, %v1639_v26  ;;  %3403 = vmatmul.mubr.msk.bf16.vlgmr.msra.gmra.mrb[36].mxu0 %vm285_vm3, %v4322_v24 }
0x14c9   :  { %3407 = vmatpush3.bf16.xpose.msra.mxu0 %v1784_v40  ;;  %v1671_v46 = vpop.permute.xlu0 %1670  ;;  %3408 = vmatprep.mubr.msk.bf16.mxu0 %vm3736_vm1, %v3735_v9 }
0x14ca   :  { %v1675_v50 = vadd.f32 %v1671_v46, %v1663_v52  ;;  %3412 = vmatprep.subr.bf16.mxu0 %v3735_v9 }
0x14cc   :  { %v4334_v58 = vpack.c.bf16 %v1675_v50, %v1675_v50 }
0x14d0   :  { %3409 = vmatmul.mubr.msk.bf16.vlgmr.msra.gmra.mrb[40].mxu0 %vm285_vm3, %v4334_v58 }
0x14d1   :  { %3414 = vmatprep.mubr.msk.bf16.mxu0 %vm3736_vm1, %v3735_v9 }
0x159b   :  { %v1771_v18 = vpop.f32.mrb[36].mxu0 }
0x159c   :  { %v1772_v3 = vadd.f32 %v4343_v30, %v1771_v18  ;;  %v3404_v55 = vpop.f32.mrb[37].mxu0 }
0x159d   :  { %v1774_v62 = vpop.f32.mrb[38].mxu0 }
0x159e   :  { %v3405_v1 = vpop.f32.mrb[39].mxu0  ;;  %v1826_v32 = vsel %vm285_vm3, %v1772_v3, -inf }
0x159f   :  { %1827 = vmax.xlane.f32.xlu1 %v1826_v32 }
0x15a3   :  { %v1820_v33 = vpop.f32.mrb[40].mxu0 }
0x15a4   :  { %v1821_v35 = vadd.f32 %v4350_v34, %v1820_v33  ;;  %v3410_v36 = vpop.f32.mrb[41].mxu0 }
0x15a5   :  { %v1823_v37 = vpop.f32.mrb[42].mxu0 }
0x15a6   :  { %v3411_v38 = vpop.f32.mrb[43].mxu0  ;;  %v1829_v41 = vsel %vm285_vm3, %v1821_v35, -inf }
0x15a7   :  { %1830 = vmax.xlane.f32.xlu0 %v1829_v41 }
0x15b0   :  { %1857 = vrot.lane.b32.xlu1 %v4356_v44, %s3743_s21 }
0x15b4   :  { %1957 = vrot.lane.b32.xlu1 %v4294_v2, %s3744_s22 }
0x15b8   :  { %2008 = vrot.lane.b32.xlu1 %v4307_v20, %s3744_s22  ;;  %s4643_s22 = smov 16  }
0x15bc   :  { %1955 = vrot.lane.b32.xlu1 %v4322_v24, %s3745_s24 }
0x162c   :  { %v1828_v45 = vpop.xlane.xlu1 %1827 }
0x162d   :  { %v1832_v39 = vsub.f32 %v1772_v3, %v1828_v45 }
0x162f   :  { %v1834_v19 = vmul.f32 1.442695, %v1832_v39 }
0x1630   :  { %v1858_v48 = vpop.permute.xlu1 %1857 }
0x1631   :  { %3661 = vpow2.f32 %v1834_v19  ;;  %v1863_v28 = vsel %vm417_vm4, %v1858_v48, 0 }
0x1632   :  { %3413 = vmatpush3.bf16.msra.mxu0 %v1863_v28 }
0x1633   :  { %3424 = vmatprep.subr.bf16.mxu0 %v3735_v9 }
0x1634   :  { %v1831_v29 = vpop.xlane.xlu0 %1830  ;;  %v1958_v11 = vpop.permute.xlu1 %1957 }
0x1635   :  { %v1833_v51 = vsub.f32 %v1821_v35, %v1831_v29  ;;  %v1963_v61 = vsel %vm285_vm3, %v1958_v11, 0 }
0x1637   :  { %v1836_v31 = vmul.f32 1.442695, %v1833_v51 }
0x1638   :  { %v2009_v16 = vpop.permute.xlu1 %2008 }
0x1639   :  { %3663 = vpow2.f32 %v1836_v31  ;;  %v2014_v6 = vsel %vm285_vm3, %v2009_v16, 0 }
0x163b   :  { %v3662_v53 = vpop.eup %3661 }
0x163c   :  { %v1838_v54 = vsel %vm285_vm3, %v3662_v53, 0.0  ;;  %v1956_v22 = vpop.permute.xlu1 %1955 }
0x163d   :  { %1839 = vadd.xlane.f32.xlu0 %v1838_v54 }
0x1643   :  { %v3664_v57 = vpop.eup %3663 }
0x1644   :  { %v1841_v59 = vsel %vm285_vm3, %v3664_v57, 0.0 }
0x1645   :  { %1842 = vadd.xlane.f32.xlu0 %v1841_v59 }
0x165b   :  { %1906 = vrot.lane.b32.xlu0 %v4372_v60, %s3743_s21  ;;  %s4642_s21 = smov 8  }
0x165f   :  { %2006 = vrot.lane.b32.xlu0 %v4334_v58, %s3745_s24 }
0x16ca   :  { %v1840_v0 = vpop.xlane.xlu0 %1839 }
0x16cb   :  { %3665 = vrcp.f32 %v1840_v0 }
0x16d2   :  { %v1843_v4 = vpop.xlane.xlu0 %1842 }
0x16d3   :  { %3667 = vrcp.f32 %v1843_v4 }
0x16d5   :  { %v3666_v5 = vpop.eup %3665 }
0x16d6   :  { %v1846_v7 = vmul.f32 %v3666_v5, %v1840_v0  ;;  %v1907_v43 = vpop.permute.xlu0 %1906 }
0x16d7   :  { %v1912_v10 = vsel %vm417_vm4, %v1907_v43, 0 }
0x16d8   :  { %v1848_v8 = vsub.f32 2.0, %v1846_v7  ;;  %3419 = vmatpush3.bf16.msra.mxu1 %v1912_v10 }
0x16d9   :  { %3430 = vmatprep.subr.bf16.mxu1 %v3735_v9 }
0x16da   :  { %v1850_v49 = vmul.f32 %v3666_v5, %v1848_v8  ;;  %v2007_v23 = vpop.permute.xlu0 %2006 }
0x16dc   :  { %v1852_v12 = vmul.f32 %v3662_v53, %v1850_v49 }
0x16dd   :  { %v3668_v13 = vpop.eup %3667 }
0x16de   :  { %v1854_v56 = vpack.c.bf16 %v1852_v12, %v1852_v12  ;;  %v1847_v14 = vmul.f32 %v3668_v13, %v1843_v4 }
0x16e0   :  { %v1849_v15 = vsub.f32 2.0, %v1847_v14  ;;  %3415 = vmatmul.mubr.msk.bf16.vlgmr.msra.gmra.mrb[44].mxu0 %vm285_vm3, %v1854_v56 }
0x16e1   :  { %3425 = vmatpush3.bf16.xpose.msra.mxu0 %v1963_v61  ;;  %3426 = vmatprep.mubr.msk.bf16.mxu0 %vm3736_vm1, %v3735_v9 }
0x16e2   :  { %v1851_v17 = vmul.f32 %v3668_v13, %v1849_v15  ;;  %3436 = vmatprep.subr.bf16.mxu0 %v3735_v9 }
0x16e4   :  { %v1853_v21 = vmul.f32 %v3664_v57, %v1851_v17 }
0x16e6   :  { %v1855_v63 = vpack.c.bf16 %v1853_v21, %v1853_v21 }
0x16e8   :  { %3421 = vmatmul.mubr.msk.bf16.vlgmr.msra.gmra.mrb[48].mxu1 %vm285_vm3, %v1855_v63  ;;  %3427 = vmatmul.mubr.msk.bf16.vlgmr.msra.gmra.mrb[48].mxu0 %vm285_vm3, %v1956_v22 }
0x16e9   :  { %3431 = vmatpush3.bf16.xpose.msra.mxu1 %v2014_v6  ;;  %3432 = vmatprep.mubr.msk.bf16.mxu1 %vm3736_vm1, %v3735_v9 }
0x16ea   :  { %3442 = vmatprep.subr.bf16.mxu1 %v3735_v9  ;;  %3438 = vmatprep.mubr.msk.bf16.mxu0 %vm3736_vm1, %v3735_v9 }
0x16f0   :  { %3433 = vmatmul.mubr.msk.bf16.vlgmr.msra.gmra.mrb[52].mxu1 %vm285_vm3, %v2007_v23 }
0x16f1   :  { %3444 = vmatprep.mubr.msk.bf16.mxu1 %vm3736_vm1, %v3735_v9 }
0x17b3   :  { %v4396_v25 = vpop.f32.mrb[44].mxu0 }
0x17b4   :  { %v3416_v26 = vpop.f32.mrb[45].mxu0 }
0x17b5   :  { %v1902_v27 = vpop.f32.mrb[46].mxu0 }
0x17b6   :  { %v3417_v40 = vpop.f32.mrb[47].mxu0 }
0x17bb   :  { %v4398_v52 = vpop.f32.mrb[48].mxu1  ;;  %v1999_v46 = vpop.f32.mrb[48].mxu0 }
0x17bc   :  { %v2000_v50 = vadd.f32 %v4343_v30, %v1999_v46  ;;  %v3422_v18 = vpop.f32.mrb[49].mxu1  ;;  %v3428_v3 = vpop.f32.mrb[49].mxu0 }
0x17bd   :  { %v1951_v55 = vpop.f32.mrb[50].mxu1  ;;  %v2002_v62 = vpop.f32.mrb[50].mxu0 }
0x17be   :  { %v3423_v1 = vpop.f32.mrb[51].mxu1  ;;  %v3429_v32 = vpop.f32.mrb[51].mxu0  ;;  %v2056_v33 = vsel %vm285_vm3, %v2000_v50, -inf }
0x17bf   :  { %2057 = vmax.xlane.f32.xlu1 %v2056_v33 }
0x17c3   :  { %v2050_v35 = vpop.f32.mrb[52].mxu1 }
0x17c4   :  { %v2051_v36 = vadd.f32 %v4350_v34, %v2050_v35  ;;  %v3434_v37 = vpop.f32.mrb[53].mxu1 }
0x17c5   :  { %v2053_v38 = vpop.f32.mrb[54].mxu1 }
0x17c6   :  { %v3435_v41 = vpop.f32.mrb[55].mxu1  ;;  %v2059_v45 = vsel %vm285_vm3, %v2051_v36, -inf }
0x17c7   :  { %2060 = vmax.xlane.f32.xlu0 %v2059_v45 }
0x17d0   :  { %2086 = vrot.lane.b32.xlu1 %v4356_v44, %s3746_s25 }
0x17d4   :  { %2184 = vrot.lane.b32.xlu1 %v4294_v2, %s3747_s26 }
0x17d8   :  { %2234 = vrot.lane.b32.xlu1 %v4307_v20, %s3747_s26 }
0x17dc   :  { %2182 = vrot.lane.b32.xlu1 %v4322_v24, %s3748_s27 }
0x184c   :  { %v2058_v39 = vpop.xlane.xlu1 %2057 }
0x184d   :  { %v2062_v19 = vsub.f32 %v2000_v50, %v2058_v39 }
0x184f   :  { %v2064_v48 = vmul.f32 1.442695, %v2062_v19 }
0x1850   :  { %v2087_v28 = vpop.permute.xlu1 %2086 }
0x1851   :  { %3669 = vpow2.f32 %v2064_v48  ;;  %v2092_v29 = vsel %vm417_vm4, %v2087_v28, 0 }
0x1852   :  { %3437 = vmatpush3.bf16.msra.mxu0 %v2092_v29 }
0x1853   :  { %3448 = vmatprep.subr.bf16.mxu0 %v3735_v9 }
0x1854   :  { %v2061_v51 = vpop.xlane.xlu0 %2060  ;;  %v2185_v12 = vpop.permute.xlu1 %2184 }
0x1855   :  { %v2063_v31 = vsub.f32 %v2051_v36, %v2061_v51  ;;  %v2190_v15 = vsel %vm285_vm3, %v2185_v12, 0 }
0x1857   :  { %v2066_v53 = vmul.f32 1.442695, %v2063_v31 }
0x1858   :  { %v2235_v17 = vpop.permute.xlu1 %2234 }
0x1859   :  { %3671 = vpow2.f32 %v2066_v53  ;;  %v2240_v23 = vsel %vm285_vm3, %v2235_v17, 0 }
0x185b   :  { %v3670_v54 = vpop.eup %3669 }
0x185c   :  { %v2068_v57 = vsel %vm285_vm3, %v3670_v54, 0.0  ;;  %v2183_v6 = vpop.permute.xlu1 %2182 }
0x185d   :  { %2069 = vadd.xlane.f32.xlu0 %v2068_v57 }
0x1863   :  { %v3672_v59 = vpop.eup %3671 }
0x1864   :  { %v2071_v0 = vsel %vm285_vm3, %v3672_v59, 0.0 }
0x1865   :  { %2072 = vadd.xlane.f32.xlu0 %v2071_v0 }
0x187b   :  { %2134 = vrot.lane.b32.xlu0 %v4372_v60, %s3746_s25 }
0x187f   :  { %2232 = vrot.lane.b32.xlu0 %v4334_v58, %s3748_s27 }
0x18ea   :  { %v2070_v4 = vpop.xlane.xlu0 %2069 }
0x18eb   :  { %3673 = vrcp.f32 %v2070_v4 }
0x18f2   :  { %v2073_v5 = vpop.xlane.xlu0 %2072 }
0x18f3   :  { %3675 = vrcp.f32 %v2073_v5 }
0x18f5   :  { %v3674_v7 = vpop.eup %3673 }
0x18f6   :  { %v2076_v43 = vmul.f32 %v3674_v7, %v2070_v4  ;;  %v2135_v10 = vpop.permute.xlu0 %2134 }
0x18f7   :  { %v2140_v8 = vsel %vm417_vm4, %v2135_v10, 0 }
0x18f8   :  { %v2078_v49 = vsub.f32 2.0, %v2076_v43  ;;  %3443 = vmatpush3.bf16.msra.mxu1 %v2140_v8 }
0x18f9   :  { %3454 = vmatprep.subr.bf16.mxu1 %v3735_v9 }
0x18fa   :  { %v2080_v11 = vmul.f32 %v3674_v7, %v2078_v49  ;;  %v2233_v26 = vpop.permute.xlu0 %2232 }
0x18fc   :  { %v2082_v13 = vmul.f32 %v3670_v54, %v2080_v11 }
0x18fd   :  { %v3676_v56 = vpop.eup %3675 }
0x18fe   :  { %v2084_v14 = vpack.c.bf16 %v2082_v13, %v2082_v13  ;;  %v2077_v61 = vmul.f32 %v3676_v56, %v2073_v5 }
0x1900   :  { %v2079_v16 = vsub.f32 2.0, %v2077_v61  ;;  %3439 = vmatmul.mubr.msk.bf16.vlgmr.msra.gmra.mrb[52].mxu0 %vm285_vm3, %v2084_v14 }
0x1901   :  { %3449 = vmatpush3.bf16.xpose.msra.mxu0 %v2190_v15  ;;  %3450 = vmatprep.mubr.msk.bf16.mxu0 %vm3736_vm1, %v3735_v9 }
0x1902   :  { %v2081_v21 = vmul.f32 %v3676_v56, %v2079_v16  ;;  %3460 = vmatprep.subr.bf16.mxu0 %v3735_v9 }
0x1904   :  { %v2083_v63 = vmul.f32 %v3672_v59, %v2081_v21 }
0x1906   :  { %v2085_v22 = vpack.c.bf16 %v2083_v63, %v2083_v63 }
0x1908   :  { %3445 = vmatmul.mubr.msk.bf16.vlgmr.msra.gmra.mrb[56].mxu1 %vm285_vm3, %v2085_v22  ;;  %3451 = vmatmul.mubr.msk.bf16.vlgmr.msra.gmra.mrb[56].mxu0 %vm285_vm3, %v2183_v6 }
0x1909   :  { %3455 = vmatpush3.bf16.xpose.msra.mxu1 %v2240_v23  ;;  %3456 = vmatprep.mubr.msk.bf16.mxu1 %vm3736_vm1, %v3735_v9 }
0x190a   :  { %3466 = vmatprep.subr.bf16.mxu1 %v3735_v9  ;;  %3462 = vmatprep.mubr.msk.bf16.mxu0 %vm3736_vm1, %v3735_v9 }
0x1910   :  { %3457 = vmatmul.mubr.msk.bf16.vlgmr.msra.gmra.mrb[60].mxu1 %vm285_vm3, %v2233_v26 }
0x1911   :  { %3468 = vmatprep.mubr.msk.bf16.mxu1 %vm3736_vm1, %v3735_v9 }
0x19d3   :  { %v4438_v27 = vpop.f32.mrb[52].mxu0 }
0x19d4   :  { %v3440_v40 = vpop.f32.mrb[53].mxu0 }
0x19d5   :  { %v2131_v46 = vpop.f32.mrb[54].mxu0 }
0x19d6   :  { %v3441_v50 = vpop.f32.mrb[55].mxu0 }
0x19db   :  { %v4440_v18 = vpop.f32.mrb[56].mxu1  ;;  %v2226_v3 = vpop.f32.mrb[56].mxu0 }
0x19dc   :  { %v3570_v55 = vpack.i.bf16 %v4440_v18, %v4438_v27  ;;  %v2227_v62 = vadd.f32 %v4343_v30, %v2226_v3  ;;  %v3446_v1 = vpop.f32.mrb[57].mxu1  ;;  %v3452_v32 = vpop.f32.mrb[57].mxu0 }
0x19dd   :  { %v2179_v33 = vpop.f32.mrb[58].mxu1  ;;  %v2229_v35 = vpop.f32.mrb[58].mxu0 }
0x19de   :  { %v3447_v36 = vpop.f32.mrb[59].mxu1  ;;  %v3453_v37 = vpop.f32.mrb[59].mxu0  ;;  %v2282_v38 = vsel %vm285_vm3, %v2227_v62, -inf }
0x19df   :  { %2283 = vmax.xlane.f32.xlu1 %v2282_v38 }
0x19e3   :  { %v2276_v41 = vpop.f32.mrb[60].mxu1 }
0x19e4   :  { %v2277_v45 = vadd.f32 %v4350_v34, %v2276_v41  ;;  %v3458_v39 = vpop.f32.mrb[61].mxu1 }
0x19e5   :  { %v2279_v19 = vpop.f32.mrb[62].mxu1 }
0x19e6   :  { %v3459_v48 = vpop.f32.mrb[63].mxu1  ;;  %v2285_v28 = vsel %vm285_vm3, %v2277_v45, -inf }
0x19e7   :  { %2286 = vmax.xlane.f32.xlu0 %v2285_v28 }
0x19f0   :  { %2312 = vrot.lane.b32.xlu1 %v4356_v44, %s3749_s29 }
0x19f4   :  { %2410 = vrot.lane.b32.xlu1 %v4294_v2, %s3750_s30 }
0x19f8   :  { %2460 = vrot.lane.b32.xlu1 %v4307_v20, %s3750_s30 }
0x19fc   :  { %2408 = vrot.lane.b32.xlu1 %v4322_v24, %s3751_s9 }
0x1a6c   :  { %v2284_v29 = vpop.xlane.xlu1 %2283 }
0x1a6d   :  { %v2288_v51 = vsub.f32 %v2227_v62, %v2284_v29 }
0x1a6f   :  { %v2290_v31 = vmul.f32 1.442695, %v2288_v51 }
0x1a70   :  { %v2313_v53 = vpop.permute.xlu1 %2312 }
0x1a71   :  { %3677 = vpow2.f32 %v2290_v31  ;;  %v2318_v54 = vsel %vm417_vm4, %v2313_v53, 0 }
0x1a72   :  { %3461 = vmatpush3.bf16.msra.mxu0 %v2318_v54 }
0x1a73   :  { %3472 = vmatprep.subr.bf16.mxu0 %v3735_v9 }
0x1a74   :  { %v2287_v57 = vpop.xlane.xlu0 %2286  ;;  %v2411_v13 = vpop.permute.xlu1 %2410 }
0x1a75   :  { %v2289_v59 = vsub.f32 %v2277_v45, %v2287_v57 }
0x1a77   :  { %v2292_v0 = vmul.f32 1.442695, %v2289_v59 }
0x1a78   :  { %v2461_v17 = vpop.permute.xlu1 %2460 }
0x1a79   :  { %3679 = vpow2.f32 %v2292_v0  ;;  %v2466_v23 = vsel %vm285_vm3, %v2461_v17, 0 }
0x1a7b   :  { %v3678_v2 = vpop.eup %3677 }
0x1a7c   :  { %v2294_v20 = vsel %vm285_vm3, %v3678_v2, 0.0  ;;  %v2409_v6 = vpop.permute.xlu1 %2408 }
0x1a7d   :  { %2295 = vadd.xlane.f32.xlu0 %v2294_v20 }
0x1a83   :  { %v3680_v4 = vpop.eup %3679 }
0x1a84   :  { %v2297_v24 = vsel %vm285_vm3, %v3680_v4, 0.0 }
0x1a85   :  { %2298 = vadd.xlane.f32.xlu0 %v2297_v24 }
0x1a9b   :  { %2360 = vrot.lane.b32.xlu0 %v4372_v60, %s3749_s29  ;;  %s4644_s29 = smov 24  }
0x1a9f   :  { %2458 = vrot.lane.b32.xlu0 %v4334_v58, %s3751_s9  ;;  %v2416_v58 = vsel %vm285_vm3, %v2411_v13, 0 }
0x1b0a   :  { %v2296_v5 = vpop.xlane.xlu0 %2295 }
0x1b0b   :  { %3681 = vrcp.f32 %v2296_v5 }
0x1b12   :  { %v2299_v7 = vpop.xlane.xlu0 %2298 }
0x1b13   :  { %3683 = vrcp.f32 %v2299_v7 }
0x1b15   :  { %v3682_v43 = vpop.eup %3681 }
0x1b16   :  { %v2302_v10 = vmul.f32 %v3682_v43, %v2296_v5  ;;  %v2361_v8 = vpop.permute.xlu0 %2360 }
0x1b17   :  { %v2366_v49 = vsel %vm417_vm4, %v2361_v8, 0 }
0x1b18   :  { %v2304_v11 = vsub.f32 2.0, %v2302_v10  ;;  %3467 = vmatpush3.bf16.msra.mxu1 %v2366_v49 }
0x1b19   :  { %3478 = vmatprep.subr.bf16.mxu1 %v3735_v9 }
0x1b1a   :  { %v2306_v12 = vmul.f32 %v3682_v43, %v2304_v11  ;;  %v2459_v26 = vpop.permute.xlu0 %2458 }
0x1b1c   :  { %v2308_v56 = vmul.f32 %v3678_v2, %v2306_v12 }
0x1b1d   :  { %v3684_v14 = vpop.eup %3683 }
0x1b1e   :  { %v2310_v61 = vpack.c.bf16 %v2308_v56, %v2308_v56  ;;  %v2303_v15 = vmul.f32 %v3684_v14, %v2299_v7 }
0x1b20   :  { %v2305_v16 = vsub.f32 2.0, %v2303_v15  ;;  %3463 = vmatmul.mubr.msk.bf16.vlgmr.msra.gmra.mrb[60].mxu0 %vm285_vm3, %v2310_v61  ;;  %v3601_v15 = vld [vmem:[%s4631_s5 + $0x10] sm:$0xff]  }
0x1b21   :  { %3473 = vmatpush3.bf16.xpose.msra.mxu0 %v2416_v58  ;;  %3474 = vmatprep.mubr.msk.bf16.mxu0 %vm3736_vm1, %v3735_v9  ;;  %v3602_v58 = vld [vmem:[%s4631_s5 + $0x18] sm:$0xff]  }
0x1b22   :  { %v2307_v21 = vmul.f32 %v3684_v14, %v2305_v16  ;;  %3484 = vmatprep.subr.bf16.mxu0 %v3735_v9 }
0x1b24   :  { %v2309_v63 = vmul.f32 %v3680_v4, %v2307_v21 }
0x1b26   :  { %v2311_v22 = vpack.c.bf16 %v2309_v63, %v2309_v63 }
0x1b28   :  { %3469 = vmatmul.mubr.msk.bf16.vlgmr.msra.gmra.mrb[64].mxu1 %vm285_vm3, %v2311_v22  ;;  %3475 = vmatmul.mubr.msk.bf16.vlgmr.msra.gmra.mrb[64].mxu0 %vm285_vm3, %v2409_v6 }
0x1b29   :  { %3479 = vmatpush3.bf16.xpose.msra.mxu1 %v2466_v23  ;;  %3480 = vmatprep.mubr.msk.bf16.mxu1 %vm3736_vm1, %v3735_v9 }
0x1b2a   :  { %3490 = vmatprep.subr.bf16.mxu1 %v3735_v9  ;;  %3486 = vmatprep.mubr.msk.bf16.mxu0 %vm3736_vm1, %v3735_v9 }
0x1b30   :  { %3481 = vmatmul.mubr.msk.bf16.vlgmr.msra.gmra.mrb[68].mxu1 %vm285_vm3, %v2459_v26 }
0x1b31   :  { %3492 = vmatprep.mubr.msk.bf16.mxu1 %vm3736_vm1, %v3735_v9 }
0x1bf3   :  { %v2354_v40 = vpop.f32.mrb[60].mxu0 }
0x1bf4   :  { %v3464_v46 = vpop.f32.mrb[61].mxu0 }
0x1bf5   :  { %v2357_v50 = vpop.f32.mrb[62].mxu0 }
0x1bf6   :  { %v3465_v3 = vpop.f32.mrb[63].mxu0 }
0x1bfb   :  { %v2402_v62 = vpop.f32.mrb[64].mxu1  ;;  %v2452_v1 = vpop.f32.mrb[64].mxu0 }
0x1bfc   :  { %v3575_v32 = vpack.i.bf16 %v2402_v62, %v2354_v40  ;;  %v2453_v33 = vadd.f32 %v4343_v30, %v2452_v1  ;;  %v3470_v35 = vpop.f32.mrb[65].mxu1  ;;  %v3476_v36 = vpop.f32.mrb[65].mxu0 }
0x1bfd   :  { %v2405_v37 = vpop.f32.mrb[66].mxu1  ;;  %v2455_v38 = vpop.f32.mrb[66].mxu0 }
0x1bfe   :  { %v3471_v41 = vpop.f32.mrb[67].mxu1  ;;  %v3477_v45 = vpop.f32.mrb[67].mxu0  ;;  %v2508_v39 = vsel %vm285_vm3, %v2453_v33, -inf }
0x1bff   :  { %2509 = vmax.xlane.f32.xlu1 %v2508_v39 }
0x1c03   :  { %v2502_v19 = vpop.f32.mrb[68].mxu1 }
0x1c04   :  { %v2503_v48 = vadd.f32 %v4350_v34, %v2502_v19  ;;  %v3482_v28 = vpop.f32.mrb[69].mxu1 }
0x1c05   :  { %v2505_v29 = vpop.f32.mrb[70].mxu1 }
0x1c06   :  { %v3483_v51 = vpop.f32.mrb[71].mxu1  ;;  %v2511_v31 = vsel %vm285_vm3, %v2503_v48, -inf }
0x1c07   :  { %2512 = vmax.xlane.f32.xlu0 %v2511_v31 }
0x1c10   :  { %2538 = vrot.lane.b32.xlu1 %v4356_v44, %s4641_s2 }
0x1c14   :  { %3571 = vrot.lane.b32.xlu1 %v3570_v55, %s4642_s21 }
0x1c18   :  { %3576 = vrot.lane.b32.xlu1 %v3575_v32, %s4643_s22 }
0x1c8c   :  { %v2510_v30 = vpop.xlane.xlu1 %2509 }
0x1c8d   :  { %v2514_v53 = vsub.f32 %v2453_v33, %v2510_v30 }
0x1c8f   :  { %v2516_v54 = vmul.f32 1.442695, %v2514_v53 }
0x1c90   :  { %v2539_v34 = vpop.permute.xlu1 %2538 }
0x1c91   :  { %3685 = vpow2.f32 %v2516_v54  ;;  %v2544_v57 = vsel %vm417_vm4, %v2539_v34, 0 }
0x1c92   :  { %3485 = vmatpush3.bf16.msra.mxu0 %v2544_v57 }
0x1c93   :  { %3496 = vmatprep.subr.bf16.mxu0 %v3735_v9 }
0x1c94   :  { %v2513_v59 = vpop.xlane.xlu0 %2512  ;;  %v3572_v46 = vpop.permute.xlu1 %3571 }
0x1c95   :  { %v2515_v0 = vsub.f32 %v2503_v48, %v2513_v59  ;;  %v3574_v3 = vunpack.i.h.bf16 %v3572_v46  ;;  %v3573_v62 = vunpack.i.l.bf16 %v3572_v46  ;;  %v3608_v46 = vld [vmem:[%s4633_s7 + $0x58] sm:$0xff]  }
0x1c97   :  { %v2518_v44 = vmul.f32 1.442695, %v2515_v0  ;;  %v2659_v35 = vsel %vm285_vm3, %v4398_v52, %v3574_v3  ;;  %v2658_v36 = vsel %vm285_vm3, %v4396_v25, %v3573_v62  ;;  %v3114_v25 = vld [vmem:[%s4629_s3 + $0xb] ss:$0 sm:$0xff]  ;;  %v3611_v62 = vld [vmem:[%s4633_s7 + $0x70] sm:$0xff]  }
0x1c98   :  { %v3577_v50 = vpop.permute.xlu1 %3576  ;;  %v3610_v3 = vld [vmem:[%s4633_s7 + $0x68] sm:$0xff]  }
0x1c99   :  { %3687 = vpow2.f32 %v2518_v44  ;;  %v3579_v1 = vunpack.i.h.bf16 %v3577_v50  ;;  %v3578_v32 = vunpack.i.l.bf16 %v3577_v50  ;;  %v3603_v44 = vld [vmem:[%s4632_s6 + $0x10] sm:$0xff]   ;;  %v3609_v50 = vld [vmem:[%s4633_s7 + $0x60] sm:$0xff]  }
0x1c9b   :  { %v3686_v2 = vpop.eup %3685  ;;  %v2661_v41 = vsel %vm1216_vm5, %v2659_v35, %v3579_v1  ;;  %v2660_v45 = vsel %vm1216_vm5, %v2658_v36, %v3578_v32  ;;  %v3612_v1 = vld [vmem:[%s4633_s7 + $0x78] sm:$0xff]   ;;  %v3121_v32 = vld [vmem:[%s4629_s3 + $0xe] ss:$0 sm:$0xff] }
0x1c9c   :  { %v2520_v27 = vsel %vm285_vm3, %v3686_v2, 0.0 }
0x1c9d   :  { %2521 = vadd.xlane.f32.xlu0 %v2520_v27  ;;  %v3605_v27 = vld [vmem:[%s4633_s7 + $0x40] sm:$0xff]  }
0x1ca3   :  { %v3688_v18 = vpop.eup %3687 }
0x1ca4   :  { %v2523_v55 = vsel %vm285_vm3, %v3688_v18, 0.0 }
0x1ca5   :  { %2524 = vadd.xlane.f32.xlu0 %v2523_v55 }
0x1cbb   :  { %2586 = vrot.lane.b32.xlu0 %v4372_v60, %s4641_s2 }
0x1d2a   :  { %v2522_v20 = vpop.xlane.xlu0 %2521 }
0x1d2b   :  { %3689 = vrcp.f32 %v2522_v20 }
0x1d32   :  { %v2525_v4 = vpop.xlane.xlu0 %2524 }
0x1d33   :  { %3691 = vrcp.f32 %v2525_v4 }
0x1d35   :  { %v3690_v24 = vpop.eup %3689 }
0x1d36   :  { %v2528_v5 = vmul.f32 %v3690_v24, %v2522_v20  ;;  %v2587_v7 = vpop.permute.xlu0 %2586 }
0x1d37   :  { %v2592_v43 = vsel %vm417_vm4, %v2587_v7, 0 }
0x1d38   :  { %v2530_v10 = vsub.f32 2.0, %v2528_v5  ;;  %3491 = vmatpush3.bf16.msra.mxu1 %v2592_v43 }
0x1d39   :  { %3504 = vmatprep.subr.bf16.mxu1 %v3735_v9 }
0x1d3a   :  { %v2532_v8 = vmul.f32 %v3690_v24, %v2530_v10 }
0x1d3c   :  { %v2534_v49 = vmul.f32 %v3686_v2, %v2532_v8  ;;  %v3604_v2 = vld [vmem:[%s4632_s6 + $0x18] sm:$0xff]  }
0x1d3d   :  { %v3692_v11 = vpop.eup %3691 }
0x1d3e   :  { %v2536_v12 = vpack.c.bf16 %v2534_v49, %v2534_v49  ;;  %v2529_v13 = vmul.f32 %v3692_v11, %v2525_v4 }
0x1d40   :  { %v2531_v56 = vsub.f32 2.0, %v2529_v13  ;;  %3487 = vmatmul.mubr.msk.bf16.vlgmr.msra.gmra.mrb[68].mxu0 %vm285_vm3, %v2536_v12 }
0x1d41   :  { %3500 = vmatprep.mubr.msk.bf16.mxu0 %vm3736_vm1, %v3735_v9  ;;  %3497 = vmatpush3.bf16.msra.mxu0 %v3601_v15 }
0x1d42   :  { %v2533_v60 = vmul.f32 %v3692_v11, %v2531_v56  ;;  %3498 = vmatprep.subr.bf16.mxu0 %v3735_v9 }
0x1d44   :  { %v2535_v14 = vmul.f32 %v3688_v18, %v2533_v60  ;;  %v3606_v18 = vld [vmem:[%s4633_s7 + $0x48] sm:$0xff]  }
0x1d45   :  { %3499 = vmatpush3.bf16.msra.mxu0 %v3602_v58  ;;  %v3115_v60 = vld [vmem:[%s4629_s3 + $0xc] ss:$0 sm:$0xff] }
0x1d46   :  { %v2537_v61 = vpack.c.bf16 %v2535_v14, %v2535_v14  ;;  %3512 = vmatprep.subr.bf16.mxu0 %v3735_v9 }
0x1d48   :  { %3493 = vmatmul.mubr.msk.bf16.vlgmr.msra.gmra.mrb[72].mxu1 %vm285_vm3, %v2537_v61 }
0x1d49   :  { %3508 = vmatprep.mubr.msk.bf16.mxu1 %vm3736_vm1, %v3735_v9  ;;  %3505 = vmatpush3.bf16.msra.mxu1 %v3603_v44 }
0x1d4a   :  { %3506 = vmatprep.subr.bf16.mxu1 %v3735_v9 }
0x1d4d   :  { %3507 = vmatpush3.bf16.msra.mxu1 %v3604_v2 }
0x1e13   :  { %v2580_v16 = vpop.f32.mrb[68].mxu0 }
0x1e14   :  { %v3488_v17 = vpop.f32.mrb[69].mxu0 }
0x1e15   :  { %v2583_v21 = vpop.f32.mrb[70].mxu0 }
0x1e16   :  { %v3489_v63 = vpop.f32.mrb[71].mxu0 }
0x1e17   :  { %v3116_v63 = vld [vmem:[%s4629_s3 + $0xd] ss:$0 sm:$0xff] }
0x1e1b   :  { %v2628_v22 = vpop.f32.mrb[72].mxu1 }
0x1e1c   :  { %v3580_v6 = vpack.i.bf16 %v2628_v22, %v2580_v16  ;;  %v3494_v23 = vpop.f32.mrb[73].mxu1 }
0x1e1d   :  { %v2631_v26 = vpop.f32.mrb[74].mxu1 }
0x1e1e   :  { %3581 = vrot.lane.b32.xlu1 %v3580_v6, %s4644_s29  ;;  %v3495_v40 = vpop.f32.mrb[75].mxu1 }
0x1e1f   :  { %v3607_v40 = vld [vmem:[%s4633_s7 + $0x50] sm:$0xff]  }
0x1e90   :  { %v3582_v33 = vpop.permute.xlu1 %3581 }
0x1e91   :  { %v3584_v37 = vunpack.i.h.bf16 %v3582_v33  ;;  %v3583_v38 = vunpack.i.l.bf16 %v3582_v33 }
0x1e93   :  { %v2663_v39 = vsel %vm1219_vm6, %v2661_v41, %v3584_v37  ;;  %v2662_v19 = vsel %vm1219_vm6, %v2660_v45, %v3583_v38 }
0x1e94   :  { %v2664_v48 = vpack.c.bf16 %v2663_v39, %v2662_v19 }
0x1e96   :  { %3501 = vmatmul.mubr.msk.bf16.vlgmr.msra.gmra.mrb[72].mxu0 %vm57_vm0, %v2664_v48 }
0x1e97   :  { %3528 = vmatprep.mubr.msk.bf16.mxu0 %vm3736_vm1, %v3735_v9  ;;  %3513 = vmatpush3.bf16.msra.mxu0 %v3605_v27 }
0x1e98   :  { %3514 = vmatprep.subr.bf16.mxu0 %v3735_v9 }
0x1e9b   :  { %3515 = vmatpush3.bf16.msra.mxu0 %v3606_v18 }
0x1e9c   :  { %3516 = vmatprep.subr.bf16.mxu0 %v3735_v9 }
0x1e9f   :  { %3517 = vmatpush3.bf16.msra.mxu0 %v3607_v40 }
0x1ea0   :  { %3518 = vmatprep.subr.bf16.mxu0 %v3735_v9 }
0x1ea3   :  { %3519 = vmatpush3.bf16.msra.mxu0 %v3608_v46 }
0x1ea4   :  { %3520 = vmatprep.subr.bf16.mxu0 %v3735_v9 }
0x1ea7   :  { %3521 = vmatpush3.bf16.msra.mxu0 %v3609_v50 }
0x1ea8   :  { %3522 = vmatprep.subr.bf16.mxu0 %v3735_v9 }
0x1eab   :  { %3523 = vmatpush3.bf16.msra.mxu0 %v3610_v3 }
0x1eac   :  { %3524 = vmatprep.subr.bf16.mxu0 %v3735_v9 }
0x1eaf   :  { %3525 = vmatpush3.bf16.msra.mxu0 %v3611_v62 }
0x1eb0   :  { %3526 = vmatprep.subr.bf16.mxu0 %v3735_v9 }
0x1eb3   :  { %3527 = vmatpush3.bf16.msra.mxu0 %v3612_v1 }
0x1f69   :  { %v2719_v52 = vpop.f32.mrb[72].mxu0 }
0x1f6a   :  { %v2726_v28 = vadd.f32 %v2719_v52, %v4221_v42  ;;  %v3502_v29 = vpop.f32.mrb[73].mxu0 }
0x1f6b   :  { %v2722_v51 = vpop.f32.mrb[74].mxu0 }
0x1f6c   :  { %v4531_v31 = vadd.f32 %v3114_v25, %v2726_v28  ;;  %v2727_v30 = vadd.f32 %v2722_v51, %v4224_v47  ;;  %v3503_v53 = vpop.f32.mrb[75].mxu0 }
0x1f6e   :  { %v4534_v54 = vadd.f32 %v3114_v25, %v2727_v30  ;;  %v2737_v34 = vsel %vm57_vm0, %v4531_v31, 0.0  ;;  %v2745_v57 = vmul.f32 %v4531_v31, %v4531_v31 }
0x1f6f   :  { %2738 = vadd.xlane.f32.xlu0 %v2737_v34  ;;  %v3149_v34 = vld [vmem:[%s4629_s3 + $0xf] ss:$0 sm:$0xff] }
0x1f70   :  { %v2740_v59 = vsel %vm57_vm0, %v4534_v54, 0.0  ;;  %v2747_v42 = vsel %vm57_vm0, %v2745_v57, 0.0  ;;  %v2746_v0 = vmul.f32 %v4534_v54, %v4534_v54 }
0x1f71   :  { %2741 = vadd.xlane.f32.xlu1 %v2740_v59 }
0x1f72   :  { %v2750_v47 = vsel %vm57_vm0, %v2746_v0, 0.0 }
0x1f73   :  { %2748 = vadd.xlane.f32.xlu0 %v2747_v42 }
0x1f77   :  { %2751 = vadd.xlane.f32.xlu0 %v2750_v47 }
0x1ffc   :  { %v2739_v55 = vpop.xlane.xlu0 %2738 }
0x1ffd   :  { %v2743_v20 = vmul.f32 0.03125, %v2739_v55 }
0x1ffe   :  { %v2742_v4 = vpop.xlane.xlu1 %2741 }
0x1fff   :  { %v2757_v5 = vmul.f32 %v2743_v20, %v2743_v20  ;;  %v2744_v7 = vmul.f32 0.03125, %v2742_v4  ;;  %v2755_v15 = vsub.f32 %v4531_v31, %v2743_v20 }
0x2000   :  { %v2749_v24 = vpop.xlane.xlu0 %2748 }
0x2001   :  { %v2753_v43 = vmul.f32 0.03125, %v2749_v24  ;;  %v2758_v49 = vmul.f32 %v2744_v7, %v2744_v7  ;;  %v2756_v16 = vsub.f32 %v4534_v54, %v2744_v7 }
0x2003   :  { %v2759_v10 = vsub.f32 %v2753_v43, %v2757_v5 }
0x2004   :  { %v2752_v8 = vpop.xlane.xlu0 %2751 }
0x2005   :  { %v2761_v11 = vadd.f32 1e-05, %v2759_v10  ;;  %v2754_v12 = vmul.f32 0.03125, %v2752_v8 }
0x2007   :  { %3693 = vrsqrt.f32 %v2761_v11  ;;  %v2760_v13 = vsub.f32 %v2754_v12, %v2758_v49 }
0x2009   :  { %v2762_v56 = vadd.f32 1e-05, %v2760_v13 }
0x200b   :  { %3695 = vrsqrt.f32 %v2762_v56 }
0x2011   :  { %v3694_v14 = vpop.eup %3693 }
0x2012   :  { %v2769_v61 = vmul.f32 %v3694_v14, %v3115_v60 }
0x2014   :  { %v2771_v21 = vmul.f32 %v2769_v61, %v2755_v15  ;;  %v3150_v61 = vld [vmem:[%s4629_s3 + $0x10] ss:$0 sm:$0xff] }
0x2015   :  { %v3696_v58 = vpop.eup %3695 }
0x2016   :  { %v2770_v17 = vmul.f32 %v3696_v58, %v3115_v60  ;;  %v2777_v6 = vadd.f32 %v3116_v63, %v2771_v21  ;;  %v3151_v21 = vld [vmem:[%s4629_s3 + $0x11] ss:$0 sm:$0xff] }
0x2018   :  { %v2772_v22 = vmul.f32 %v2770_v17, %v2756_v16 }
0x201a   :  { %v2778_v23 = vadd.f32 %v3116_v63, %v2772_v22 }
0x201c   :  { %v2779_v26 = vpack.c.bf16 %v2778_v23, %v2777_v6 }
0x201e   :  { %3509 = vmatmul.mubr.msk.bf16.vlgmr.msra.gmra.mrb[76].mxu1 %vm57_vm0, %v2779_v26 }
0x20f1   :  { %v2839_v33 = vpop.f32.mrb[76].mxu1 }
0x20f2   :  { %v2840_v35 = vadd.f32 %v3121_v32, %v2839_v33  ;;  %v3510_v36 = vpop.f32.mrb[77].mxu1 }
0x20f3   :  { %v2842_v37 = vpop.f32.mrb[78].mxu1 }
0x20f4   :  { %v2848_v38 = vmul.f32 0.70710677, %v2840_v35  ;;  %v2843_v41 = vadd.f32 %v3121_v32, %v2842_v37  ;;  %v3511_v45 = vpop.f32.mrb[79].mxu1  ;;  %v2846_v52 = vmul.f32 0.5, %v2840_v35 }
0x20f6   :  { %3697 = verf.f32 %v2848_v38  ;;  %v2849_v39 = vmul.f32 0.70710677, %v2843_v41  ;;  %v2847_v25 = vmul.f32 0.5, %v2843_v41 }
0x20f8   :  { %3699 = verf.f32 %v2849_v39 }
0x2100   :  { %v3698_v9 = vpop.eup %3697 }
0x2101   :  { %v2852_v19 = vadd.f32 1.0, %v3698_v9 }
0x2102   :  { %v3700_v48 = vpop.eup %3699 }
0x2103   :  { %v2853_v28 = vadd.f32 1.0, %v3700_v48  ;;  %v2854_v29 = vmul.f32 %v2852_v19, %v2846_v52 }
0x2105   :  { %v2855_v51 = vmul.f32 %v2853_v28, %v2847_v25 }
0x2107   :  { %v2856_v30 = vpack.c.bf16 %v2855_v51, %v2854_v29 }
0x2109   :  { %3529 = vmatmul.mubr.bf16.vlgmr.msra.gmra.mrb[76].mxu0 %v2856_v30 }
0x21dc   :  { %v2956_v53 = vpop.f32.mrb[76].mxu0 }
0x21dd   :  { %v2963_v57 = vadd.f32 %v2956_v53, %v4531_v31  ;;  %v3530_v59 = vpop.f32.mrb[77].mxu0 }
0x21de   :  { %v2959_v42 = vpop.f32.mrb[78].mxu0 }
0x21df   :  { %v2970_v0 = vadd.f32 %v3149_v34, %v2963_v57  ;;  %v2964_v47 = vadd.f32 %v2959_v42, %v4534_v54  ;;  %v3531_v44 = vpop.f32.mrb[79].mxu0 }
0x21e1   :  { %v2971_v2 = vadd.f32 %v3149_v34, %v2964_v47  ;;  %v2974_v27 = vsel %vm57_vm0, %v2970_v0, 0.0  ;;  %v2982_v18 = vmul.f32 %v2970_v0, %v2970_v0 }
0x21e2   :  { %2975 = vadd.xlane.f32.xlu0 %v2974_v27 }
0x21e3   :  { %v2977_v55 = vsel %vm57_vm0, %v2971_v2, 0.0  ;;  %v2983_v20 = vmul.f32 %v2971_v2, %v2971_v2  ;;  %v2984_v4 = vsel %vm57_vm0, %v2982_v18, 0.0 }
0x21e4   :  { %2978 = vadd.xlane.f32.xlu1 %v2977_v55 }
0x21e5   :  { %v2987_v31 = vsel %vm57_vm0, %v2983_v20, 0.0 }
0x21e6   :  { %2985 = vadd.xlane.f32.xlu0 %v2984_v4 }
0x21e8   :  { %2988 = vadd.xlane.f32.xlu1 %v2987_v31 }
0x226f   :  { %v2976_v24 = vpop.xlane.xlu0 %2975 }
0x2270   :  { %v2980_v5 = vmul.f32 0.03125, %v2976_v24 }
0x2271   :  { %v2979_v7 = vpop.xlane.xlu1 %2978 }
0x2272   :  { %v2981_v54 = vmul.f32 0.03125, %v2979_v7  ;;  %v2994_v10 = vmul.f32 %v2980_v5, %v2980_v5  ;;  %v2992_v58 = vsub.f32 %v2970_v0, %v2980_v5 }
0x2273   :  { %v2986_v43 = vpop.xlane.xlu0 %2985 }
0x2274   :  { %v2990_v8 = vmul.f32 0.03125, %v2986_v43  ;;  %v2995_v11 = vmul.f32 %v2981_v54, %v2981_v54  ;;  %v2993_v63 = vsub.f32 %v2971_v2, %v2981_v54 }
0x2275   :  { %v2989_v49 = vpop.xlane.xlu1 %2988 }
0x2276   :  { %v2996_v12 = vsub.f32 %v2990_v8, %v2994_v10  ;;  %v2991_v13 = vmul.f32 0.03125, %v2989_v49 }
0x2278   :  { %v2998_v56 = vadd.f32 1e-05, %v2996_v12  ;;  %v2997_v60 = vsub.f32 %v2991_v13, %v2995_v11 }
0x227a   :  { %3701 = vrsqrt.f32 %v2998_v56  ;;  %v2999_v14 = vadd.f32 1e-05, %v2997_v60 }
0x227c   :  { %3703 = vrsqrt.f32 %v2999_v14 }
0x2284   :  { %v3702_v15 = vpop.eup %3701 }
0x2285   :  { %v3006_v16 = vmul.f32 %v3702_v15, %v3150_v61 }
0x2286   :  { %v3704_v17 = vpop.eup %3703 }
0x2287   :  { %v3007_v22 = vmul.f32 %v3704_v17, %v3150_v61  ;;  %v3008_v6 = vmul.f32 %v3006_v16, %v2992_v58 }
0x2289   :  { %v3009_v23 = vmul.f32 %v3007_v22, %v2993_v63  ;;  %v3014_v26 = vadd.f32 %v3151_v21, %v3008_v6 }
0x228b   :  { %v3015_v40 = vadd.f32 %v3151_v21, %v3009_v23  ;;  %3016 = vst.msk [vmem:[#allocation2] sm:$0xff] %vm57_vm0, %v3014_v26 }
0x228d   :  { %3017 = vst.msk [vmem:[#allocation2 + $0x8] sm:$0xff] %vm57_vm0, %v3015_v40 }
0x228e   :  { %3722 = shalt.err (!%p3719_p4)
}
0x228f   :  { %s3723_s6 = scalar_lea.hbm %s4634_s8, 256 }
0x2290   :  { %p3724_p5 = scmp.ne.s32.totalorder %s4634_s8, %s3723_s6  ;;  %p3727_p6 = scmp.lt.u32.totalorder %s3723_s6, %s4634_s8 }
0x2292   :  { %p3729_p7 = pnand %p3727_p6, %p3724_p5 }
0x2294   :  { %3732 = shalt.err (!%p3729_p7)
}
0x2295   :  { %s3757_s28 = smov 128  }
0x2296   :  { %3029 = dma.vmem_to_hbm [thread:$0]  %s3024_s0, 256, %s4634_s8, [#allocation3], %s3757_s28, %s3757_s28, %s4642_s21  }
0x2297   :  { %3733 = dma.done.wait [#allocation3], 256  }
0x2298   :  { %3734 = vsyncadd [#allocation3], 4294967040 }
0x2299   :  { %3033 = vsyncpa [#allocation3], 1 }

</bundles_post_ra>
